<compile_context>
chip_gen: v5e
topology: v5e:2x2
jax: 0.10.0
libtpu: 0.0.40
codegen_flags: <defaults>
</compile_context>

<pallas_src>
import functools
import math

import jax
import jax.numpy as jnp
from jax.experimental import pallas as pl
from jax.experimental.pallas import tpu as pltpu

D_MODEL = 128
N_HEADS = 4
HEAD_DIM = D_MODEL // N_HEADS
DIM_FF = 256
NUM_LAYERS = 2
EPS = 1e-6  # layer_norm_eps
NEG_INF = -1e30  # finite sentinel (avoids NaN rows if a query has all keys masked)


# ----------------------------------------------------------------------------- kernel
def _decoder_kernel(x_ref, enc_ref, dm_ref, em_ref,
                    wa_ref, w1_ref, w2_ref, v_ref, out_ref,
                    *, n_heads, num_layers):
    # Per grid step (one batch block):
    #   x_ref:   (Bb, T, D)  target embeddings
    #   enc_ref: (Bb, S, D)  encoder output
    #   dm_ref:  (Bb, T, T)  self-attn mask (1 keep / 0 mask)
    #   em_ref:  (Bb, T, S)  cross-attn mask
    #   wa_ref:  (L, 2, D, 4D) bf16   [Wq.T | Wk.T | Wv.T | Wo.T] per (layer, self/cross)
    #   w1_ref:  (L, D, F) bf16, w2_ref: (L, F, D) bf16
    #   v_ref:   (L, 8, 4D) f32 packed norms/biases (see pack_for_kernel for row layout)
    Bb, T, D = x_ref.shape
    S = enc_ref.shape[1]
    F = w1_ref.shape[-1]
    hd = D // n_heads
    N = Bb * T

    y = x_ref[...].astype(jnp.float32).reshape(N, D)          # residual stream
    enc = enc_ref[...].astype(jnp.float32).reshape(Bb * S, D)

    # Additive mask biases, built once (0 keep / -1e30 masked).
    d_bias = jnp.where(dm_ref[...] == 0, NEG_INF, 0.0).astype(jnp.float32)  # (Bb,T,T)
    e_bias = jnp.where(em_ref[...] == 0, NEG_INF, 0.0).astype(jnp.float32)  # (Bb,T,S)

    inv_scale = 1.0 / math.sqrt(float(D))  # module divides scores by d_model ** 0.5

    def ln(v, g, b):
        mu = jnp.mean(v, axis=-1, keepdims=True)
        var = jnp.mean(jnp.square(v - mu), axis=-1, keepdims=True)
        return (v - mu) * jax.lax.rsqrt(var + EPS) * g + b

    def bdot(a, w):
        # bf16 operands (native MXU), f32 accumulation.
        return jnp.dot(a.astype(jnp.bfloat16), w.astype(jnp.bfloat16),
                       preferred_element_type=jnp.float32)

    def heads_attention(q, k, v, bias, n_kv):
        # q: (N, D), k/v: (Bb*n_kv, D), bias: (Bb, T, n_kv)
        outs = []
        for h in range(n_heads):  # only the tiny score / PV products stay per-head
            sl = slice(h * hd, (h + 1) * hd)
            qh = q[:, sl].reshape(Bb, T, hd)
            kh = k[:, sl].reshape(Bb, n_kv, hd)
            vh = v[:, sl].reshape(Bb, n_kv, hd)
            s = jnp.einsum("btd,bsd->bts",
                           qh.astype(jnp.bfloat16), kh.astype(jnp.bfloat16),
                           preferred_element_type=jnp.float32) * inv_scale + bias
            m = jnp.max(s, axis=-1, keepdims=True)
            e = jnp.exp(s - m)
            p = e * pl.reciprocal(jnp.sum(e, axis=-1, keepdims=True), approx=True)
            oh = jnp.einsum("bts,bsd->btd",
                            p.astype(jnp.bfloat16), vh.astype(jnp.bfloat16),
                            preferred_element_type=jnp.float32)
            outs.append(oh.reshape(N, hd))
        return jnp.concatenate(outs, axis=-1)  # (N, D)

    for l in range(num_layers):
        # ---- per-layer packed parameter slices (all static offsets) ----
        w_sa = wa_ref[l, 0]                        # (D, 4D)
        w_ca = wa_ref[l, 1]
        w1 = w1_ref[l]                             # (D, F)
        w2 = w2_ref[l]                             # (F, D)
        g_mha = v_ref[l, 0:1, 0:D];        b_mha = v_ref[l, 0:1, D:2 * D]
        g_ca = v_ref[l, 0:1, 2 * D:3 * D]; b_ca = v_ref[l, 0:1, 3 * D:4 * D]
        g_ff = v_ref[l, 1:2, 0:D];         b_ff = v_ref[l, 1:2, D:2 * D]
        b2 = v_ref[l, 1:2, 2 * D:3 * D]
        bqkv_sa = v_ref[l, 2:3, 0:3 * D];  bo_sa = v_ref[l, 2:3, 3 * D:4 * D]
        bq_ca = v_ref[l, 3:4, 0:D]
        bkv_ca = v_ref[l, 3:4, D:3 * D];   bo_ca = v_ref[l, 3:4, 3 * D:4 * D]
        b1 = v_ref[l, 4:5, 0:F]

        # ---- self-attention sub-layer (pre-norm + residual) ----
        xn = ln(y, g_mha, b_mha)
        qkv = bdot(xn, w_sa[:, 0:3 * D]) + bqkv_sa               # one fused QKV matmul
        q, k, v = qkv[:, 0:D], qkv[:, D:2 * D], qkv[:, 2 * D:3 * D]
        ctx = heads_attention(q, k, v, d_bias, T)
        y = y + bdot(ctx, w_sa[:, 3 * D:4 * D]) + bo_sa          # single output proj

        # ---- cross-attention sub-layer ----
        xn = ln(y, g_ca, b_ca)
        qc = bdot(xn, w_ca[:, 0:D]) + bq_ca
        kvc = bdot(enc, w_ca[:, D:3 * D]) + bkv_ca               # fused K|V matmul
        kc, vc = kvc[:, 0:D], kvc[:, D:2 * D]
        ctx = heads_attention(qc, kc, vc, e_bias, S)
        y = y + bdot(ctx, w_ca[:, 3 * D:4 * D]) + bo_ca

        # ---- feed-forward sub-layer (ReLU) ----
        xn = ln(y, g_ff, b_ff)
        h1 = jnp.maximum(bdot(xn, w1) + b1, 0.0)
        y = y + bdot(h1, w2) + b2
        # TODO(synk): dropout / dropout_mha / dropout_ff omitted — identity in eval mode.

    # ---- final decoder LayerNorm (stored in layer-0 slot, row 5) ----
    g_fin = v_ref[0, 5:6, 0:D]
    b_fin = v_ref[0, 5:6, D:2 * D]
    y = ln(y, g_fin, b_fin)

    out_ref[...] = y.reshape(Bb, T, D).astype(out_ref.dtype)


# ----------------------------------------------------------------------------- wrapper
def transformer_decoder_pallas(x, enc, d_mask, e_mask, packed, *,
                               n_heads=N_HEADS, num_layers=NUM_LAYERS, b_blk=None):
    B, T, D = x.shape
    S = enc.shape[1]
    if b_blk is None:
        b_blk = B if B <= 8 else 8
    assert B % b_blk == 0, "batch must be divisible by the batch block"
    grid = (B // b_blk,)

    w_attn = packed["w_attn"]
    w_ff1 = packed["w_ff1"]
    w_ff2 = packed["w_ff2"]
    v_slab = packed["v_slab"]

    kernel = functools.partial(_decoder_kernel, n_heads=n_heads, num_layers=num_layers)

    return pl.pallas_call(
        kernel,
        out_shape=jax.ShapeDtypeStruct((B, T, D), x.dtype),
        grid=grid,
        in_specs=[
            pl.BlockSpec((b_blk, T, D), lambda b: (b, 0, 0)),
            pl.BlockSpec((b_blk, S, D), lambda b: (b, 0, 0)),
            pl.BlockSpec((b_blk, T, T), lambda b: (b, 0, 0)),
            pl.BlockSpec((b_blk, T, S), lambda b: (b, 0, 0)),
            # parameter slabs: full blocks, constant index -> loaded once, stay resident
            pl.BlockSpec(w_attn.shape, lambda b: (0, 0, 0, 0)),
            pl.BlockSpec(w_ff1.shape, lambda b: (0, 0, 0)),
            pl.BlockSpec(w_ff2.shape, lambda b: (0, 0, 0)),
            pl.BlockSpec(v_slab.shape, lambda b: (0, 0, 0)),
        ],
        out_specs=pl.BlockSpec((b_blk, T, D), lambda b: (b, 0, 0)),
        compiler_params=pltpu.CompilerParams(dimension_semantics=("parallel",)),
    )(x, enc, d_mask, e_mask, w_attn, w_ff1, w_ff2, v_slab)


# -------------------------------------------------------------------- params (torch layout)
def init_decoder_params(key, num_layers):
    def lin(k, out_f, in_f):  # torch nn.Linear layout: W (out, in), b (out,)
        k1, k2 = jax.random.split(k)
        w = jax.random.normal(k1, (out_f, in_f), jnp.float32) / math.sqrt(in_f)
        b = jax.random.normal(k2, (out_f,), jnp.float32) * 0.02
        return w, b

    def norm(k, d):  # non-trivial gamma/beta to exercise the LN path
        k1, k2 = jax.random.split(k)
        g = 1.0 + 0.1 * jax.random.normal(k1, (d,), jnp.float32)
        b = 0.1 * jax.random.normal(k2, (d,), jnp.float32)
        return g, b

    keys = jax.random.split(key, num_layers + 1)
    layers = []
    for lk in keys[:num_layers]:
        ks = jax.random.split(lk, 13)
        layers.append({
            "mha_norm": norm(ks[0], D_MODEL),
            "ca_norm": norm(ks[1], D_MODEL),
            "ff_norm": norm(ks[2], D_MODEL),
            "mha": {"q": lin(ks[3], D_MODEL, D_MODEL), "k": lin(ks[4], D_MODEL, D_MODEL),
                    "v": lin(ks[5], D_MODEL, D_MODEL), "o": lin(ks[6], D_MODEL, D_MODEL)},
            "ca": {"q": lin(ks[7], D_MODEL, D_MODEL), "k": lin(ks[8], D_MODEL, D_MODEL),
                   "v": lin(ks[9], D_MODEL, D_MODEL), "o": lin(ks[10], D_MODEL, D_MODEL)},
            "ff": {"w1": lin(ks[11], DIM_FF, D_MODEL), "w2": lin(ks[12], D_MODEL, DIM_FF)},
        })
    return {"layers": layers, "final_norm": norm(keys[-1], D_MODEL)}


def pack_for_kernel(params):
    """Pack torch-layout params into 4 lane-dense slabs.

    v_slab row layout (per layer, width 4*D):
      0: [g_mha | b_mha | g_ca | b_ca]
      1: [g_ff  | b_ff  | b2   | 0   ]
      2: [bq_sa | bk_sa | bv_sa| bo_sa]
      3: [bq_ca | bk_ca | bv_ca| bo_ca]
      4: [b1 (F) | 0 ...]
      5: [final_gamma | final_beta | 0 | 0]   (layer 0 slot only)
      6,7: zero padding (8-sublane alignment)
    """
    D, F = D_MODEL, DIM_FF
    assert F <= 4 * D
    zD = jnp.zeros((D,), jnp.float32)
    w_attn, w1s, w2s, vrows = [], [], [], []
    for l, p in enumerate(params["layers"]):
        blocks, brow_sa, brow_ca = [], [], []
        for name, brow in (("mha", brow_sa), ("ca", brow_ca)):
            Wq, bq = p[name]["q"]; Wk, bk = p[name]["k"]
            Wv, bv = p[name]["v"]; Wo, bo = p[name]["o"]
            blocks.append(jnp.concatenate([Wq.T, Wk.T, Wv.T, Wo.T], axis=1))  # (D, 4D)
            brow.extend([bq, bk, bv, bo])
        w_attn.append(jnp.stack(blocks))                                      # (2, D, 4D)

        W1, b1 = p["ff"]["w1"]; W2, b2 = p["ff"]["w2"]
        w1s.append(W1.T)   # (D, F)
        w2s.append(W2.T)   # (F, D)

        g_mha, b_mha = p["mha_norm"]; g_ca, b_ca = p["ca_norm"]; g_ff, b_ff = p["ff_norm"]
        g_fin, b_fin = params["final_norm"] if l == 0 else (zD, zD)
        rows = [
            jnp.concatenate([g_mha, b_mha, g_ca, b_ca]),
            jnp.concatenate([g_ff, b_ff, b2, zD]),
            jnp.concatenate(brow_sa),
            jnp.concatenate(brow_ca),
            jnp.concatenate([b1, jnp.zeros((4 * D - F,), jnp.float32)]),
            jnp.concatenate([g_fin, b_fin, zD, zD]),
            jnp.zeros((4 * D,), jnp.float32),
            jnp.zeros((4 * D,), jnp.float32),
        ]
        vrows.append(jnp.stack(rows))                                         # (8, 4D)

    return {
        "w_attn": jnp.stack(w_attn).astype(jnp.bfloat16),   # (L, 2, D, 4D)
        "w_ff1": jnp.stack(w1s).astype(jnp.bfloat16),       # (L, D, F)
        "w_ff2": jnp.stack(w2s).astype(jnp.bfloat16),       # (L, F, D)
        "v_slab": jnp.stack(vrows),                         # (L, 8, 4D) f32
    }


# ----------------------------------------------------------------------------- reference
def decoder_ref(x, enc, d_mask, e_mask, params):
    D = x.shape[-1]

    def ln(v, gb):
        g, b = gb
        m = v.mean(-1, keepdims=True)
        var = ((v - m) ** 2).mean(-1, keepdims=True)
        return (v - m) / jnp.sqrt(var + EPS) * g + b

    def mha(q_in, kv_in, attn, mask):
        B, T, _ = q_in.shape
        S = kv_in.shape[1]
        hd = D // N_HEADS
        Wq, bq = attn["q"]; Wk, bk = attn["k"]; Wv, bv = attn["v"]; Wo, bo = attn["o"]
        q = (q_in @ Wq.T + bq).reshape(B, T, N_HEADS, hd).transpose(0, 2, 1, 3)
        k = (kv_in @ Wk.T + bk).reshape(B, S, N_HEADS, hd).transpose(0, 2, 1, 3)
        v = (kv_in @ Wv.T + bv).reshape(B, S, N_HEADS, hd).transpose(0, 2, 1, 3)
        s = jnp.einsum("bhtd,bhsd->bhts", q, k) / math.sqrt(D)
        s = jnp.where(mask[:, None] == 0, -jnp.inf, s)
        p = jax.nn.softmax(s, axis=-1)
        o = jnp.einsum("bhts,bhsd->bhtd", p, v).transpose(0, 2, 1, 3).reshape(B, T, D)
        return o @ Wo.T + bo

    out = x
    for p in params["layers"]:
        sa_in = ln(out, p["mha_norm"])
        out = out + mha(sa_in, sa_in, p["mha"], d_mask)
        ca_in = ln(out, p["ca_norm"])
        out = out + mha(ca_in, enc, p["ca"], e_mask)
        ff_in = ln(out, p["ff_norm"])
        W1, b1 = p["ff"]["w1"]; W2, b2 = p["ff"]["w2"]
        out = out + (jnp.maximum(ff_in @ W1.T + b1, 0.0) @ W2.T + b2)
    return ln(out, params["final_norm"])


# ----------------------------------------------------------------------------- main
if __name__ == "__main__":
    key = jax.random.PRNGKey(0)
    k_x, k_e, k_p = jax.random.split(key, 3)

    B, T, S = 2, 8, 8
    x = jax.random.normal(k_x, (B, T, D_MODEL), jnp.float32)
    enc = jax.random.normal(k_e, (B, S, D_MODEL), jnp.float32)
    d_mask = jnp.broadcast_to(jnp.tril(jnp.ones((T, T), jnp.float32)), (B, T, T))
    e_mask = jnp.ones((B, T, S), jnp.float32).at[1, :, S - 2:].set(0.0)

    params = init_decoder_params(k_p, NUM_LAYERS)
    packed = pack_for_kernel(params)

    out = transformer_decoder_pallas(x, enc, d_mask, e_mask, packed)
    out = jax.block_until_ready(out)

    # f32 "highest"-precision ground truth (kernel runs native-bf16 MXU matmuls).
    with jax.default_matmul_precision("highest"):
        ref = jax.block_until_ready(decoder_ref(x, enc, d_mask, e_mask, params))

    assert out.shape == (B, T, D_MODEL)
    err = float(jnp.max(jnp.abs(out - ref)))
    # Tolerance covers bf16 operand rounding of the MXU matmuls (+ approx reciprocal).
    assert jnp.allclose(out, ref, atol=5e-2, rtol=5e-2), f"max abs err {err}"
    print("KERNEL_OK")
</pallas_src>

<mosaic_0001>
module attributes {stable_mosaic.version = 11 : i64} {
  func.func @_decoder_kernel(%arg0: i32, %arg1: memref<2x8x128xf32, #tpu.memory_space<vmem>>, %arg2: memref<2x8x128xf32, #tpu.memory_space<vmem>>, %arg3: memref<2x8x8xf32, #tpu.memory_space<vmem>>, %arg4: memref<2x8x8xf32, #tpu.memory_space<vmem>>, %arg5: memref<2x2x128x512xbf16, #tpu.memory_space<vmem>>, %arg6: memref<2x128x256xbf16, #tpu.memory_space<vmem>>, %arg7: memref<2x256x128xbf16, #tpu.memory_space<vmem>>, %arg8: memref<2x8x512xf32, #tpu.memory_space<vmem>>, %arg9: memref<2x8x128xf32, #tpu.memory_space<vmem>>) attributes {dimension_semantics = [#tpu.dimension_semantics<parallel>], iteration_bounds = array<i64: 1>, scalar_prefetch = 0 : i64, scratch_operands = 0 : i64, tpu.core_type = #tpu.core_type<tc>, window_params = [{transform_indices = @transform_0, window_bounds = array<i64: 2, 8, 128>}, {transform_indices = @transform_1, window_bounds = array<i64: 2, 8, 128>}, {transform_indices = @transform_2, window_bounds = array<i64: 2, 8, 8>}, {transform_indices = @transform_3, window_bounds = array<i64: 2, 8, 8>}, {pipeline_mode = #tpu.pipeline_mode<synchronous>, transform_indices = @transform_4, window_bounds = array<i64: 2, 2, 128, 512>}, {pipeline_mode = #tpu.pipeline_mode<synchronous>, transform_indices = @transform_5, window_bounds = array<i64: 2, 128, 256>}, {pipeline_mode = #tpu.pipeline_mode<synchronous>, transform_indices = @transform_6, window_bounds = array<i64: 2, 256, 128>}, {pipeline_mode = #tpu.pipeline_mode<synchronous>, transform_indices = @transform_7, window_bounds = array<i64: 2, 8, 512>}, {transform_indices = @transform_8, window_bounds = array<i64: 2, 8, 128>}]} {
    %c0 = arith.constant 0 : index
    %c0_0 = arith.constant 0 : index
    %c0_1 = arith.constant 0 : index
    %0 = vector.load %arg1[%c0, %c0_0, %c0_1] : memref<2x8x128xf32, #tpu.memory_space<vmem>>, vector<2x8x128xf32>
    %1 = vector.shape_cast %0 : vector<2x8x128xf32> to vector<16x128xf32>
    %c0_2 = arith.constant 0 : index
    %c0_3 = arith.constant 0 : index
    %c0_4 = arith.constant 0 : index
    %2 = vector.load %arg2[%c0_2, %c0_3, %c0_4] : memref<2x8x128xf32, #tpu.memory_space<vmem>>, vector<2x8x128xf32>
    %3 = vector.shape_cast %2 : vector<2x8x128xf32> to vector<16x128xf32>
    %c0_5 = arith.constant 0 : index
    %c0_6 = arith.constant 0 : index
    %c0_7 = arith.constant 0 : index
    %4 = vector.load %arg3[%c0_5, %c0_6, %c0_7] : memref<2x8x8xf32, #tpu.memory_space<vmem>>, vector<2x8x8xf32>
    %cst = arith.constant 0.000000e+00 : f32
    %5 = vector.broadcast %cst : f32 to vector<2x8x8xf32>
    %6 = arith.cmpf oeq, %4, %5 : vector<2x8x8xf32>
    %cst_8 = arith.constant -1.000000e+30 : f32
    %cst_9 = arith.constant 0.000000e+00 : f32
    %7 = vector.broadcast %cst_8 : f32 to vector<2x8x8xf32>
    %8 = vector.broadcast %cst_9 : f32 to vector<2x8x8xf32>
    %9 = arith.select %6, %7, %8 : vector<2x8x8xi1>, vector<2x8x8xf32>
    %c0_10 = arith.constant 0 : index
    %c0_11 = arith.constant 0 : index
    %c0_12 = arith.constant 0 : index
    %10 = vector.load %arg4[%c0_10, %c0_11, %c0_12] : memref<2x8x8xf32, #tpu.memory_space<vmem>>, vector<2x8x8xf32>
    %cst_13 = arith.constant 0.000000e+00 : f32
    %11 = vector.broadcast %cst_13 : f32 to vector<2x8x8xf32>
    %12 = arith.cmpf oeq, %10, %11 : vector<2x8x8xf32>
    %cst_14 = arith.constant -1.000000e+30 : f32
    %cst_15 = arith.constant 0.000000e+00 : f32
    %13 = vector.broadcast %cst_14 : f32 to vector<2x8x8xf32>
    %14 = vector.broadcast %cst_15 : f32 to vector<2x8x8xf32>
    %15 = arith.select %12, %13, %14 : vector<2x8x8xi1>, vector<2x8x8xf32>
    %c0_16 = arith.constant 0 : index
    %c0_17 = arith.constant 0 : index
    %c0_18 = arith.constant 0 : index
    %c0_19 = arith.constant 0 : index
    %16 = vector.load %arg5[%c0_16, %c0_17, %c0_18, %c0_19] : memref<2x2x128x512xbf16, #tpu.memory_space<vmem>>, vector<1x1x128x512xbf16>
    %17 = vector.shape_cast %16 : vector<1x1x128x512xbf16> to vector<128x512xbf16>
    %c0_20 = arith.constant 0 : index
    %c1 = arith.constant 1 : index
    %c0_21 = arith.constant 0 : index
    %c0_22 = arith.constant 0 : index
    %18 = vector.load %arg5[%c0_20, %c1, %c0_21, %c0_22] : memref<2x2x128x512xbf16, #tpu.memory_space<vmem>>, vector<1x1x128x512xbf16>
    %19 = vector.shape_cast %18 : vector<1x1x128x512xbf16> to vector<128x512xbf16>
    %c0_23 = arith.constant 0 : index
    %c0_24 = arith.constant 0 : index
    %c0_25 = arith.constant 0 : index
    %20 = vector.load %arg6[%c0_23, %c0_24, %c0_25] : memref<2x128x256xbf16, #tpu.memory_space<vmem>>, vector<1x128x256xbf16>
    %21 = vector.shape_cast %20 : vector<1x128x256xbf16> to vector<128x256xbf16>
    %c0_26 = arith.constant 0 : index
    %c0_27 = arith.constant 0 : index
    %c0_28 = arith.constant 0 : index
    %22 = vector.load %arg7[%c0_26, %c0_27, %c0_28] : memref<2x256x128xbf16, #tpu.memory_space<vmem>>, vector<1x256x128xbf16>
    %23 = vector.shape_cast %22 : vector<1x256x128xbf16> to vector<256x128xbf16>
    %c0_29 = arith.constant 0 : index
    %c0_30 = arith.constant 0 : index
    %c0_31 = arith.constant 0 : index
    %24 = vector.load %arg8[%c0_29, %c0_30, %c0_31] : memref<2x8x512xf32, #tpu.memory_space<vmem>>, vector<1x1x128xf32>
    %25 = vector.shape_cast %24 : vector<1x1x128xf32> to vector<1x128xf32>
    %c0_32 = arith.constant 0 : index
    %c0_33 = arith.constant 0 : index
    %c128 = arith.constant 128 : index
    %26 = vector.load %arg8[%c0_32, %c0_33, %c128] : memref<2x8x512xf32, #tpu.memory_space<vmem>>, vector<1x1x128xf32>
    %27 = vector.shape_cast %26 : vector<1x1x128xf32> to vector<1x128xf32>
    %c0_34 = arith.constant 0 : index
    %c0_35 = arith.constant 0 : index
    %c256 = arith.constant 256 : index
    %28 = vector.load %arg8[%c0_34, %c0_35, %c256] : memref<2x8x512xf32, #tpu.memory_space<vmem>>, vector<1x1x128xf32>
    %29 = vector.shape_cast %28 : vector<1x1x128xf32> to vector<1x128xf32>
    %c0_36 = arith.constant 0 : index
    %c0_37 = arith.constant 0 : index
    %c384 = arith.constant 384 : index
    %30 = vector.load %arg8[%c0_36, %c0_37, %c384] : memref<2x8x512xf32, #tpu.memory_space<vmem>>, vector<1x1x128xf32>
    %31 = vector.shape_cast %30 : vector<1x1x128xf32> to vector<1x128xf32>
    %c0_38 = arith.constant 0 : index
    %c1_39 = arith.constant 1 : index
    %c0_40 = arith.constant 0 : index
    %32 = vector.load %arg8[%c0_38, %c1_39, %c0_40] : memref<2x8x512xf32, #tpu.memory_space<vmem>>, vector<1x1x128xf32>
    %33 = vector.shape_cast %32 : vector<1x1x128xf32> to vector<1x128xf32>
    %c0_41 = arith.constant 0 : index
    %c1_42 = arith.constant 1 : index
    %c128_43 = arith.constant 128 : index
    %34 = vector.load %arg8[%c0_41, %c1_42, %c128_43] : memref<2x8x512xf32, #tpu.memory_space<vmem>>, vector<1x1x128xf32>
    %35 = vector.shape_cast %34 : vector<1x1x128xf32> to vector<1x128xf32>
    %c0_44 = arith.constant 0 : index
    %c1_45 = arith.constant 1 : index
    %c256_46 = arith.constant 256 : index
    %36 = vector.load %arg8[%c0_44, %c1_45, %c256_46] : memref<2x8x512xf32, #tpu.memory_space<vmem>>, vector<1x1x128xf32>
    %37 = vector.shape_cast %36 : vector<1x1x128xf32> to vector<1x128xf32>
    %c0_47 = arith.constant 0 : index
    %c2 = arith.constant 2 : index
    %c0_48 = arith.constant 0 : index
    %38 = vector.load %arg8[%c0_47, %c2, %c0_48] : memref<2x8x512xf32, #tpu.memory_space<vmem>>, vector<1x1x384xf32>
    %39 = vector.shape_cast %38 : vector<1x1x384xf32> to vector<1x384xf32>
    %c0_49 = arith.constant 0 : index
    %c2_50 = arith.constant 2 : index
    %c384_51 = arith.constant 384 : index
    %40 = vector.load %arg8[%c0_49, %c2_50, %c384_51] : memref<2x8x512xf32, #tpu.memory_space<vmem>>, vector<1x1x128xf32>
    %41 = vector.shape_cast %40 : vector<1x1x128xf32> to vector<1x128xf32>
    %c0_52 = arith.constant 0 : index
    %c3 = arith.constant 3 : index
    %c0_53 = arith.constant 0 : index
    %42 = vector.load %arg8[%c0_52, %c3, %c0_53] : memref<2x8x512xf32, #tpu.memory_space<vmem>>, vector<1x1x128xf32>
    %43 = vector.shape_cast %42 : vector<1x1x128xf32> to vector<1x128xf32>
    %c0_54 = arith.constant 0 : index
    %c3_55 = arith.constant 3 : index
    %c128_56 = arith.constant 128 : index
    %44 = vector.load %arg8[%c0_54, %c3_55, %c128_56] : memref<2x8x512xf32, #tpu.memory_space<vmem>>, vector<1x1x256xf32>
    %45 = vector.shape_cast %44 : vector<1x1x256xf32> to vector<1x256xf32>
    %c0_57 = arith.constant 0 : index
    %c3_58 = arith.constant 3 : index
    %c384_59 = arith.constant 384 : index
    %46 = vector.load %arg8[%c0_57, %c3_58, %c384_59] : memref<2x8x512xf32, #tpu.memory_space<vmem>>, vector<1x1x128xf32>
    %47 = vector.shape_cast %46 : vector<1x1x128xf32> to vector<1x128xf32>
    %c0_60 = arith.constant 0 : index
    %c4 = arith.constant 4 : index
    %c0_61 = arith.constant 0 : index
    %48 = vector.load %arg8[%c0_60, %c4, %c0_61] : memref<2x8x512xf32, #tpu.memory_space<vmem>>, vector<1x1x256xf32>
    %49 = vector.shape_cast %48 : vector<1x1x256xf32> to vector<1x256xf32>
    %cst_62 = arith.constant dense<0.000000e+00> : vector<16xf32>
    %50 = vector.multi_reduction <add>, %1, %cst_62 [1] : vector<16x128xf32> to vector<16xf32>
    %51 = vector.shape_cast %50 : vector<16xf32> to vector<16x1xf32>
    %cst_63 = arith.constant 1.280000e+02 : f32
    %52 = vector.broadcast %cst_63 : f32 to vector<16x1xf32>
    %53 = arith.divf %51, %52 : vector<16x1xf32>
    %54 = vector.broadcast %53 : vector<16x1xf32> to vector<16x128xf32>
    %55 = arith.subf %1, %54 : vector<16x128xf32>
    %56 = arith.mulf %55, %55 : vector<16x128xf32>
    %cst_64 = arith.constant dense<0.000000e+00> : vector<16xf32>
    %57 = vector.multi_reduction <add>, %56, %cst_64 [1] : vector<16x128xf32> to vector<16xf32>
    %58 = vector.shape_cast %57 : vector<16xf32> to vector<16x1xf32>
    %cst_65 = arith.constant 1.280000e+02 : f32
    %59 = vector.broadcast %cst_65 : f32 to vector<16x1xf32>
    %60 = arith.divf %58, %59 : vector<16x1xf32>
    %61 = vector.broadcast %53 : vector<16x1xf32> to vector<16x128xf32>
    %62 = arith.subf %1, %61 : vector<16x128xf32>
    %cst_66 = arith.constant 9.99999997E-7 : f32
    %63 = vector.broadcast %cst_66 : f32 to vector<16x1xf32>
    %64 = arith.addf %60, %63 : vector<16x1xf32>
    %65 = math.rsqrt %64 : vector<16x1xf32>
    %66 = vector.broadcast %65 : vector<16x1xf32> to vector<16x128xf32>
    %67 = arith.mulf %62, %66 : vector<16x128xf32>
    %68 = vector.broadcast %25 : vector<1x128xf32> to vector<16x128xf32>
    %69 = arith.mulf %67, %68 : vector<16x128xf32>
    %70 = vector.broadcast %27 : vector<1x128xf32> to vector<16x128xf32>
    %71 = arith.addf %69, %70 : vector<16x128xf32>
    %72 = vector.extract_strided_slice %17 {offsets = [0, 0], sizes = [128, 384], strides = [1, 1]} : vector<128x512xbf16> to vector<128x384xbf16>
    %73 = arith.truncf %71 : vector<16x128xf32> to vector<16x128xbf16>
    %cst_67 = arith.constant dense<0.000000e+00> : vector<16x384xf32>
    %74 = tpu.matmul %73, %72, %cst_67 {dimension_numbers = #tpu.dot_dimension_numbers<[1], [0], [0], [1], [0, 0, 1, 1], [], []>} : vector<16x128xbf16>, vector<128x384xbf16>, vector<16x384xf32> -> vector<16x384xf32>
    %75 = vector.broadcast %39 : vector<1x384xf32> to vector<16x384xf32>
    %76 = arith.addf %74, %75 : vector<16x384xf32>
    %77 = vector.extract_strided_slice %76 {offsets = [0, 0], sizes = [16, 128], strides = [1, 1]} : vector<16x384xf32> to vector<16x128xf32>
    %78 = vector.extract_strided_slice %76 {offsets = [0, 128], sizes = [16, 128], strides = [1, 1]} : vector<16x384xf32> to vector<16x128xf32>
    %79 = vector.extract_strided_slice %76 {offsets = [0, 256], sizes = [16, 128], strides = [1, 1]} : vector<16x384xf32> to vector<16x128xf32>
    %80 = vector.extract_strided_slice %77 {offsets = [0, 0], sizes = [16, 32], strides = [1, 1]} : vector<16x128xf32> to vector<16x32xf32>
    %81 = vector.shape_cast %80 : vector<16x32xf32> to vector<2x8x32xf32>
    %82 = vector.extract_strided_slice %78 {offsets = [0, 0], sizes = [16, 32], strides = [1, 1]} : vector<16x128xf32> to vector<16x32xf32>
    %83 = vector.shape_cast %82 : vector<16x32xf32> to vector<2x8x32xf32>
    %84 = vector.extract_strided_slice %79 {offsets = [0, 0], sizes = [16, 32], strides = [1, 1]} : vector<16x128xf32> to vector<16x32xf32>
    %85 = vector.shape_cast %84 : vector<16x32xf32> to vector<2x8x32xf32>
    %86 = arith.truncf %81 : vector<2x8x32xf32> to vector<2x8x32xbf16>
    %87 = arith.truncf %83 : vector<2x8x32xf32> to vector<2x8x32xbf16>
    "tpu.trace_start"() <{level = 10 : i32, message = "btd,bsd->bts"}> : () -> ()
    %cst_68 = arith.constant dense<0.000000e+00> : vector<2x8x8xf32>
    %88 = tpu.matmul %86, %87, %cst_68 {dimension_numbers = #tpu.dot_dimension_numbers<[2], [2], [1], [1], [0, 0, 0, 1, 1, 1], [0], [0]>} : vector<2x8x32xbf16>, vector<2x8x32xbf16>, vector<2x8x8xf32> -> vector<2x8x8xf32>
    "tpu.trace_stop"() : () -> ()
    %cst_69 = arith.constant 0.0883883461 : f32
    %89 = vector.broadcast %cst_69 : f32 to vector<2x8x8xf32>
    %90 = arith.mulf %88, %89 : vector<2x8x8xf32>
    %91 = arith.addf %90, %9 : vector<2x8x8xf32>
    %cst_70 = arith.constant dense<0xFF800000> : vector<2x8xf32>
    %92 = vector.multi_reduction <maximumf>, %91, %cst_70 [2] : vector<2x8x8xf32> to vector<2x8xf32>
    %93 = vector.shape_cast %92 : vector<2x8xf32> to vector<2x8x1xf32>
    %94 = vector.broadcast %93 : vector<2x8x1xf32> to vector<2x8x8xf32>
    %95 = arith.subf %91, %94 : vector<2x8x8xf32>
    %96 = math.exp %95 : vector<2x8x8xf32>
    %cst_71 = arith.constant dense<0.000000e+00> : vector<2x8xf32>
    %97 = vector.multi_reduction <add>, %96, %cst_71 [2] : vector<2x8x8xf32> to vector<2x8xf32>
    %98 = vector.shape_cast %97 : vector<2x8xf32> to vector<2x8x1xf32>
    %99 = tpu.reciprocal %98 {approx = true} : vector<2x8x1xf32> -> vector<2x8x1xf32>
    %100 = vector.broadcast %99 : vector<2x8x1xf32> to vector<2x8x8xf32>
    %101 = arith.mulf %96, %100 : vector<2x8x8xf32>
    %102 = arith.truncf %101 : vector<2x8x8xf32> to vector<2x8x8xbf16>
    %103 = arith.truncf %85 : vector<2x8x32xf32> to vector<2x8x32xbf16>
    "tpu.trace_start"() <{level = 10 : i32, message = "bts,bsd->btd"}> : () -> ()
    %cst_72 = arith.constant dense<0.000000e+00> : vector<2x8x32xf32>
    %104 = tpu.matmul %102, %103, %cst_72 {dimension_numbers = #tpu.dot_dimension_numbers<[2], [1], [1], [2], [0, 0, 0, 1, 1, 2], [0], [0]>} : vector<2x8x8xbf16>, vector<2x8x32xbf16>, vector<2x8x32xf32> -> vector<2x8x32xf32>
    "tpu.trace_stop"() : () -> ()
    %105 = vector.shape_cast %104 : vector<2x8x32xf32> to vector<16x32xf32>
    %106 = vector.extract_strided_slice %77 {offsets = [0, 32], sizes = [16, 32], strides = [1, 1]} : vector<16x128xf32> to vector<16x32xf32>
    %107 = vector.shape_cast %106 : vector<16x32xf32> to vector<2x8x32xf32>
    %108 = vector.extract_strided_slice %78 {offsets = [0, 32], sizes = [16, 32], strides = [1, 1]} : vector<16x128xf32> to vector<16x32xf32>
    %109 = vector.shape_cast %108 : vector<16x32xf32> to vector<2x8x32xf32>
    %110 = vector.extract_strided_slice %79 {offsets = [0, 32], sizes = [16, 32], strides = [1, 1]} : vector<16x128xf32> to vector<16x32xf32>
    %111 = vector.shape_cast %110 : vector<16x32xf32> to vector<2x8x32xf32>
    %112 = arith.truncf %107 : vector<2x8x32xf32> to vector<2x8x32xbf16>
    %113 = arith.truncf %109 : vector<2x8x32xf32> to vector<2x8x32xbf16>
    "tpu.trace_start"() <{level = 10 : i32, message = "btd,bsd->bts"}> : () -> ()
    %cst_73 = arith.constant dense<0.000000e+00> : vector<2x8x8xf32>
    %114 = tpu.matmul %112, %113, %cst_73 {dimension_numbers = #tpu.dot_dimension_numbers<[2], [2], [1], [1], [0, 0, 0, 1, 1, 1], [0], [0]>} : vector<2x8x32xbf16>, vector<2x8x32xbf16>, vector<2x8x8xf32> -> vector<2x8x8xf32>
    "tpu.trace_stop"() : () -> ()
    %cst_74 = arith.constant 0.0883883461 : f32
    %115 = vector.broadcast %cst_74 : f32 to vector<2x8x8xf32>
    %116 = arith.mulf %114, %115 : vector<2x8x8xf32>
    %117 = arith.addf %116, %9 : vector<2x8x8xf32>
    %cst_75 = arith.constant dense<0xFF800000> : vector<2x8xf32>
    %118 = vector.multi_reduction <maximumf>, %117, %cst_75 [2] : vector<2x8x8xf32> to vector<2x8xf32>
    %119 = vector.shape_cast %118 : vector<2x8xf32> to vector<2x8x1xf32>
    %120 = vector.broadcast %119 : vector<2x8x1xf32> to vector<2x8x8xf32>
    %121 = arith.subf %117, %120 : vector<2x8x8xf32>
    %122 = math.exp %121 : vector<2x8x8xf32>
    %cst_76 = arith.constant dense<0.000000e+00> : vector<2x8xf32>
    %123 = vector.multi_reduction <add>, %122, %cst_76 [2] : vector<2x8x8xf32> to vector<2x8xf32>
    %124 = vector.shape_cast %123 : vector<2x8xf32> to vector<2x8x1xf32>
    %125 = tpu.reciprocal %124 {approx = true} : vector<2x8x1xf32> -> vector<2x8x1xf32>
    %126 = vector.broadcast %125 : vector<2x8x1xf32> to vector<2x8x8xf32>
    %127 = arith.mulf %122, %126 : vector<2x8x8xf32>
    %128 = arith.truncf %127 : vector<2x8x8xf32> to vector<2x8x8xbf16>
    %129 = arith.truncf %111 : vector<2x8x32xf32> to vector<2x8x32xbf16>
    "tpu.trace_start"() <{level = 10 : i32, message = "bts,bsd->btd"}> : () -> ()
    %cst_77 = arith.constant dense<0.000000e+00> : vector<2x8x32xf32>
    %130 = tpu.matmul %128, %129, %cst_77 {dimension_numbers = #tpu.dot_dimension_numbers<[2], [1], [1], [2], [0, 0, 0, 1, 1, 2], [0], [0]>} : vector<2x8x8xbf16>, vector<2x8x32xbf16>, vector<2x8x32xf32> -> vector<2x8x32xf32>
    "tpu.trace_stop"() : () -> ()
    %131 = vector.shape_cast %130 : vector<2x8x32xf32> to vector<16x32xf32>
    %132 = vector.extract_strided_slice %77 {offsets = [0, 64], sizes = [16, 32], strides = [1, 1]} : vector<16x128xf32> to vector<16x32xf32>
    %133 = vector.shape_cast %132 : vector<16x32xf32> to vector<2x8x32xf32>
    %134 = vector.extract_strided_slice %78 {offsets = [0, 64], sizes = [16, 32], strides = [1, 1]} : vector<16x128xf32> to vector<16x32xf32>
    %135 = vector.shape_cast %134 : vector<16x32xf32> to vector<2x8x32xf32>
    %136 = vector.extract_strided_slice %79 {offsets = [0, 64], sizes = [16, 32], strides = [1, 1]} : vector<16x128xf32> to vector<16x32xf32>
    %137 = vector.shape_cast %136 : vector<16x32xf32> to vector<2x8x32xf32>
    %138 = arith.truncf %133 : vector<2x8x32xf32> to vector<2x8x32xbf16>
    %139 = arith.truncf %135 : vector<2x8x32xf32> to vector<2x8x32xbf16>
    "tpu.trace_start"() <{level = 10 : i32, message = "btd,bsd->bts"}> : () -> ()
    %cst_78 = arith.constant dense<0.000000e+00> : vector<2x8x8xf32>
    %140 = tpu.matmul %138, %139, %cst_78 {dimension_numbers = #tpu.dot_dimension_numbers<[2], [2], [1], [1], [0, 0, 0, 1, 1, 1], [0], [0]>} : vector<2x8x32xbf16>, vector<2x8x32xbf16>, vector<2x8x8xf32> -> vector<2x8x8xf32>
    "tpu.trace_stop"() : () -> ()
    %cst_79 = arith.constant 0.0883883461 : f32
    %141 = vector.broadcast %cst_79 : f32 to vector<2x8x8xf32>
    %142 = arith.mulf %140, %141 : vector<2x8x8xf32>
    %143 = arith.addf %142, %9 : vector<2x8x8xf32>
    %cst_80 = arith.constant dense<0xFF800000> : vector<2x8xf32>
    %144 = vector.multi_reduction <maximumf>, %143, %cst_80 [2] : vector<2x8x8xf32> to vector<2x8xf32>
    %145 = vector.shape_cast %144 : vector<2x8xf32> to vector<2x8x1xf32>
    %146 = vector.broadcast %145 : vector<2x8x1xf32> to vector<2x8x8xf32>
    %147 = arith.subf %143, %146 : vector<2x8x8xf32>
    %148 = math.exp %147 : vector<2x8x8xf32>
    %cst_81 = arith.constant dense<0.000000e+00> : vector<2x8xf32>
    %149 = vector.multi_reduction <add>, %148, %cst_81 [2] : vector<2x8x8xf32> to vector<2x8xf32>
    %150 = vector.shape_cast %149 : vector<2x8xf32> to vector<2x8x1xf32>
    %151 = tpu.reciprocal %150 {approx = true} : vector<2x8x1xf32> -> vector<2x8x1xf32>
    %152 = vector.broadcast %151 : vector<2x8x1xf32> to vector<2x8x8xf32>
    %153 = arith.mulf %148, %152 : vector<2x8x8xf32>
    %154 = arith.truncf %153 : vector<2x8x8xf32> to vector<2x8x8xbf16>
    %155 = arith.truncf %137 : vector<2x8x32xf32> to vector<2x8x32xbf16>
    "tpu.trace_start"() <{level = 10 : i32, message = "bts,bsd->btd"}> : () -> ()
    %cst_82 = arith.constant dense<0.000000e+00> : vector<2x8x32xf32>
    %156 = tpu.matmul %154, %155, %cst_82 {dimension_numbers = #tpu.dot_dimension_numbers<[2], [1], [1], [2], [0, 0, 0, 1, 1, 2], [0], [0]>} : vector<2x8x8xbf16>, vector<2x8x32xbf16>, vector<2x8x32xf32> -> vector<2x8x32xf32>
    "tpu.trace_stop"() : () -> ()
    %157 = vector.shape_cast %156 : vector<2x8x32xf32> to vector<16x32xf32>
    %158 = vector.extract_strided_slice %77 {offsets = [0, 96], sizes = [16, 32], strides = [1, 1]} : vector<16x128xf32> to vector<16x32xf32>
    %159 = vector.shape_cast %158 : vector<16x32xf32> to vector<2x8x32xf32>
    %160 = vector.extract_strided_slice %78 {offsets = [0, 96], sizes = [16, 32], strides = [1, 1]} : vector<16x128xf32> to vector<16x32xf32>
    %161 = vector.shape_cast %160 : vector<16x32xf32> to vector<2x8x32xf32>
    %162 = vector.extract_strided_slice %79 {offsets = [0, 96], sizes = [16, 32], strides = [1, 1]} : vector<16x128xf32> to vector<16x32xf32>
    %163 = vector.shape_cast %162 : vector<16x32xf32> to vector<2x8x32xf32>
    %164 = arith.truncf %159 : vector<2x8x32xf32> to vector<2x8x32xbf16>
    %165 = arith.truncf %161 : vector<2x8x32xf32> to vector<2x8x32xbf16>
    "tpu.trace_start"() <{level = 10 : i32, message = "btd,bsd->bts"}> : () -> ()
    %cst_83 = arith.constant dense<0.000000e+00> : vector<2x8x8xf32>
    %166 = tpu.matmul %164, %165, %cst_83 {dimension_numbers = #tpu.dot_dimension_numbers<[2], [2], [1], [1], [0, 0, 0, 1, 1, 1], [0], [0]>} : vector<2x8x32xbf16>, vector<2x8x32xbf16>, vector<2x8x8xf32> -> vector<2x8x8xf32>
    "tpu.trace_stop"() : () -> ()
    %cst_84 = arith.constant 0.0883883461 : f32
    %167 = vector.broadcast %cst_84 : f32 to vector<2x8x8xf32>
    %168 = arith.mulf %166, %167 : vector<2x8x8xf32>
    %169 = arith.addf %168, %9 : vector<2x8x8xf32>
    %cst_85 = arith.constant dense<0xFF800000> : vector<2x8xf32>
    %170 = vector.multi_reduction <maximumf>, %169, %cst_85 [2] : vector<2x8x8xf32> to vector<2x8xf32>
    %171 = vector.shape_cast %170 : vector<2x8xf32> to vector<2x8x1xf32>
    %172 = vector.broadcast %171 : vector<2x8x1xf32> to vector<2x8x8xf32>
    %173 = arith.subf %169, %172 : vector<2x8x8xf32>
    %174 = math.exp %173 : vector<2x8x8xf32>
    %cst_86 = arith.constant dense<0.000000e+00> : vector<2x8xf32>
    %175 = vector.multi_reduction <add>, %174, %cst_86 [2] : vector<2x8x8xf32> to vector<2x8xf32>
    %176 = vector.shape_cast %175 : vector<2x8xf32> to vector<2x8x1xf32>
    %177 = tpu.reciprocal %176 {approx = true} : vector<2x8x1xf32> -> vector<2x8x1xf32>
    %178 = vector.broadcast %177 : vector<2x8x1xf32> to vector<2x8x8xf32>
    %179 = arith.mulf %174, %178 : vector<2x8x8xf32>
    %180 = arith.truncf %179 : vector<2x8x8xf32> to vector<2x8x8xbf16>
    %181 = arith.truncf %163 : vector<2x8x32xf32> to vector<2x8x32xbf16>
    "tpu.trace_start"() <{level = 10 : i32, message = "bts,bsd->btd"}> : () -> ()
    %cst_87 = arith.constant dense<0.000000e+00> : vector<2x8x32xf32>
    %182 = tpu.matmul %180, %181, %cst_87 {dimension_numbers = #tpu.dot_dimension_numbers<[2], [1], [1], [2], [0, 0, 0, 1, 1, 2], [0], [0]>} : vector<2x8x8xbf16>, vector<2x8x32xbf16>, vector<2x8x32xf32> -> vector<2x8x32xf32>
    "tpu.trace_stop"() : () -> ()
    %183 = vector.shape_cast %182 : vector<2x8x32xf32> to vector<16x32xf32>
    %184 = tpu.concatenate %105, %131, %157, %183 in 1 : vector<16x32xf32>, vector<16x32xf32>, vector<16x32xf32>, vector<16x32xf32> -> vector<16x128xf32>
    %185 = vector.extract_strided_slice %17 {offsets = [0, 384], sizes = [128, 128], strides = [1, 1]} : vector<128x512xbf16> to vector<128x128xbf16>
    %186 = arith.truncf %184 : vector<16x128xf32> to vector<16x128xbf16>
    %cst_88 = arith.constant dense<0.000000e+00> : vector<16x128xf32>
    %187 = tpu.matmul %186, %185, %cst_88 {dimension_numbers = #tpu.dot_dimension_numbers<[1], [0], [0], [1], [0, 0, 1, 1], [], []>} : vector<16x128xbf16>, vector<128x128xbf16>, vector<16x128xf32> -> vector<16x128xf32>
    %188 = arith.addf %1, %187 : vector<16x128xf32>
    %189 = vector.broadcast %41 : vector<1x128xf32> to vector<16x128xf32>
    %190 = arith.addf %188, %189 : vector<16x128xf32>
    %cst_89 = arith.constant dense<0.000000e+00> : vector<16xf32>
    %191 = vector.multi_reduction <add>, %190, %cst_89 [1] : vector<16x128xf32> to vector<16xf32>
    %192 = vector.shape_cast %191 : vector<16xf32> to vector<16x1xf32>
    %cst_90 = arith.constant 1.280000e+02 : f32
    %193 = vector.broadcast %cst_90 : f32 to vector<16x1xf32>
    %194 = arith.divf %192, %193 : vector<16x1xf32>
    %195 = vector.broadcast %194 : vector<16x1xf32> to vector<16x128xf32>
    %196 = arith.subf %190, %195 : vector<16x128xf32>
    %197 = arith.mulf %196, %196 : vector<16x128xf32>
    %cst_91 = arith.constant dense<0.000000e+00> : vector<16xf32>
    %198 = vector.multi_reduction <add>, %197, %cst_91 [1] : vector<16x128xf32> to vector<16xf32>
    %199 = vector.shape_cast %198 : vector<16xf32> to vector<16x1xf32>
    %cst_92 = arith.constant 1.280000e+02 : f32
    %200 = vector.broadcast %cst_92 : f32 to vector<16x1xf32>
    %201 = arith.divf %199, %200 : vector<16x1xf32>
    %202 = vector.broadcast %194 : vector<16x1xf32> to vector<16x128xf32>
    %203 = arith.subf %190, %202 : vector<16x128xf32>
    %cst_93 = arith.constant 9.99999997E-7 : f32
    %204 = vector.broadcast %cst_93 : f32 to vector<16x1xf32>
    %205 = arith.addf %201, %204 : vector<16x1xf32>
    %206 = math.rsqrt %205 : vector<16x1xf32>
    %207 = vector.broadcast %206 : vector<16x1xf32> to vector<16x128xf32>
    %208 = arith.mulf %203, %207 : vector<16x128xf32>
    %209 = vector.broadcast %29 : vector<1x128xf32> to vector<16x128xf32>
    %210 = arith.mulf %208, %209 : vector<16x128xf32>
    %211 = vector.broadcast %31 : vector<1x128xf32> to vector<16x128xf32>
    %212 = arith.addf %210, %211 : vector<16x128xf32>
    %213 = vector.extract_strided_slice %19 {offsets = [0, 0], sizes = [128, 128], strides = [1, 1]} : vector<128x512xbf16> to vector<128x128xbf16>
    %214 = arith.truncf %212 : vector<16x128xf32> to vector<16x128xbf16>
    %cst_94 = arith.constant dense<0.000000e+00> : vector<16x128xf32>
    %215 = tpu.matmul %214, %213, %cst_94 {dimension_numbers = #tpu.dot_dimension_numbers<[1], [0], [0], [1], [0, 0, 1, 1], [], []>} : vector<16x128xbf16>, vector<128x128xbf16>, vector<16x128xf32> -> vector<16x128xf32>
    %216 = vector.broadcast %43 : vector<1x128xf32> to vector<16x128xf32>
    %217 = arith.addf %215, %216 : vector<16x128xf32>
    %218 = vector.extract_strided_slice %19 {offsets = [0, 128], sizes = [128, 256], strides = [1, 1]} : vector<128x512xbf16> to vector<128x256xbf16>
    %219 = arith.truncf %3 : vector<16x128xf32> to vector<16x128xbf16>
    %cst_95 = arith.constant dense<0.000000e+00> : vector<16x256xf32>
    %220 = tpu.matmul %219, %218, %cst_95 {dimension_numbers = #tpu.dot_dimension_numbers<[1], [0], [0], [1], [0, 0, 1, 1], [], []>} : vector<16x128xbf16>, vector<128x256xbf16>, vector<16x256xf32> -> vector<16x256xf32>
    %221 = vector.broadcast %45 : vector<1x256xf32> to vector<16x256xf32>
    %222 = arith.addf %220, %221 : vector<16x256xf32>
    %223 = vector.extract_strided_slice %222 {offsets = [0, 0], sizes = [16, 128], strides = [1, 1]} : vector<16x256xf32> to vector<16x128xf32>
    %224 = vector.extract_strided_slice %222 {offsets = [0, 128], sizes = [16, 128], strides = [1, 1]} : vector<16x256xf32> to vector<16x128xf32>
    %225 = vector.extract_strided_slice %217 {offsets = [0, 0], sizes = [16, 32], strides = [1, 1]} : vector<16x128xf32> to vector<16x32xf32>
    %226 = vector.shape_cast %225 : vector<16x32xf32> to vector<2x8x32xf32>
    %227 = vector.extract_strided_slice %223 {offsets = [0, 0], sizes = [16, 32], strides = [1, 1]} : vector<16x128xf32> to vector<16x32xf32>
    %228 = vector.shape_cast %227 : vector<16x32xf32> to vector<2x8x32xf32>
    %229 = vector.extract_strided_slice %224 {offsets = [0, 0], sizes = [16, 32], strides = [1, 1]} : vector<16x128xf32> to vector<16x32xf32>
    %230 = vector.shape_cast %229 : vector<16x32xf32> to vector<2x8x32xf32>
    %231 = arith.truncf %226 : vector<2x8x32xf32> to vector<2x8x32xbf16>
    %232 = arith.truncf %228 : vector<2x8x32xf32> to vector<2x8x32xbf16>
    "tpu.trace_start"() <{level = 10 : i32, message = "btd,bsd->bts"}> : () -> ()
    %cst_96 = arith.constant dense<0.000000e+00> : vector<2x8x8xf32>
    %233 = tpu.matmul %231, %232, %cst_96 {dimension_numbers = #tpu.dot_dimension_numbers<[2], [2], [1], [1], [0, 0, 0, 1, 1, 1], [0], [0]>} : vector<2x8x32xbf16>, vector<2x8x32xbf16>, vector<2x8x8xf32> -> vector<2x8x8xf32>
    "tpu.trace_stop"() : () -> ()
    %cst_97 = arith.constant 0.0883883461 : f32
    %234 = vector.broadcast %cst_97 : f32 to vector<2x8x8xf32>
    %235 = arith.mulf %233, %234 : vector<2x8x8xf32>
    %236 = arith.addf %235, %15 : vector<2x8x8xf32>
    %cst_98 = arith.constant dense<0xFF800000> : vector<2x8xf32>
    %237 = vector.multi_reduction <maximumf>, %236, %cst_98 [2] : vector<2x8x8xf32> to vector<2x8xf32>
    %238 = vector.shape_cast %237 : vector<2x8xf32> to vector<2x8x1xf32>
    %239 = vector.broadcast %238 : vector<2x8x1xf32> to vector<2x8x8xf32>
    %240 = arith.subf %236, %239 : vector<2x8x8xf32>
    %241 = math.exp %240 : vector<2x8x8xf32>
    %cst_99 = arith.constant dense<0.000000e+00> : vector<2x8xf32>
    %242 = vector.multi_reduction <add>, %241, %cst_99 [2] : vector<2x8x8xf32> to vector<2x8xf32>
    %243 = vector.shape_cast %242 : vector<2x8xf32> to vector<2x8x1xf32>
    %244 = tpu.reciprocal %243 {approx = true} : vector<2x8x1xf32> -> vector<2x8x1xf32>
    %245 = vector.broadcast %244 : vector<2x8x1xf32> to vector<2x8x8xf32>
    %246 = arith.mulf %241, %245 : vector<2x8x8xf32>
    %247 = arith.truncf %246 : vector<2x8x8xf32> to vector<2x8x8xbf16>
    %248 = arith.truncf %230 : vector<2x8x32xf32> to vector<2x8x32xbf16>
    "tpu.trace_start"() <{level = 10 : i32, message = "bts,bsd->btd"}> : () -> ()
    %cst_100 = arith.constant dense<0.000000e+00> : vector<2x8x32xf32>
    %249 = tpu.matmul %247, %248, %cst_100 {dimension_numbers = #tpu.dot_dimension_numbers<[2], [1], [1], [2], [0, 0, 0, 1, 1, 2], [0], [0]>} : vector<2x8x8xbf16>, vector<2x8x32xbf16>, vector<2x8x32xf32> -> vector<2x8x32xf32>
    "tpu.trace_stop"() : () -> ()
    %250 = vector.shape_cast %249 : vector<2x8x32xf32> to vector<16x32xf32>
    %251 = vector.extract_strided_slice %217 {offsets = [0, 32], sizes = [16, 32], strides = [1, 1]} : vector<16x128xf32> to vector<16x32xf32>
    %252 = vector.shape_cast %251 : vector<16x32xf32> to vector<2x8x32xf32>
    %253 = vector.extract_strided_slice %223 {offsets = [0, 32], sizes = [16, 32], strides = [1, 1]} : vector<16x128xf32> to vector<16x32xf32>
    %254 = vector.shape_cast %253 : vector<16x32xf32> to vector<2x8x32xf32>
    %255 = vector.extract_strided_slice %224 {offsets = [0, 32], sizes = [16, 32], strides = [1, 1]} : vector<16x128xf32> to vector<16x32xf32>
    %256 = vector.shape_cast %255 : vector<16x32xf32> to vector<2x8x32xf32>
    %257 = arith.truncf %252 : vector<2x8x32xf32> to vector<2x8x32xbf16>
    %258 = arith.truncf %254 : vector<2x8x32xf32> to vector<2x8x32xbf16>
    "tpu.trace_start"() <{level = 10 : i32, message = "btd,bsd->bts"}> : () -> ()
    %cst_101 = arith.constant dense<0.000000e+00> : vector<2x8x8xf32>
    %259 = tpu.matmul %257, %258, %cst_101 {dimension_numbers = #tpu.dot_dimension_numbers<[2], [2], [1], [1], [0, 0, 0, 1, 1, 1], [0], [0]>} : vector<2x8x32xbf16>, vector<2x8x32xbf16>, vector<2x8x8xf32> -> vector<2x8x8xf32>
    "tpu.trace_stop"() : () -> ()
    %cst_102 = arith.constant 0.0883883461 : f32
    %260 = vector.broadcast %cst_102 : f32 to vector<2x8x8xf32>
    %261 = arith.mulf %259, %260 : vector<2x8x8xf32>
    %262 = arith.addf %261, %15 : vector<2x8x8xf32>
    %cst_103 = arith.constant dense<0xFF800000> : vector<2x8xf32>
    %263 = vector.multi_reduction <maximumf>, %262, %cst_103 [2] : vector<2x8x8xf32> to vector<2x8xf32>
    %264 = vector.shape_cast %263 : vector<2x8xf32> to vector<2x8x1xf32>
    %265 = vector.broadcast %264 : vector<2x8x1xf32> to vector<2x8x8xf32>
    %266 = arith.subf %262, %265 : vector<2x8x8xf32>
    %267 = math.exp %266 : vector<2x8x8xf32>
    %cst_104 = arith.constant dense<0.000000e+00> : vector<2x8xf32>
    %268 = vector.multi_reduction <add>, %267, %cst_104 [2] : vector<2x8x8xf32> to vector<2x8xf32>
    %269 = vector.shape_cast %268 : vector<2x8xf32> to vector<2x8x1xf32>
    %270 = tpu.reciprocal %269 {approx = true} : vector<2x8x1xf32> -> vector<2x8x1xf32>
    %271 = vector.broadcast %270 : vector<2x8x1xf32> to vector<2x8x8xf32>
    %272 = arith.mulf %267, %271 : vector<2x8x8xf32>
    %273 = arith.truncf %272 : vector<2x8x8xf32> to vector<2x8x8xbf16>
    %274 = arith.truncf %256 : vector<2x8x32xf32> to vector<2x8x32xbf16>
    "tpu.trace_start"() <{level = 10 : i32, message = "bts,bsd->btd"}> : () -> ()
    %cst_105 = arith.constant dense<0.000000e+00> : vector<2x8x32xf32>
    %275 = tpu.matmul %273, %274, %cst_105 {dimension_numbers = #tpu.dot_dimension_numbers<[2], [1], [1], [2], [0, 0, 0, 1, 1, 2], [0], [0]>} : vector<2x8x8xbf16>, vector<2x8x32xbf16>, vector<2x8x32xf32> -> vector<2x8x32xf32>
    "tpu.trace_stop"() : () -> ()
    %276 = vector.shape_cast %275 : vector<2x8x32xf32> to vector<16x32xf32>
    %277 = vector.extract_strided_slice %217 {offsets = [0, 64], sizes = [16, 32], strides = [1, 1]} : vector<16x128xf32> to vector<16x32xf32>
    %278 = vector.shape_cast %277 : vector<16x32xf32> to vector<2x8x32xf32>
    %279 = vector.extract_strided_slice %223 {offsets = [0, 64], sizes = [16, 32], strides = [1, 1]} : vector<16x128xf32> to vector<16x32xf32>
    %280 = vector.shape_cast %279 : vector<16x32xf32> to vector<2x8x32xf32>
    %281 = vector.extract_strided_slice %224 {offsets = [0, 64], sizes = [16, 32], strides = [1, 1]} : vector<16x128xf32> to vector<16x32xf32>
    %282 = vector.shape_cast %281 : vector<16x32xf32> to vector<2x8x32xf32>
    %283 = arith.truncf %278 : vector<2x8x32xf32> to vector<2x8x32xbf16>
    %284 = arith.truncf %280 : vector<2x8x32xf32> to vector<2x8x32xbf16>
    "tpu.trace_start"() <{level = 10 : i32, message = "btd,bsd->bts"}> : () -> ()
    %cst_106 = arith.constant dense<0.000000e+00> : vector<2x8x8xf32>
    %285 = tpu.matmul %283, %284, %cst_106 {dimension_numbers = #tpu.dot_dimension_numbers<[2], [2], [1], [1], [0, 0, 0, 1, 1, 1], [0], [0]>} : vector<2x8x32xbf16>, vector<2x8x32xbf16>, vector<2x8x8xf32> -> vector<2x8x8xf32>
    "tpu.trace_stop"() : () -> ()
    %cst_107 = arith.constant 0.0883883461 : f32
    %286 = vector.broadcast %cst_107 : f32 to vector<2x8x8xf32>
    %287 = arith.mulf %285, %286 : vector<2x8x8xf32>
    %288 = arith.addf %287, %15 : vector<2x8x8xf32>
    %cst_108 = arith.constant dense<0xFF800000> : vector<2x8xf32>
    %289 = vector.multi_reduction <maximumf>, %288, %cst_108 [2] : vector<2x8x8xf32> to vector<2x8xf32>
    %290 = vector.shape_cast %289 : vector<2x8xf32> to vector<2x8x1xf32>
    %291 = vector.broadcast %290 : vector<2x8x1xf32> to vector<2x8x8xf32>
    %292 = arith.subf %288, %291 : vector<2x8x8xf32>
    %293 = math.exp %292 : vector<2x8x8xf32>
    %cst_109 = arith.constant dense<0.000000e+00> : vector<2x8xf32>
    %294 = vector.multi_reduction <add>, %293, %cst_109 [2] : vector<2x8x8xf32> to vector<2x8xf32>
    %295 = vector.shape_cast %294 : vector<2x8xf32> to vector<2x8x1xf32>
    %296 = tpu.reciprocal %295 {approx = true} : vector<2x8x1xf32> -> vector<2x8x1xf32>
    %297 = vector.broadcast %296 : vector<2x8x1xf32> to vector<2x8x8xf32>
    %298 = arith.mulf %293, %297 : vector<2x8x8xf32>
    %299 = arith.truncf %298 : vector<2x8x8xf32> to vector<2x8x8xbf16>
    %300 = arith.truncf %282 : vector<2x8x32xf32> to vector<2x8x32xbf16>
    "tpu.trace_start"() <{level = 10 : i32, message = "bts,bsd->btd"}> : () -> ()
    %cst_110 = arith.constant dense<0.000000e+00> : vector<2x8x32xf32>
    %301 = tpu.matmul %299, %300, %cst_110 {dimension_numbers = #tpu.dot_dimension_numbers<[2], [1], [1], [2], [0, 0, 0, 1, 1, 2], [0], [0]>} : vector<2x8x8xbf16>, vector<2x8x32xbf16>, vector<2x8x32xf32> -> vector<2x8x32xf32>
    "tpu.trace_stop"() : () -> ()
    %302 = vector.shape_cast %301 : vector<2x8x32xf32> to vector<16x32xf32>
    %303 = vector.extract_strided_slice %217 {offsets = [0, 96], sizes = [16, 32], strides = [1, 1]} : vector<16x128xf32> to vector<16x32xf32>
    %304 = vector.shape_cast %303 : vector<16x32xf32> to vector<2x8x32xf32>
    %305 = vector.extract_strided_slice %223 {offsets = [0, 96], sizes = [16, 32], strides = [1, 1]} : vector<16x128xf32> to vector<16x32xf32>
    %306 = vector.shape_cast %305 : vector<16x32xf32> to vector<2x8x32xf32>
    %307 = vector.extract_strided_slice %224 {offsets = [0, 96], sizes = [16, 32], strides = [1, 1]} : vector<16x128xf32> to vector<16x32xf32>
    %308 = vector.shape_cast %307 : vector<16x32xf32> to vector<2x8x32xf32>
    %309 = arith.truncf %304 : vector<2x8x32xf32> to vector<2x8x32xbf16>
    %310 = arith.truncf %306 : vector<2x8x32xf32> to vector<2x8x32xbf16>
    "tpu.trace_start"() <{level = 10 : i32, message = "btd,bsd->bts"}> : () -> ()
    %cst_111 = arith.constant dense<0.000000e+00> : vector<2x8x8xf32>
    %311 = tpu.matmul %309, %310, %cst_111 {dimension_numbers = #tpu.dot_dimension_numbers<[2], [2], [1], [1], [0, 0, 0, 1, 1, 1], [0], [0]>} : vector<2x8x32xbf16>, vector<2x8x32xbf16>, vector<2x8x8xf32> -> vector<2x8x8xf32>
    "tpu.trace_stop"() : () -> ()
    %cst_112 = arith.constant 0.0883883461 : f32
    %312 = vector.broadcast %cst_112 : f32 to vector<2x8x8xf32>
    %313 = arith.mulf %311, %312 : vector<2x8x8xf32>
    %314 = arith.addf %313, %15 : vector<2x8x8xf32>
    %cst_113 = arith.constant dense<0xFF800000> : vector<2x8xf32>
    %315 = vector.multi_reduction <maximumf>, %314, %cst_113 [2] : vector<2x8x8xf32> to vector<2x8xf32>
    %316 = vector.shape_cast %315 : vector<2x8xf32> to vector<2x8x1xf32>
    %317 = vector.broadcast %316 : vector<2x8x1xf32> to vector<2x8x8xf32>
    %318 = arith.subf %314, %317 : vector<2x8x8xf32>
    %319 = math.exp %318 : vector<2x8x8xf32>
    %cst_114 = arith.constant dense<0.000000e+00> : vector<2x8xf32>
    %320 = vector.multi_reduction <add>, %319, %cst_114 [2] : vector<2x8x8xf32> to vector<2x8xf32>
    %321 = vector.shape_cast %320 : vector<2x8xf32> to vector<2x8x1xf32>
    %322 = tpu.reciprocal %321 {approx = true} : vector<2x8x1xf32> -> vector<2x8x1xf32>
    %323 = vector.broadcast %322 : vector<2x8x1xf32> to vector<2x8x8xf32>
    %324 = arith.mulf %319, %323 : vector<2x8x8xf32>
    %325 = arith.truncf %324 : vector<2x8x8xf32> to vector<2x8x8xbf16>
    %326 = arith.truncf %308 : vector<2x8x32xf32> to vector<2x8x32xbf16>
    "tpu.trace_start"() <{level = 10 : i32, message = "bts,bsd->btd"}> : () -> ()
    %cst_115 = arith.constant dense<0.000000e+00> : vector<2x8x32xf32>
    %327 = tpu.matmul %325, %326, %cst_115 {dimension_numbers = #tpu.dot_dimension_numbers<[2], [1], [1], [2], [0, 0, 0, 1, 1, 2], [0], [0]>} : vector<2x8x8xbf16>, vector<2x8x32xbf16>, vector<2x8x32xf32> -> vector<2x8x32xf32>
    "tpu.trace_stop"() : () -> ()
    %328 = vector.shape_cast %327 : vector<2x8x32xf32> to vector<16x32xf32>
    %329 = tpu.concatenate %250, %276, %302, %328 in 1 : vector<16x32xf32>, vector<16x32xf32>, vector<16x32xf32>, vector<16x32xf32> -> vector<16x128xf32>
    %330 = vector.extract_strided_slice %19 {offsets = [0, 384], sizes = [128, 128], strides = [1, 1]} : vector<128x512xbf16> to vector<128x128xbf16>
    %331 = arith.truncf %329 : vector<16x128xf32> to vector<16x128xbf16>
    %cst_116 = arith.constant dense<0.000000e+00> : vector<16x128xf32>
    %332 = tpu.matmul %331, %330, %cst_116 {dimension_numbers = #tpu.dot_dimension_numbers<[1], [0], [0], [1], [0, 0, 1, 1], [], []>} : vector<16x128xbf16>, vector<128x128xbf16>, vector<16x128xf32> -> vector<16x128xf32>
    %333 = arith.addf %190, %332 : vector<16x128xf32>
    %334 = vector.broadcast %47 : vector<1x128xf32> to vector<16x128xf32>
    %335 = arith.addf %333, %334 : vector<16x128xf32>
    %cst_117 = arith.constant dense<0.000000e+00> : vector<16xf32>
    %336 = vector.multi_reduction <add>, %335, %cst_117 [1] : vector<16x128xf32> to vector<16xf32>
    %337 = vector.shape_cast %336 : vector<16xf32> to vector<16x1xf32>
    %cst_118 = arith.constant 1.280000e+02 : f32
    %338 = vector.broadcast %cst_118 : f32 to vector<16x1xf32>
    %339 = arith.divf %337, %338 : vector<16x1xf32>
    %340 = vector.broadcast %339 : vector<16x1xf32> to vector<16x128xf32>
    %341 = arith.subf %335, %340 : vector<16x128xf32>
    %342 = arith.mulf %341, %341 : vector<16x128xf32>
    %cst_119 = arith.constant dense<0.000000e+00> : vector<16xf32>
    %343 = vector.multi_reduction <add>, %342, %cst_119 [1] : vector<16x128xf32> to vector<16xf32>
    %344 = vector.shape_cast %343 : vector<16xf32> to vector<16x1xf32>
    %cst_120 = arith.constant 1.280000e+02 : f32
    %345 = vector.broadcast %cst_120 : f32 to vector<16x1xf32>
    %346 = arith.divf %344, %345 : vector<16x1xf32>
    %347 = vector.broadcast %339 : vector<16x1xf32> to vector<16x128xf32>
    %348 = arith.subf %335, %347 : vector<16x128xf32>
    %cst_121 = arith.constant 9.99999997E-7 : f32
    %349 = vector.broadcast %cst_121 : f32 to vector<16x1xf32>
    %350 = arith.addf %346, %349 : vector<16x1xf32>
    %351 = math.rsqrt %350 : vector<16x1xf32>
    %352 = vector.broadcast %351 : vector<16x1xf32> to vector<16x128xf32>
    %353 = arith.mulf %348, %352 : vector<16x128xf32>
    %354 = vector.broadcast %33 : vector<1x128xf32> to vector<16x128xf32>
    %355 = arith.mulf %353, %354 : vector<16x128xf32>
    %356 = vector.broadcast %35 : vector<1x128xf32> to vector<16x128xf32>
    %357 = arith.addf %355, %356 : vector<16x128xf32>
    %358 = arith.truncf %357 : vector<16x128xf32> to vector<16x128xbf16>
    %cst_122 = arith.constant dense<0.000000e+00> : vector<16x256xf32>
    %359 = tpu.matmul %358, %21, %cst_122 {dimension_numbers = #tpu.dot_dimension_numbers<[1], [0], [0], [1], [0, 0, 1, 1], [], []>} : vector<16x128xbf16>, vector<128x256xbf16>, vector<16x256xf32> -> vector<16x256xf32>
    %360 = vector.broadcast %49 : vector<1x256xf32> to vector<16x256xf32>
    %361 = arith.addf %359, %360 : vector<16x256xf32>
    %cst_123 = arith.constant 0.000000e+00 : f32
    %362 = vector.broadcast %cst_123 : f32 to vector<16x256xf32>
    %363 = arith.maximumf %361, %362 : vector<16x256xf32>
    %364 = arith.truncf %363 : vector<16x256xf32> to vector<16x256xbf16>
    %cst_124 = arith.constant dense<0.000000e+00> : vector<16x128xf32>
    %365 = tpu.matmul %364, %23, %cst_124 {dimension_numbers = #tpu.dot_dimension_numbers<[1], [0], [0], [1], [0, 0, 1, 1], [], []>} : vector<16x256xbf16>, vector<256x128xbf16>, vector<16x128xf32> -> vector<16x128xf32>
    %366 = arith.addf %335, %365 : vector<16x128xf32>
    %367 = vector.broadcast %37 : vector<1x128xf32> to vector<16x128xf32>
    %368 = arith.addf %366, %367 : vector<16x128xf32>
    %c1_125 = arith.constant 1 : index
    %c0_126 = arith.constant 0 : index
    %c0_127 = arith.constant 0 : index
    %c0_128 = arith.constant 0 : index
    %369 = vector.load %arg5[%c1_125, %c0_126, %c0_127, %c0_128] : memref<2x2x128x512xbf16, #tpu.memory_space<vmem>>, vector<1x1x128x512xbf16>
    %370 = vector.shape_cast %369 : vector<1x1x128x512xbf16> to vector<128x512xbf16>
    %c1_129 = arith.constant 1 : index
    %c1_130 = arith.constant 1 : index
    %c0_131 = arith.constant 0 : index
    %c0_132 = arith.constant 0 : index
    %371 = vector.load %arg5[%c1_129, %c1_130, %c0_131, %c0_132] : memref<2x2x128x512xbf16, #tpu.memory_space<vmem>>, vector<1x1x128x512xbf16>
    %372 = vector.shape_cast %371 : vector<1x1x128x512xbf16> to vector<128x512xbf16>
    %c1_133 = arith.constant 1 : index
    %c0_134 = arith.constant 0 : index
    %c0_135 = arith.constant 0 : index
    %373 = vector.load %arg6[%c1_133, %c0_134, %c0_135] : memref<2x128x256xbf16, #tpu.memory_space<vmem>>, vector<1x128x256xbf16>
    %374 = vector.shape_cast %373 : vector<1x128x256xbf16> to vector<128x256xbf16>
    %c1_136 = arith.constant 1 : index
    %c0_137 = arith.constant 0 : index
    %c0_138 = arith.constant 0 : index
    %375 = vector.load %arg7[%c1_136, %c0_137, %c0_138] : memref<2x256x128xbf16, #tpu.memory_space<vmem>>, vector<1x256x128xbf16>
    %376 = vector.shape_cast %375 : vector<1x256x128xbf16> to vector<256x128xbf16>
    %c1_139 = arith.constant 1 : index
    %c0_140 = arith.constant 0 : index
    %c0_141 = arith.constant 0 : index
    %377 = vector.load %arg8[%c1_139, %c0_140, %c0_141] : memref<2x8x512xf32, #tpu.memory_space<vmem>>, vector<1x1x128xf32>
    %378 = vector.shape_cast %377 : vector<1x1x128xf32> to vector<1x128xf32>
    %c1_142 = arith.constant 1 : index
    %c0_143 = arith.constant 0 : index
    %c128_144 = arith.constant 128 : index
    %379 = vector.load %arg8[%c1_142, %c0_143, %c128_144] : memref<2x8x512xf32, #tpu.memory_space<vmem>>, vector<1x1x128xf32>
    %380 = vector.shape_cast %379 : vector<1x1x128xf32> to vector<1x128xf32>
    %c1_145 = arith.constant 1 : index
    %c0_146 = arith.constant 0 : index
    %c256_147 = arith.constant 256 : index
    %381 = vector.load %arg8[%c1_145, %c0_146, %c256_147] : memref<2x8x512xf32, #tpu.memory_space<vmem>>, vector<1x1x128xf32>
    %382 = vector.shape_cast %381 : vector<1x1x128xf32> to vector<1x128xf32>
    %c1_148 = arith.constant 1 : index
    %c0_149 = arith.constant 0 : index
    %c384_150 = arith.constant 384 : index
    %383 = vector.load %arg8[%c1_148, %c0_149, %c384_150] : memref<2x8x512xf32, #tpu.memory_space<vmem>>, vector<1x1x128xf32>
    %384 = vector.shape_cast %383 : vector<1x1x128xf32> to vector<1x128xf32>
    %c1_151 = arith.constant 1 : index
    %c1_152 = arith.constant 1 : index
    %c0_153 = arith.constant 0 : index
    %385 = vector.load %arg8[%c1_151, %c1_152, %c0_153] : memref<2x8x512xf32, #tpu.memory_space<vmem>>, vector<1x1x128xf32>
    %386 = vector.shape_cast %385 : vector<1x1x128xf32> to vector<1x128xf32>
    %c1_154 = arith.constant 1 : index
    %c1_155 = arith.constant 1 : index
    %c128_156 = arith.constant 128 : index
    %387 = vector.load %arg8[%c1_154, %c1_155, %c128_156] : memref<2x8x512xf32, #tpu.memory_space<vmem>>, vector<1x1x128xf32>
    %388 = vector.shape_cast %387 : vector<1x1x128xf32> to vector<1x128xf32>
    %c1_157 = arith.constant 1 : index
    %c1_158 = arith.constant 1 : index
    %c256_159 = arith.constant 256 : index
    %389 = vector.load %arg8[%c1_157, %c1_158, %c256_159] : memref<2x8x512xf32, #tpu.memory_space<vmem>>, vector<1x1x128xf32>
    %390 = vector.shape_cast %389 : vector<1x1x128xf32> to vector<1x128xf32>
    %c1_160 = arith.constant 1 : index
    %c2_161 = arith.constant 2 : index
    %c0_162 = arith.constant 0 : index
    %391 = vector.load %arg8[%c1_160, %c2_161, %c0_162] : memref<2x8x512xf32, #tpu.memory_space<vmem>>, vector<1x1x384xf32>
    %392 = vector.shape_cast %391 : vector<1x1x384xf32> to vector<1x384xf32>
    %c1_163 = arith.constant 1 : index
    %c2_164 = arith.constant 2 : index
    %c384_165 = arith.constant 384 : index
    %393 = vector.load %arg8[%c1_163, %c2_164, %c384_165] : memref<2x8x512xf32, #tpu.memory_space<vmem>>, vector<1x1x128xf32>
    %394 = vector.shape_cast %393 : vector<1x1x128xf32> to vector<1x128xf32>
    %c1_166 = arith.constant 1 : index
    %c3_167 = arith.constant 3 : index
    %c0_168 = arith.constant 0 : index
    %395 = vector.load %arg8[%c1_166, %c3_167, %c0_168] : memref<2x8x512xf32, #tpu.memory_space<vmem>>, vector<1x1x128xf32>
    %396 = vector.shape_cast %395 : vector<1x1x128xf32> to vector<1x128xf32>
    %c1_169 = arith.constant 1 : index
    %c3_170 = arith.constant 3 : index
    %c128_171 = arith.constant 128 : index
    %397 = vector.load %arg8[%c1_169, %c3_170, %c128_171] : memref<2x8x512xf32, #tpu.memory_space<vmem>>, vector<1x1x256xf32>
    %398 = vector.shape_cast %397 : vector<1x1x256xf32> to vector<1x256xf32>
    %c1_172 = arith.constant 1 : index
    %c3_173 = arith.constant 3 : index
    %c384_174 = arith.constant 384 : index
    %399 = vector.load %arg8[%c1_172, %c3_173, %c384_174] : memref<2x8x512xf32, #tpu.memory_space<vmem>>, vector<1x1x128xf32>
    %400 = vector.shape_cast %399 : vector<1x1x128xf32> to vector<1x128xf32>
    %c1_175 = arith.constant 1 : index
    %c4_176 = arith.constant 4 : index
    %c0_177 = arith.constant 0 : index
    %401 = vector.load %arg8[%c1_175, %c4_176, %c0_177] : memref<2x8x512xf32, #tpu.memory_space<vmem>>, vector<1x1x256xf32>
    %402 = vector.shape_cast %401 : vector<1x1x256xf32> to vector<1x256xf32>
    %cst_178 = arith.constant dense<0.000000e+00> : vector<16xf32>
    %403 = vector.multi_reduction <add>, %368, %cst_178 [1] : vector<16x128xf32> to vector<16xf32>
    %404 = vector.shape_cast %403 : vector<16xf32> to vector<16x1xf32>
    %cst_179 = arith.constant 1.280000e+02 : f32
    %405 = vector.broadcast %cst_179 : f32 to vector<16x1xf32>
    %406 = arith.divf %404, %405 : vector<16x1xf32>
    %407 = vector.broadcast %406 : vector<16x1xf32> to vector<16x128xf32>
    %408 = arith.subf %368, %407 : vector<16x128xf32>
    %409 = arith.mulf %408, %408 : vector<16x128xf32>
    %cst_180 = arith.constant dense<0.000000e+00> : vector<16xf32>
    %410 = vector.multi_reduction <add>, %409, %cst_180 [1] : vector<16x128xf32> to vector<16xf32>
    %411 = vector.shape_cast %410 : vector<16xf32> to vector<16x1xf32>
    %cst_181 = arith.constant 1.280000e+02 : f32
    %412 = vector.broadcast %cst_181 : f32 to vector<16x1xf32>
    %413 = arith.divf %411, %412 : vector<16x1xf32>
    %414 = vector.broadcast %406 : vector<16x1xf32> to vector<16x128xf32>
    %415 = arith.subf %368, %414 : vector<16x128xf32>
    %cst_182 = arith.constant 9.99999997E-7 : f32
    %416 = vector.broadcast %cst_182 : f32 to vector<16x1xf32>
    %417 = arith.addf %413, %416 : vector<16x1xf32>
    %418 = math.rsqrt %417 : vector<16x1xf32>
    %419 = vector.broadcast %418 : vector<16x1xf32> to vector<16x128xf32>
    %420 = arith.mulf %415, %419 : vector<16x128xf32>
    %421 = vector.broadcast %378 : vector<1x128xf32> to vector<16x128xf32>
    %422 = arith.mulf %420, %421 : vector<16x128xf32>
    %423 = vector.broadcast %380 : vector<1x128xf32> to vector<16x128xf32>
    %424 = arith.addf %422, %423 : vector<16x128xf32>
    %425 = vector.extract_strided_slice %370 {offsets = [0, 0], sizes = [128, 384], strides = [1, 1]} : vector<128x512xbf16> to vector<128x384xbf16>
    %426 = arith.truncf %424 : vector<16x128xf32> to vector<16x128xbf16>
    %cst_183 = arith.constant dense<0.000000e+00> : vector<16x384xf32>
    %427 = tpu.matmul %426, %425, %cst_183 {dimension_numbers = #tpu.dot_dimension_numbers<[1], [0], [0], [1], [0, 0, 1, 1], [], []>} : vector<16x128xbf16>, vector<128x384xbf16>, vector<16x384xf32> -> vector<16x384xf32>
    %428 = vector.broadcast %392 : vector<1x384xf32> to vector<16x384xf32>
    %429 = arith.addf %427, %428 : vector<16x384xf32>
    %430 = vector.extract_strided_slice %429 {offsets = [0, 0], sizes = [16, 128], strides = [1, 1]} : vector<16x384xf32> to vector<16x128xf32>
    %431 = vector.extract_strided_slice %429 {offsets = [0, 128], sizes = [16, 128], strides = [1, 1]} : vector<16x384xf32> to vector<16x128xf32>
    %432 = vector.extract_strided_slice %429 {offsets = [0, 256], sizes = [16, 128], strides = [1, 1]} : vector<16x384xf32> to vector<16x128xf32>
    %433 = vector.extract_strided_slice %430 {offsets = [0, 0], sizes = [16, 32], strides = [1, 1]} : vector<16x128xf32> to vector<16x32xf32>
    %434 = vector.shape_cast %433 : vector<16x32xf32> to vector<2x8x32xf32>
    %435 = vector.extract_strided_slice %431 {offsets = [0, 0], sizes = [16, 32], strides = [1, 1]} : vector<16x128xf32> to vector<16x32xf32>
    %436 = vector.shape_cast %435 : vector<16x32xf32> to vector<2x8x32xf32>
    %437 = vector.extract_strided_slice %432 {offsets = [0, 0], sizes = [16, 32], strides = [1, 1]} : vector<16x128xf32> to vector<16x32xf32>
    %438 = vector.shape_cast %437 : vector<16x32xf32> to vector<2x8x32xf32>
    %439 = arith.truncf %434 : vector<2x8x32xf32> to vector<2x8x32xbf16>
    %440 = arith.truncf %436 : vector<2x8x32xf32> to vector<2x8x32xbf16>
    "tpu.trace_start"() <{level = 10 : i32, message = "btd,bsd->bts"}> : () -> ()
    %cst_184 = arith.constant dense<0.000000e+00> : vector<2x8x8xf32>
    %441 = tpu.matmul %439, %440, %cst_184 {dimension_numbers = #tpu.dot_dimension_numbers<[2], [2], [1], [1], [0, 0, 0, 1, 1, 1], [0], [0]>} : vector<2x8x32xbf16>, vector<2x8x32xbf16>, vector<2x8x8xf32> -> vector<2x8x8xf32>
    "tpu.trace_stop"() : () -> ()
    %cst_185 = arith.constant 0.0883883461 : f32
    %442 = vector.broadcast %cst_185 : f32 to vector<2x8x8xf32>
    %443 = arith.mulf %441, %442 : vector<2x8x8xf32>
    %444 = arith.addf %443, %9 : vector<2x8x8xf32>
    %cst_186 = arith.constant dense<0xFF800000> : vector<2x8xf32>
    %445 = vector.multi_reduction <maximumf>, %444, %cst_186 [2] : vector<2x8x8xf32> to vector<2x8xf32>
    %446 = vector.shape_cast %445 : vector<2x8xf32> to vector<2x8x1xf32>
    %447 = vector.broadcast %446 : vector<2x8x1xf32> to vector<2x8x8xf32>
    %448 = arith.subf %444, %447 : vector<2x8x8xf32>
    %449 = math.exp %448 : vector<2x8x8xf32>
    %cst_187 = arith.constant dense<0.000000e+00> : vector<2x8xf32>
    %450 = vector.multi_reduction <add>, %449, %cst_187 [2] : vector<2x8x8xf32> to vector<2x8xf32>
    %451 = vector.shape_cast %450 : vector<2x8xf32> to vector<2x8x1xf32>
    %452 = tpu.reciprocal %451 {approx = true} : vector<2x8x1xf32> -> vector<2x8x1xf32>
    %453 = vector.broadcast %452 : vector<2x8x1xf32> to vector<2x8x8xf32>
    %454 = arith.mulf %449, %453 : vector<2x8x8xf32>
    %455 = arith.truncf %454 : vector<2x8x8xf32> to vector<2x8x8xbf16>
    %456 = arith.truncf %438 : vector<2x8x32xf32> to vector<2x8x32xbf16>
    "tpu.trace_start"() <{level = 10 : i32, message = "bts,bsd->btd"}> : () -> ()
    %cst_188 = arith.constant dense<0.000000e+00> : vector<2x8x32xf32>
    %457 = tpu.matmul %455, %456, %cst_188 {dimension_numbers = #tpu.dot_dimension_numbers<[2], [1], [1], [2], [0, 0, 0, 1, 1, 2], [0], [0]>} : vector<2x8x8xbf16>, vector<2x8x32xbf16>, vector<2x8x32xf32> -> vector<2x8x32xf32>
    "tpu.trace_stop"() : () -> ()
    %458 = vector.shape_cast %457 : vector<2x8x32xf32> to vector<16x32xf32>
    %459 = vector.extract_strided_slice %430 {offsets = [0, 32], sizes = [16, 32], strides = [1, 1]} : vector<16x128xf32> to vector<16x32xf32>
    %460 = vector.shape_cast %459 : vector<16x32xf32> to vector<2x8x32xf32>
    %461 = vector.extract_strided_slice %431 {offsets = [0, 32], sizes = [16, 32], strides = [1, 1]} : vector<16x128xf32> to vector<16x32xf32>
    %462 = vector.shape_cast %461 : vector<16x32xf32> to vector<2x8x32xf32>
    %463 = vector.extract_strided_slice %432 {offsets = [0, 32], sizes = [16, 32], strides = [1, 1]} : vector<16x128xf32> to vector<16x32xf32>
    %464 = vector.shape_cast %463 : vector<16x32xf32> to vector<2x8x32xf32>
    %465 = arith.truncf %460 : vector<2x8x32xf32> to vector<2x8x32xbf16>
    %466 = arith.truncf %462 : vector<2x8x32xf32> to vector<2x8x32xbf16>
    "tpu.trace_start"() <{level = 10 : i32, message = "btd,bsd->bts"}> : () -> ()
    %cst_189 = arith.constant dense<0.000000e+00> : vector<2x8x8xf32>
    %467 = tpu.matmul %465, %466, %cst_189 {dimension_numbers = #tpu.dot_dimension_numbers<[2], [2], [1], [1], [0, 0, 0, 1, 1, 1], [0], [0]>} : vector<2x8x32xbf16>, vector<2x8x32xbf16>, vector<2x8x8xf32> -> vector<2x8x8xf32>
    "tpu.trace_stop"() : () -> ()
    %cst_190 = arith.constant 0.0883883461 : f32
    %468 = vector.broadcast %cst_190 : f32 to vector<2x8x8xf32>
    %469 = arith.mulf %467, %468 : vector<2x8x8xf32>
    %470 = arith.addf %469, %9 : vector<2x8x8xf32>
    %cst_191 = arith.constant dense<0xFF800000> : vector<2x8xf32>
    %471 = vector.multi_reduction <maximumf>, %470, %cst_191 [2] : vector<2x8x8xf32> to vector<2x8xf32>
    %472 = vector.shape_cast %471 : vector<2x8xf32> to vector<2x8x1xf32>
    %473 = vector.broadcast %472 : vector<2x8x1xf32> to vector<2x8x8xf32>
    %474 = arith.subf %470, %473 : vector<2x8x8xf32>
    %475 = math.exp %474 : vector<2x8x8xf32>
    %cst_192 = arith.constant dense<0.000000e+00> : vector<2x8xf32>
    %476 = vector.multi_reduction <add>, %475, %cst_192 [2] : vector<2x8x8xf32> to vector<2x8xf32>
    %477 = vector.shape_cast %476 : vector<2x8xf32> to vector<2x8x1xf32>
    %478 = tpu.reciprocal %477 {approx = true} : vector<2x8x1xf32> -> vector<2x8x1xf32>
    %479 = vector.broadcast %478 : vector<2x8x1xf32> to vector<2x8x8xf32>
    %480 = arith.mulf %475, %479 : vector<2x8x8xf32>
    %481 = arith.truncf %480 : vector<2x8x8xf32> to vector<2x8x8xbf16>
    %482 = arith.truncf %464 : vector<2x8x32xf32> to vector<2x8x32xbf16>
    "tpu.trace_start"() <{level = 10 : i32, message = "bts,bsd->btd"}> : () -> ()
    %cst_193 = arith.constant dense<0.000000e+00> : vector<2x8x32xf32>
    %483 = tpu.matmul %481, %482, %cst_193 {dimension_numbers = #tpu.dot_dimension_numbers<[2], [1], [1], [2], [0, 0, 0, 1, 1, 2], [0], [0]>} : vector<2x8x8xbf16>, vector<2x8x32xbf16>, vector<2x8x32xf32> -> vector<2x8x32xf32>
    "tpu.trace_stop"() : () -> ()
    %484 = vector.shape_cast %483 : vector<2x8x32xf32> to vector<16x32xf32>
    %485 = vector.extract_strided_slice %430 {offsets = [0, 64], sizes = [16, 32], strides = [1, 1]} : vector<16x128xf32> to vector<16x32xf32>
    %486 = vector.shape_cast %485 : vector<16x32xf32> to vector<2x8x32xf32>
    %487 = vector.extract_strided_slice %431 {offsets = [0, 64], sizes = [16, 32], strides = [1, 1]} : vector<16x128xf32> to vector<16x32xf32>
    %488 = vector.shape_cast %487 : vector<16x32xf32> to vector<2x8x32xf32>
    %489 = vector.extract_strided_slice %432 {offsets = [0, 64], sizes = [16, 32], strides = [1, 1]} : vector<16x128xf32> to vector<16x32xf32>
    %490 = vector.shape_cast %489 : vector<16x32xf32> to vector<2x8x32xf32>
    %491 = arith.truncf %486 : vector<2x8x32xf32> to vector<2x8x32xbf16>
    %492 = arith.truncf %488 : vector<2x8x32xf32> to vector<2x8x32xbf16>
    "tpu.trace_start"() <{level = 10 : i32, message = "btd,bsd->bts"}> : () -> ()
    %cst_194 = arith.constant dense<0.000000e+00> : vector<2x8x8xf32>
    %493 = tpu.matmul %491, %492, %cst_194 {dimension_numbers = #tpu.dot_dimension_numbers<[2], [2], [1], [1], [0, 0, 0, 1, 1, 1], [0], [0]>} : vector<2x8x32xbf16>, vector<2x8x32xbf16>, vector<2x8x8xf32> -> vector<2x8x8xf32>
    "tpu.trace_stop"() : () -> ()
    %cst_195 = arith.constant 0.0883883461 : f32
    %494 = vector.broadcast %cst_195 : f32 to vector<2x8x8xf32>
    %495 = arith.mulf %493, %494 : vector<2x8x8xf32>
    %496 = arith.addf %495, %9 : vector<2x8x8xf32>
    %cst_196 = arith.constant dense<0xFF800000> : vector<2x8xf32>
    %497 = vector.multi_reduction <maximumf>, %496, %cst_196 [2] : vector<2x8x8xf32> to vector<2x8xf32>
    %498 = vector.shape_cast %497 : vector<2x8xf32> to vector<2x8x1xf32>
    %499 = vector.broadcast %498 : vector<2x8x1xf32> to vector<2x8x8xf32>
    %500 = arith.subf %496, %499 : vector<2x8x8xf32>
    %501 = math.exp %500 : vector<2x8x8xf32>
    %cst_197 = arith.constant dense<0.000000e+00> : vector<2x8xf32>
    %502 = vector.multi_reduction <add>, %501, %cst_197 [2] : vector<2x8x8xf32> to vector<2x8xf32>
    %503 = vector.shape_cast %502 : vector<2x8xf32> to vector<2x8x1xf32>
    %504 = tpu.reciprocal %503 {approx = true} : vector<2x8x1xf32> -> vector<2x8x1xf32>
    %505 = vector.broadcast %504 : vector<2x8x1xf32> to vector<2x8x8xf32>
    %506 = arith.mulf %501, %505 : vector<2x8x8xf32>
    %507 = arith.truncf %506 : vector<2x8x8xf32> to vector<2x8x8xbf16>
    %508 = arith.truncf %490 : vector<2x8x32xf32> to vector<2x8x32xbf16>
    "tpu.trace_start"() <{level = 10 : i32, message = "bts,bsd->btd"}> : () -> ()
    %cst_198 = arith.constant dense<0.000000e+00> : vector<2x8x32xf32>
    %509 = tpu.matmul %507, %508, %cst_198 {dimension_numbers = #tpu.dot_dimension_numbers<[2], [1], [1], [2], [0, 0, 0, 1, 1, 2], [0], [0]>} : vector<2x8x8xbf16>, vector<2x8x32xbf16>, vector<2x8x32xf32> -> vector<2x8x32xf32>
    "tpu.trace_stop"() : () -> ()
    %510 = vector.shape_cast %509 : vector<2x8x32xf32> to vector<16x32xf32>
    %511 = vector.extract_strided_slice %430 {offsets = [0, 96], sizes = [16, 32], strides = [1, 1]} : vector<16x128xf32> to vector<16x32xf32>
    %512 = vector.shape_cast %511 : vector<16x32xf32> to vector<2x8x32xf32>
    %513 = vector.extract_strided_slice %431 {offsets = [0, 96], sizes = [16, 32], strides = [1, 1]} : vector<16x128xf32> to vector<16x32xf32>
    %514 = vector.shape_cast %513 : vector<16x32xf32> to vector<2x8x32xf32>
    %515 = vector.extract_strided_slice %432 {offsets = [0, 96], sizes = [16, 32], strides = [1, 1]} : vector<16x128xf32> to vector<16x32xf32>
    %516 = vector.shape_cast %515 : vector<16x32xf32> to vector<2x8x32xf32>
    %517 = arith.truncf %512 : vector<2x8x32xf32> to vector<2x8x32xbf16>
    %518 = arith.truncf %514 : vector<2x8x32xf32> to vector<2x8x32xbf16>
    "tpu.trace_start"() <{level = 10 : i32, message = "btd,bsd->bts"}> : () -> ()
    %cst_199 = arith.constant dense<0.000000e+00> : vector<2x8x8xf32>
    %519 = tpu.matmul %517, %518, %cst_199 {dimension_numbers = #tpu.dot_dimension_numbers<[2], [2], [1], [1], [0, 0, 0, 1, 1, 1], [0], [0]>} : vector<2x8x32xbf16>, vector<2x8x32xbf16>, vector<2x8x8xf32> -> vector<2x8x8xf32>
    "tpu.trace_stop"() : () -> ()
    %cst_200 = arith.constant 0.0883883461 : f32
    %520 = vector.broadcast %cst_200 : f32 to vector<2x8x8xf32>
    %521 = arith.mulf %519, %520 : vector<2x8x8xf32>
    %522 = arith.addf %521, %9 : vector<2x8x8xf32>
    %cst_201 = arith.constant dense<0xFF800000> : vector<2x8xf32>
    %523 = vector.multi_reduction <maximumf>, %522, %cst_201 [2] : vector<2x8x8xf32> to vector<2x8xf32>
    %524 = vector.shape_cast %523 : vector<2x8xf32> to vector<2x8x1xf32>
    %525 = vector.broadcast %524 : vector<2x8x1xf32> to vector<2x8x8xf32>
    %526 = arith.subf %522, %525 : vector<2x8x8xf32>
    %527 = math.exp %526 : vector<2x8x8xf32>
    %cst_202 = arith.constant dense<0.000000e+00> : vector<2x8xf32>
    %528 = vector.multi_reduction <add>, %527, %cst_202 [2] : vector<2x8x8xf32> to vector<2x8xf32>
    %529 = vector.shape_cast %528 : vector<2x8xf32> to vector<2x8x1xf32>
    %530 = tpu.reciprocal %529 {approx = true} : vector<2x8x1xf32> -> vector<2x8x1xf32>
    %531 = vector.broadcast %530 : vector<2x8x1xf32> to vector<2x8x8xf32>
    %532 = arith.mulf %527, %531 : vector<2x8x8xf32>
    %533 = arith.truncf %532 : vector<2x8x8xf32> to vector<2x8x8xbf16>
    %534 = arith.truncf %516 : vector<2x8x32xf32> to vector<2x8x32xbf16>
    "tpu.trace_start"() <{level = 10 : i32, message = "bts,bsd->btd"}> : () -> ()
    %cst_203 = arith.constant dense<0.000000e+00> : vector<2x8x32xf32>
    %535 = tpu.matmul %533, %534, %cst_203 {dimension_numbers = #tpu.dot_dimension_numbers<[2], [1], [1], [2], [0, 0, 0, 1, 1, 2], [0], [0]>} : vector<2x8x8xbf16>, vector<2x8x32xbf16>, vector<2x8x32xf32> -> vector<2x8x32xf32>
    "tpu.trace_stop"() : () -> ()
    %536 = vector.shape_cast %535 : vector<2x8x32xf32> to vector<16x32xf32>
    %537 = tpu.concatenate %458, %484, %510, %536 in 1 : vector<16x32xf32>, vector<16x32xf32>, vector<16x32xf32>, vector<16x32xf32> -> vector<16x128xf32>
    %538 = vector.extract_strided_slice %370 {offsets = [0, 384], sizes = [128, 128], strides = [1, 1]} : vector<128x512xbf16> to vector<128x128xbf16>
    %539 = arith.truncf %537 : vector<16x128xf32> to vector<16x128xbf16>
    %cst_204 = arith.constant dense<0.000000e+00> : vector<16x128xf32>
    %540 = tpu.matmul %539, %538, %cst_204 {dimension_numbers = #tpu.dot_dimension_numbers<[1], [0], [0], [1], [0, 0, 1, 1], [], []>} : vector<16x128xbf16>, vector<128x128xbf16>, vector<16x128xf32> -> vector<16x128xf32>
    %541 = arith.addf %368, %540 : vector<16x128xf32>
    %542 = vector.broadcast %394 : vector<1x128xf32> to vector<16x128xf32>
    %543 = arith.addf %541, %542 : vector<16x128xf32>
    %cst_205 = arith.constant dense<0.000000e+00> : vector<16xf32>
    %544 = vector.multi_reduction <add>, %543, %cst_205 [1] : vector<16x128xf32> to vector<16xf32>
    %545 = vector.shape_cast %544 : vector<16xf32> to vector<16x1xf32>
    %cst_206 = arith.constant 1.280000e+02 : f32
    %546 = vector.broadcast %cst_206 : f32 to vector<16x1xf32>
    %547 = arith.divf %545, %546 : vector<16x1xf32>
    %548 = vector.broadcast %547 : vector<16x1xf32> to vector<16x128xf32>
    %549 = arith.subf %543, %548 : vector<16x128xf32>
    %550 = arith.mulf %549, %549 : vector<16x128xf32>
    %cst_207 = arith.constant dense<0.000000e+00> : vector<16xf32>
    %551 = vector.multi_reduction <add>, %550, %cst_207 [1] : vector<16x128xf32> to vector<16xf32>
    %552 = vector.shape_cast %551 : vector<16xf32> to vector<16x1xf32>
    %cst_208 = arith.constant 1.280000e+02 : f32
    %553 = vector.broadcast %cst_208 : f32 to vector<16x1xf32>
    %554 = arith.divf %552, %553 : vector<16x1xf32>
    %555 = vector.broadcast %547 : vector<16x1xf32> to vector<16x128xf32>
    %556 = arith.subf %543, %555 : vector<16x128xf32>
    %cst_209 = arith.constant 9.99999997E-7 : f32
    %557 = vector.broadcast %cst_209 : f32 to vector<16x1xf32>
    %558 = arith.addf %554, %557 : vector<16x1xf32>
    %559 = math.rsqrt %558 : vector<16x1xf32>
    %560 = vector.broadcast %559 : vector<16x1xf32> to vector<16x128xf32>
    %561 = arith.mulf %556, %560 : vector<16x128xf32>
    %562 = vector.broadcast %382 : vector<1x128xf32> to vector<16x128xf32>
    %563 = arith.mulf %561, %562 : vector<16x128xf32>
    %564 = vector.broadcast %384 : vector<1x128xf32> to vector<16x128xf32>
    %565 = arith.addf %563, %564 : vector<16x128xf32>
    %566 = vector.extract_strided_slice %372 {offsets = [0, 0], sizes = [128, 128], strides = [1, 1]} : vector<128x512xbf16> to vector<128x128xbf16>
    %567 = arith.truncf %565 : vector<16x128xf32> to vector<16x128xbf16>
    %cst_210 = arith.constant dense<0.000000e+00> : vector<16x128xf32>
    %568 = tpu.matmul %567, %566, %cst_210 {dimension_numbers = #tpu.dot_dimension_numbers<[1], [0], [0], [1], [0, 0, 1, 1], [], []>} : vector<16x128xbf16>, vector<128x128xbf16>, vector<16x128xf32> -> vector<16x128xf32>
    %569 = vector.broadcast %396 : vector<1x128xf32> to vector<16x128xf32>
    %570 = arith.addf %568, %569 : vector<16x128xf32>
    %571 = vector.extract_strided_slice %372 {offsets = [0, 128], sizes = [128, 256], strides = [1, 1]} : vector<128x512xbf16> to vector<128x256xbf16>
    %572 = arith.truncf %3 : vector<16x128xf32> to vector<16x128xbf16>
    %cst_211 = arith.constant dense<0.000000e+00> : vector<16x256xf32>
    %573 = tpu.matmul %572, %571, %cst_211 {dimension_numbers = #tpu.dot_dimension_numbers<[1], [0], [0], [1], [0, 0, 1, 1], [], []>} : vector<16x128xbf16>, vector<128x256xbf16>, vector<16x256xf32> -> vector<16x256xf32>
    %574 = vector.broadcast %398 : vector<1x256xf32> to vector<16x256xf32>
    %575 = arith.addf %573, %574 : vector<16x256xf32>
    %576 = vector.extract_strided_slice %575 {offsets = [0, 0], sizes = [16, 128], strides = [1, 1]} : vector<16x256xf32> to vector<16x128xf32>
    %577 = vector.extract_strided_slice %575 {offsets = [0, 128], sizes = [16, 128], strides = [1, 1]} : vector<16x256xf32> to vector<16x128xf32>
    %578 = vector.extract_strided_slice %570 {offsets = [0, 0], sizes = [16, 32], strides = [1, 1]} : vector<16x128xf32> to vector<16x32xf32>
    %579 = vector.shape_cast %578 : vector<16x32xf32> to vector<2x8x32xf32>
    %580 = vector.extract_strided_slice %576 {offsets = [0, 0], sizes = [16, 32], strides = [1, 1]} : vector<16x128xf32> to vector<16x32xf32>
    %581 = vector.shape_cast %580 : vector<16x32xf32> to vector<2x8x32xf32>
    %582 = vector.extract_strided_slice %577 {offsets = [0, 0], sizes = [16, 32], strides = [1, 1]} : vector<16x128xf32> to vector<16x32xf32>
    %583 = vector.shape_cast %582 : vector<16x32xf32> to vector<2x8x32xf32>
    %584 = arith.truncf %579 : vector<2x8x32xf32> to vector<2x8x32xbf16>
    %585 = arith.truncf %581 : vector<2x8x32xf32> to vector<2x8x32xbf16>
    "tpu.trace_start"() <{level = 10 : i32, message = "btd,bsd->bts"}> : () -> ()
    %cst_212 = arith.constant dense<0.000000e+00> : vector<2x8x8xf32>
    %586 = tpu.matmul %584, %585, %cst_212 {dimension_numbers = #tpu.dot_dimension_numbers<[2], [2], [1], [1], [0, 0, 0, 1, 1, 1], [0], [0]>} : vector<2x8x32xbf16>, vector<2x8x32xbf16>, vector<2x8x8xf32> -> vector<2x8x8xf32>
    "tpu.trace_stop"() : () -> ()
    %cst_213 = arith.constant 0.0883883461 : f32
    %587 = vector.broadcast %cst_213 : f32 to vector<2x8x8xf32>
    %588 = arith.mulf %586, %587 : vector<2x8x8xf32>
    %589 = arith.addf %588, %15 : vector<2x8x8xf32>
    %cst_214 = arith.constant dense<0xFF800000> : vector<2x8xf32>
    %590 = vector.multi_reduction <maximumf>, %589, %cst_214 [2] : vector<2x8x8xf32> to vector<2x8xf32>
    %591 = vector.shape_cast %590 : vector<2x8xf32> to vector<2x8x1xf32>
    %592 = vector.broadcast %591 : vector<2x8x1xf32> to vector<2x8x8xf32>
    %593 = arith.subf %589, %592 : vector<2x8x8xf32>
    %594 = math.exp %593 : vector<2x8x8xf32>
    %cst_215 = arith.constant dense<0.000000e+00> : vector<2x8xf32>
    %595 = vector.multi_reduction <add>, %594, %cst_215 [2] : vector<2x8x8xf32> to vector<2x8xf32>
    %596 = vector.shape_cast %595 : vector<2x8xf32> to vector<2x8x1xf32>
    %597 = tpu.reciprocal %596 {approx = true} : vector<2x8x1xf32> -> vector<2x8x1xf32>
    %598 = vector.broadcast %597 : vector<2x8x1xf32> to vector<2x8x8xf32>
    %599 = arith.mulf %594, %598 : vector<2x8x8xf32>
    %600 = arith.truncf %599 : vector<2x8x8xf32> to vector<2x8x8xbf16>
    %601 = arith.truncf %583 : vector<2x8x32xf32> to vector<2x8x32xbf16>
    "tpu.trace_start"() <{level = 10 : i32, message = "bts,bsd->btd"}> : () -> ()
    %cst_216 = arith.constant dense<0.000000e+00> : vector<2x8x32xf32>
    %602 = tpu.matmul %600, %601, %cst_216 {dimension_numbers = #tpu.dot_dimension_numbers<[2], [1], [1], [2], [0, 0, 0, 1, 1, 2], [0], [0]>} : vector<2x8x8xbf16>, vector<2x8x32xbf16>, vector<2x8x32xf32> -> vector<2x8x32xf32>
    "tpu.trace_stop"() : () -> ()
    %603 = vector.shape_cast %602 : vector<2x8x32xf32> to vector<16x32xf32>
    %604 = vector.extract_strided_slice %570 {offsets = [0, 32], sizes = [16, 32], strides = [1, 1]} : vector<16x128xf32> to vector<16x32xf32>
    %605 = vector.shape_cast %604 : vector<16x32xf32> to vector<2x8x32xf32>
    %606 = vector.extract_strided_slice %576 {offsets = [0, 32], sizes = [16, 32], strides = [1, 1]} : vector<16x128xf32> to vector<16x32xf32>
    %607 = vector.shape_cast %606 : vector<16x32xf32> to vector<2x8x32xf32>
    %608 = vector.extract_strided_slice %577 {offsets = [0, 32], sizes = [16, 32], strides = [1, 1]} : vector<16x128xf32> to vector<16x32xf32>
    %609 = vector.shape_cast %608 : vector<16x32xf32> to vector<2x8x32xf32>
    %610 = arith.truncf %605 : vector<2x8x32xf32> to vector<2x8x32xbf16>
    %611 = arith.truncf %607 : vector<2x8x32xf32> to vector<2x8x32xbf16>
    "tpu.trace_start"() <{level = 10 : i32, message = "btd,bsd->bts"}> : () -> ()
    %cst_217 = arith.constant dense<0.000000e+00> : vector<2x8x8xf32>
    %612 = tpu.matmul %610, %611, %cst_217 {dimension_numbers = #tpu.dot_dimension_numbers<[2], [2], [1], [1], [0, 0, 0, 1, 1, 1], [0], [0]>} : vector<2x8x32xbf16>, vector<2x8x32xbf16>, vector<2x8x8xf32> -> vector<2x8x8xf32>
    "tpu.trace_stop"() : () -> ()
    %cst_218 = arith.constant 0.0883883461 : f32
    %613 = vector.broadcast %cst_218 : f32 to vector<2x8x8xf32>
    %614 = arith.mulf %612, %613 : vector<2x8x8xf32>
    %615 = arith.addf %614, %15 : vector<2x8x8xf32>
    %cst_219 = arith.constant dense<0xFF800000> : vector<2x8xf32>
    %616 = vector.multi_reduction <maximumf>, %615, %cst_219 [2] : vector<2x8x8xf32> to vector<2x8xf32>
    %617 = vector.shape_cast %616 : vector<2x8xf32> to vector<2x8x1xf32>
    %618 = vector.broadcast %617 : vector<2x8x1xf32> to vector<2x8x8xf32>
    %619 = arith.subf %615, %618 : vector<2x8x8xf32>
    %620 = math.exp %619 : vector<2x8x8xf32>
    %cst_220 = arith.constant dense<0.000000e+00> : vector<2x8xf32>
    %621 = vector.multi_reduction <add>, %620, %cst_220 [2] : vector<2x8x8xf32> to vector<2x8xf32>
    %622 = vector.shape_cast %621 : vector<2x8xf32> to vector<2x8x1xf32>
    %623 = tpu.reciprocal %622 {approx = true} : vector<2x8x1xf32> -> vector<2x8x1xf32>
    %624 = vector.broadcast %623 : vector<2x8x1xf32> to vector<2x8x8xf32>
    %625 = arith.mulf %620, %624 : vector<2x8x8xf32>
    %626 = arith.truncf %625 : vector<2x8x8xf32> to vector<2x8x8xbf16>
    %627 = arith.truncf %609 : vector<2x8x32xf32> to vector<2x8x32xbf16>
    "tpu.trace_start"() <{level = 10 : i32, message = "bts,bsd->btd"}> : () -> ()
    %cst_221 = arith.constant dense<0.000000e+00> : vector<2x8x32xf32>
    %628 = tpu.matmul %626, %627, %cst_221 {dimension_numbers = #tpu.dot_dimension_numbers<[2], [1], [1], [2], [0, 0, 0, 1, 1, 2], [0], [0]>} : vector<2x8x8xbf16>, vector<2x8x32xbf16>, vector<2x8x32xf32> -> vector<2x8x32xf32>
    "tpu.trace_stop"() : () -> ()
    %629 = vector.shape_cast %628 : vector<2x8x32xf32> to vector<16x32xf32>
    %630 = vector.extract_strided_slice %570 {offsets = [0, 64], sizes = [16, 32], strides = [1, 1]} : vector<16x128xf32> to vector<16x32xf32>
    %631 = vector.shape_cast %630 : vector<16x32xf32> to vector<2x8x32xf32>
    %632 = vector.extract_strided_slice %576 {offsets = [0, 64], sizes = [16, 32], strides = [1, 1]} : vector<16x128xf32> to vector<16x32xf32>
    %633 = vector.shape_cast %632 : vector<16x32xf32> to vector<2x8x32xf32>
    %634 = vector.extract_strided_slice %577 {offsets = [0, 64], sizes = [16, 32], strides = [1, 1]} : vector<16x128xf32> to vector<16x32xf32>
    %635 = vector.shape_cast %634 : vector<16x32xf32> to vector<2x8x32xf32>
    %636 = arith.truncf %631 : vector<2x8x32xf32> to vector<2x8x32xbf16>
    %637 = arith.truncf %633 : vector<2x8x32xf32> to vector<2x8x32xbf16>
    "tpu.trace_start"() <{level = 10 : i32, message = "btd,bsd->bts"}> : () -> ()
    %cst_222 = arith.constant dense<0.000000e+00> : vector<2x8x8xf32>
    %638 = tpu.matmul %636, %637, %cst_222 {dimension_numbers = #tpu.dot_dimension_numbers<[2], [2], [1], [1], [0, 0, 0, 1, 1, 1], [0], [0]>} : vector<2x8x32xbf16>, vector<2x8x32xbf16>, vector<2x8x8xf32> -> vector<2x8x8xf32>
    "tpu.trace_stop"() : () -> ()
    %cst_223 = arith.constant 0.0883883461 : f32
    %639 = vector.broadcast %cst_223 : f32 to vector<2x8x8xf32>
    %640 = arith.mulf %638, %639 : vector<2x8x8xf32>
    %641 = arith.addf %640, %15 : vector<2x8x8xf32>
    %cst_224 = arith.constant dense<0xFF800000> : vector<2x8xf32>
    %642 = vector.multi_reduction <maximumf>, %641, %cst_224 [2] : vector<2x8x8xf32> to vector<2x8xf32>
    %643 = vector.shape_cast %642 : vector<2x8xf32> to vector<2x8x1xf32>
    %644 = vector.broadcast %643 : vector<2x8x1xf32> to vector<2x8x8xf32>
    %645 = arith.subf %641, %644 : vector<2x8x8xf32>
    %646 = math.exp %645 : vector<2x8x8xf32>
    %cst_225 = arith.constant dense<0.000000e+00> : vector<2x8xf32>
    %647 = vector.multi_reduction <add>, %646, %cst_225 [2] : vector<2x8x8xf32> to vector<2x8xf32>
    %648 = vector.shape_cast %647 : vector<2x8xf32> to vector<2x8x1xf32>
    %649 = tpu.reciprocal %648 {approx = true} : vector<2x8x1xf32> -> vector<2x8x1xf32>
    %650 = vector.broadcast %649 : vector<2x8x1xf32> to vector<2x8x8xf32>
    %651 = arith.mulf %646, %650 : vector<2x8x8xf32>
    %652 = arith.truncf %651 : vector<2x8x8xf32> to vector<2x8x8xbf16>
    %653 = arith.truncf %635 : vector<2x8x32xf32> to vector<2x8x32xbf16>
    "tpu.trace_start"() <{level = 10 : i32, message = "bts,bsd->btd"}> : () -> ()
    %cst_226 = arith.constant dense<0.000000e+00> : vector<2x8x32xf32>
    %654 = tpu.matmul %652, %653, %cst_226 {dimension_numbers = #tpu.dot_dimension_numbers<[2], [1], [1], [2], [0, 0, 0, 1, 1, 2], [0], [0]>} : vector<2x8x8xbf16>, vector<2x8x32xbf16>, vector<2x8x32xf32> -> vector<2x8x32xf32>
    "tpu.trace_stop"() : () -> ()
    %655 = vector.shape_cast %654 : vector<2x8x32xf32> to vector<16x32xf32>
    %656 = vector.extract_strided_slice %570 {offsets = [0, 96], sizes = [16, 32], strides = [1, 1]} : vector<16x128xf32> to vector<16x32xf32>
    %657 = vector.shape_cast %656 : vector<16x32xf32> to vector<2x8x32xf32>
    %658 = vector.extract_strided_slice %576 {offsets = [0, 96], sizes = [16, 32], strides = [1, 1]} : vector<16x128xf32> to vector<16x32xf32>
    %659 = vector.shape_cast %658 : vector<16x32xf32> to vector<2x8x32xf32>
    %660 = vector.extract_strided_slice %577 {offsets = [0, 96], sizes = [16, 32], strides = [1, 1]} : vector<16x128xf32> to vector<16x32xf32>
    %661 = vector.shape_cast %660 : vector<16x32xf32> to vector<2x8x32xf32>
    %662 = arith.truncf %657 : vector<2x8x32xf32> to vector<2x8x32xbf16>
    %663 = arith.truncf %659 : vector<2x8x32xf32> to vector<2x8x32xbf16>
    "tpu.trace_start"() <{level = 10 : i32, message = "btd,bsd->bts"}> : () -> ()
    %cst_227 = arith.constant dense<0.000000e+00> : vector<2x8x8xf32>
    %664 = tpu.matmul %662, %663, %cst_227 {dimension_numbers = #tpu.dot_dimension_numbers<[2], [2], [1], [1], [0, 0, 0, 1, 1, 1], [0], [0]>} : vector<2x8x32xbf16>, vector<2x8x32xbf16>, vector<2x8x8xf32> -> vector<2x8x8xf32>
    "tpu.trace_stop"() : () -> ()
    %cst_228 = arith.constant 0.0883883461 : f32
    %665 = vector.broadcast %cst_228 : f32 to vector<2x8x8xf32>
    %666 = arith.mulf %664, %665 : vector<2x8x8xf32>
    %667 = arith.addf %666, %15 : vector<2x8x8xf32>
    %cst_229 = arith.constant dense<0xFF800000> : vector<2x8xf32>
    %668 = vector.multi_reduction <maximumf>, %667, %cst_229 [2] : vector<2x8x8xf32> to vector<2x8xf32>
    %669 = vector.shape_cast %668 : vector<2x8xf32> to vector<2x8x1xf32>
    %670 = vector.broadcast %669 : vector<2x8x1xf32> to vector<2x8x8xf32>
    %671 = arith.subf %667, %670 : vector<2x8x8xf32>
    %672 = math.exp %671 : vector<2x8x8xf32>
    %cst_230 = arith.constant dense<0.000000e+00> : vector<2x8xf32>
    %673 = vector.multi_reduction <add>, %672, %cst_230 [2] : vector<2x8x8xf32> to vector<2x8xf32>
    %674 = vector.shape_cast %673 : vector<2x8xf32> to vector<2x8x1xf32>
    %675 = tpu.reciprocal %674 {approx = true} : vector<2x8x1xf32> -> vector<2x8x1xf32>
    %676 = vector.broadcast %675 : vector<2x8x1xf32> to vector<2x8x8xf32>
    %677 = arith.mulf %672, %676 : vector<2x8x8xf32>
    %678 = arith.truncf %677 : vector<2x8x8xf32> to vector<2x8x8xbf16>
    %679 = arith.truncf %661 : vector<2x8x32xf32> to vector<2x8x32xbf16>
    "tpu.trace_start"() <{level = 10 : i32, message = "bts,bsd->btd"}> : () -> ()
    %cst_231 = arith.constant dense<0.000000e+00> : vector<2x8x32xf32>
    %680 = tpu.matmul %678, %679, %cst_231 {dimension_numbers = #tpu.dot_dimension_numbers<[2], [1], [1], [2], [0, 0, 0, 1, 1, 2], [0], [0]>} : vector<2x8x8xbf16>, vector<2x8x32xbf16>, vector<2x8x32xf32> -> vector<2x8x32xf32>
    "tpu.trace_stop"() : () -> ()
    %681 = vector.shape_cast %680 : vector<2x8x32xf32> to vector<16x32xf32>
    %682 = tpu.concatenate %603, %629, %655, %681 in 1 : vector<16x32xf32>, vector<16x32xf32>, vector<16x32xf32>, vector<16x32xf32> -> vector<16x128xf32>
    %683 = vector.extract_strided_slice %372 {offsets = [0, 384], sizes = [128, 128], strides = [1, 1]} : vector<128x512xbf16> to vector<128x128xbf16>
    %684 = arith.truncf %682 : vector<16x128xf32> to vector<16x128xbf16>
    %cst_232 = arith.constant dense<0.000000e+00> : vector<16x128xf32>
    %685 = tpu.matmul %684, %683, %cst_232 {dimension_numbers = #tpu.dot_dimension_numbers<[1], [0], [0], [1], [0, 0, 1, 1], [], []>} : vector<16x128xbf16>, vector<128x128xbf16>, vector<16x128xf32> -> vector<16x128xf32>
    %686 = arith.addf %543, %685 : vector<16x128xf32>
    %687 = vector.broadcast %400 : vector<1x128xf32> to vector<16x128xf32>
    %688 = arith.addf %686, %687 : vector<16x128xf32>
    %cst_233 = arith.constant dense<0.000000e+00> : vector<16xf32>
    %689 = vector.multi_reduction <add>, %688, %cst_233 [1] : vector<16x128xf32> to vector<16xf32>
    %690 = vector.shape_cast %689 : vector<16xf32> to vector<16x1xf32>
    %cst_234 = arith.constant 1.280000e+02 : f32
    %691 = vector.broadcast %cst_234 : f32 to vector<16x1xf32>
    %692 = arith.divf %690, %691 : vector<16x1xf32>
    %693 = vector.broadcast %692 : vector<16x1xf32> to vector<16x128xf32>
    %694 = arith.subf %688, %693 : vector<16x128xf32>
    %695 = arith.mulf %694, %694 : vector<16x128xf32>
    %cst_235 = arith.constant dense<0.000000e+00> : vector<16xf32>
    %696 = vector.multi_reduction <add>, %695, %cst_235 [1] : vector<16x128xf32> to vector<16xf32>
    %697 = vector.shape_cast %696 : vector<16xf32> to vector<16x1xf32>
    %cst_236 = arith.constant 1.280000e+02 : f32
    %698 = vector.broadcast %cst_236 : f32 to vector<16x1xf32>
    %699 = arith.divf %697, %698 : vector<16x1xf32>
    %700 = vector.broadcast %692 : vector<16x1xf32> to vector<16x128xf32>
    %701 = arith.subf %688, %700 : vector<16x128xf32>
    %cst_237 = arith.constant 9.99999997E-7 : f32
    %702 = vector.broadcast %cst_237 : f32 to vector<16x1xf32>
    %703 = arith.addf %699, %702 : vector<16x1xf32>
    %704 = math.rsqrt %703 : vector<16x1xf32>
    %705 = vector.broadcast %704 : vector<16x1xf32> to vector<16x128xf32>
    %706 = arith.mulf %701, %705 : vector<16x128xf32>
    %707 = vector.broadcast %386 : vector<1x128xf32> to vector<16x128xf32>
    %708 = arith.mulf %706, %707 : vector<16x128xf32>
    %709 = vector.broadcast %388 : vector<1x128xf32> to vector<16x128xf32>
    %710 = arith.addf %708, %709 : vector<16x128xf32>
    %711 = arith.truncf %710 : vector<16x128xf32> to vector<16x128xbf16>
    %cst_238 = arith.constant dense<0.000000e+00> : vector<16x256xf32>
    %712 = tpu.matmul %711, %374, %cst_238 {dimension_numbers = #tpu.dot_dimension_numbers<[1], [0], [0], [1], [0, 0, 1, 1], [], []>} : vector<16x128xbf16>, vector<128x256xbf16>, vector<16x256xf32> -> vector<16x256xf32>
    %713 = vector.broadcast %402 : vector<1x256xf32> to vector<16x256xf32>
    %714 = arith.addf %712, %713 : vector<16x256xf32>
    %cst_239 = arith.constant 0.000000e+00 : f32
    %715 = vector.broadcast %cst_239 : f32 to vector<16x256xf32>
    %716 = arith.maximumf %714, %715 : vector<16x256xf32>
    %717 = arith.truncf %716 : vector<16x256xf32> to vector<16x256xbf16>
    %cst_240 = arith.constant dense<0.000000e+00> : vector<16x128xf32>
    %718 = tpu.matmul %717, %376, %cst_240 {dimension_numbers = #tpu.dot_dimension_numbers<[1], [0], [0], [1], [0, 0, 1, 1], [], []>} : vector<16x256xbf16>, vector<256x128xbf16>, vector<16x128xf32> -> vector<16x128xf32>
    %719 = arith.addf %688, %718 : vector<16x128xf32>
    %720 = vector.broadcast %390 : vector<1x128xf32> to vector<16x128xf32>
    %721 = arith.addf %719, %720 : vector<16x128xf32>
    %c0_241 = arith.constant 0 : index
    %c5 = arith.constant 5 : index
    %c0_242 = arith.constant 0 : index
    %722 = vector.load %arg8[%c0_241, %c5, %c0_242] : memref<2x8x512xf32, #tpu.memory_space<vmem>>, vector<1x1x128xf32>
    %723 = vector.shape_cast %722 : vector<1x1x128xf32> to vector<1x128xf32>
    %c0_243 = arith.constant 0 : index
    %c5_244 = arith.constant 5 : index
    %c128_245 = arith.constant 128 : index
    %724 = vector.load %arg8[%c0_243, %c5_244, %c128_245] : memref<2x8x512xf32, #tpu.memory_space<vmem>>, vector<1x1x128xf32>
    %725 = vector.shape_cast %724 : vector<1x1x128xf32> to vector<1x128xf32>
    %cst_246 = arith.constant dense<0.000000e+00> : vector<16xf32>
    %726 = vector.multi_reduction <add>, %721, %cst_246 [1] : vector<16x128xf32> to vector<16xf32>
    %727 = vector.shape_cast %726 : vector<16xf32> to vector<16x1xf32>
    %cst_247 = arith.constant 1.280000e+02 : f32
    %728 = vector.broadcast %cst_247 : f32 to vector<16x1xf32>
    %729 = arith.divf %727, %728 : vector<16x1xf32>
    %730 = vector.broadcast %729 : vector<16x1xf32> to vector<16x128xf32>
    %731 = arith.subf %721, %730 : vector<16x128xf32>
    %732 = arith.mulf %731, %731 : vector<16x128xf32>
    %cst_248 = arith.constant dense<0.000000e+00> : vector<16xf32>
    %733 = vector.multi_reduction <add>, %732, %cst_248 [1] : vector<16x128xf32> to vector<16xf32>
    %734 = vector.shape_cast %733 : vector<16xf32> to vector<16x1xf32>
    %cst_249 = arith.constant 1.280000e+02 : f32
    %735 = vector.broadcast %cst_249 : f32 to vector<16x1xf32>
    %736 = arith.divf %734, %735 : vector<16x1xf32>
    %737 = vector.broadcast %729 : vector<16x1xf32> to vector<16x128xf32>
    %738 = arith.subf %721, %737 : vector<16x128xf32>
    %cst_250 = arith.constant 9.99999997E-7 : f32
    %739 = vector.broadcast %cst_250 : f32 to vector<16x1xf32>
    %740 = arith.addf %736, %739 : vector<16x1xf32>
    %741 = math.rsqrt %740 : vector<16x1xf32>
    %742 = vector.broadcast %741 : vector<16x1xf32> to vector<16x128xf32>
    %743 = arith.mulf %738, %742 : vector<16x128xf32>
    %744 = vector.broadcast %723 : vector<1x128xf32> to vector<16x128xf32>
    %745 = arith.mulf %743, %744 : vector<16x128xf32>
    %746 = vector.broadcast %725 : vector<1x128xf32> to vector<16x128xf32>
    %747 = arith.addf %745, %746 : vector<16x128xf32>
    %748 = vector.shape_cast %747 : vector<16x128xf32> to vector<2x8x128xf32>
    %c0_251 = arith.constant 0 : index
    %c0_252 = arith.constant 0 : index
    %c0_253 = arith.constant 0 : index
    %749 = vector.load %arg9[%c0_251, %c0_252, %c0_253] : memref<2x8x128xf32, #tpu.memory_space<vmem>>, vector<2x8x128xf32>
    tpu.vector_store %arg9[%c0_251, %c0_252, %c0_253], %748 {strides = array<i32>} : memref<2x8x128xf32, #tpu.memory_space<vmem>>, vector<2x8x128xf32>,
    return
  }
  func.func @transform_0(%arg0: i32) -> (i32, i32, i32) {
    %c0_i32 = arith.constant 0 : i32
    %c0_i32_0 = arith.constant 0 : i32
    %c0_i32_1 = arith.constant 0 : i32
    return %arg0, %c0_i32, %c0_i32_0 : i32, i32, i32
  }
  func.func @transform_1(%arg0: i32) -> (i32, i32, i32) {
    %c0_i32 = arith.constant 0 : i32
    %c0_i32_0 = arith.constant 0 : i32
    %c0_i32_1 = arith.constant 0 : i32
    return %arg0, %c0_i32, %c0_i32_0 : i32, i32, i32
  }
  func.func @transform_2(%arg0: i32) -> (i32, i32, i32) {
    %c0_i32 = arith.constant 0 : i32
    %c0_i32_0 = arith.constant 0 : i32
    %c0_i32_1 = arith.constant 0 : i32
    return %arg0, %c0_i32, %c0_i32_0 : i32, i32, i32
  }
  func.func @transform_3(%arg0: i32) -> (i32, i32, i32) {
    %c0_i32 = arith.constant 0 : i32
    %c0_i32_0 = arith.constant 0 : i32
    %c0_i32_1 = arith.constant 0 : i32
    return %arg0, %c0_i32, %c0_i32_0 : i32, i32, i32
  }
  func.func @transform_4(%arg0: i32) -> (i32, i32, i32, i32) {
    %c0_i32 = arith.constant 0 : i32
    %c0_i32_0 = arith.constant 0 : i32
    %c0_i32_1 = arith.constant 0 : i32
    %c0_i32_2 = arith.constant 0 : i32
    %c0_i32_3 = arith.constant 0 : i32
    return %c0_i32, %c0_i32_0, %c0_i32_1, %c0_i32_2 : i32, i32, i32, i32
  }
  func.func @transform_5(%arg0: i32) -> (i32, i32, i32) {
    %c0_i32 = arith.constant 0 : i32
    %c0_i32_0 = arith.constant 0 : i32
    %c0_i32_1 = arith.constant 0 : i32
    %c0_i32_2 = arith.constant 0 : i32
    return %c0_i32, %c0_i32_0, %c0_i32_1 : i32, i32, i32
  }
  func.func @transform_6(%arg0: i32) -> (i32, i32, i32) {
    %c0_i32 = arith.constant 0 : i32
    %c0_i32_0 = arith.constant 0 : i32
    %c0_i32_1 = arith.constant 0 : i32
    %c0_i32_2 = arith.constant 0 : i32
    return %c0_i32, %c0_i32_0, %c0_i32_1 : i32, i32, i32
  }
  func.func @transform_7(%arg0: i32) -> (i32, i32, i32) {
    %c0_i32 = arith.constant 0 : i32
    %c0_i32_0 = arith.constant 0 : i32
    %c0_i32_1 = arith.constant 0 : i32
    %c0_i32_2 = arith.constant 0 : i32
    return %c0_i32, %c0_i32_0, %c0_i32_1 : i32, i32, i32
  }
  func.func @transform_8(%arg0: i32) -> (i32, i32, i32) {
    %c0_i32 = arith.constant 0 : i32
    %c0_i32_0 = arith.constant 0 : i32
    %c0_i32_1 = arith.constant 0 : i32
    return %arg0, %c0_i32, %c0_i32_0 : i32, i32, i32
  }
}

</mosaic_0001>

<bundles_post_ra>
// kernel: tpu_custom_call.1
= control target key start
LH: loop header
LB: loop body
LE: loop exit
PB: predicated region body
PF: predicated region fallthrough
CT: control target
= control target key end

     0   :  { %13 = vsyncpa [#allocation3], 0  ;;  %s6415_s0 = inlined_call_operand.hbm [shape: f32[2,8,128], index: 0, kind: input, shape index: {}]   ;;  %s6416_s1 = inlined_call_operand.hbm [shape: f32[2,8,128], index: 1, kind: input, shape index: {}]   ;;  %s6417_s2 = inlined_call_operand.hbm [shape: f32[2,8,8], index: 2, kind: input, shape index: {}]   ;;  %s6418_s3 = inlined_call_operand.hbm [shape: f32[2,8,8], index: 3, kind: input, shape index: {}]   ;;  %s6419_s4 = inlined_call_operand.hbm [shape: bf16[2,2,128,512], index: 4, kind: input, shape index: {}]   ;;  %s6420_s5 = inlined_call_operand.hbm [shape: bf16[2,128,256], index: 5, kind: input, shape index: {}]   ;;  %s6421_s6 = inlined_call_operand.hbm [shape: bf16[2,256,128], index: 6, kind: input, shape index: {}]   ;;  %s6422_s7 = inlined_call_operand.hbm [shape: f32[2,8,512], index: 7, kind: input, shape index: {}]   ;;  %s6423_s8 = inlined_call_operand.hbm [shape: f32[2,8,128], index: 8, kind: output, shape index: {}]  }
   0x1   :  { %14 = vsyncpa [#allocation6], 0 }
   0x2   :  { %15 = vsyncpa [#allocation9], 0 }
   0x3   :  { %16 = vsyncpa [#allocation12], 0 }
   0x4   :  { %17 = vsyncpa [#allocation15], 0 }
   0x5   :  { %18 = vsyncpa [#allocation4], 0  ;;  %s36_s29 = sshll.u32 %s6416_s1, 4  ;;  %s5707_s30 = smov [#allocation5]   ;;  %s37_s29 = int_to_ptr.hbm [resolvable:$true] %s36_s29 }
   0x6   :  { %s38_s9 = sshll.u32 %s5707_s30, 4  ;;  %s62_s12 = sshll.u32 %s6418_s3, 4  ;;  %s39_s9 = int_to_ptr.vmem [resolvable:$true] %s38_s9  ;;  %s63_s12 = int_to_ptr.hbm [resolvable:$true] %s62_s12 }
   0x7   :  { %s5708_s13 = smov 128   ;;  %s5709_s14 = smov 8  }
   0x8   :  { %44 = dma.hbm_to_vmem [thread:$0]  %s37_s29, 256, %s39_s9, [#allocation6], %s5708_s13, %s5708_s13, %s5709_s14  }
   0x9   :  { %s5710_s15 = smov [#allocation8]   ;;  %s88_s1 = sshll.u32 %s6420_s5, 4  ;;  %s89_s1 = int_to_ptr.hbm [resolvable:$true] %s88_s1 }
   0xa   :  { %s64_s16 = sshll.u32 %s5710_s15, 4  ;;  %s23_s20 = sshll.u32 %s6415_s0, 4  ;;  %s65_s16 = int_to_ptr.vmem [resolvable:$true] %s64_s16  ;;  %s24_s20 = int_to_ptr.hbm [resolvable:$true] %s23_s20 }
   0xb   :  { %70 = dma.hbm_to_vmem [thread:$0]  %s63_s12, 256, %s65_s16, [#allocation9], %s5708_s13, %s5708_s13, %s5709_s14  }
   0xc   :  { %s5711_s21 = smov [#allocation11]   ;;  %s5712_s23 = smov [#allocation2]  }
   0xd   :  { %s90_s22 = sshll.u32 %s5711_s21, 4  ;;  %s25_s5 = sshll.u32 %s5712_s23, 4  ;;  %s91_s22 = int_to_ptr.vmem [resolvable:$true] %s90_s22  ;;  %s26_s5 = int_to_ptr.vmem [resolvable:$true] %s25_s5 }
   0xe   :  { %96 = dma.hbm_to_vmem [thread:$0]  %s89_s1, 4096, %s91_s22, [#allocation12], %s5708_s13, %s5708_s13, %s5709_s14  }
   0xf   :  { %s49_s26 = sshll.u32 %s6417_s2, 4  ;;  %s75_s28 = sshll.u32 %s6419_s4, 4  ;;  %s50_s26 = int_to_ptr.hbm [resolvable:$true] %s49_s26  ;;  %s76_s28 = int_to_ptr.hbm [resolvable:$true] %s75_s28 }
  0x10   :  { %31 = dma.hbm_to_vmem [thread:$0]  %s24_s20, 256, %s26_s5, [#allocation3], %s5708_s13, %s5708_s13, %s5709_s14  }
  0x11   :  { %s5713_s29 = smov [#allocation7]   ;;  %s5714_s9 = smov [#allocation10]  }
  0x12   :  { %s51_s30 = sshll.u32 %s5713_s29, 4  ;;  %s77_s2 = sshll.u32 %s5714_s9, 4  ;;  %s52_s30 = int_to_ptr.vmem [resolvable:$true] %s51_s30  ;;  %s78_s2 = int_to_ptr.vmem [resolvable:$true] %s77_s2 }
  0x13   :  { %57 = dma.hbm_to_vmem [thread:$0]  %s50_s26, 256, %s52_s30, [#allocation6], %s5708_s13, %s5708_s13, %s5709_s14  }
  0x14   :  { %s5715_s10 = smov 256   ;;  %s5716_s11 = smov 16  }
  0x15   :  { %83 = dma.hbm_to_vmem [thread:$0]  %s76_s28, 16384, %s78_s2, [#allocation9], %s5715_s10, %s5715_s10, %s5716_s11  }
  0x16   :  { %s101_s16 = sshll.u32 %s6421_s6, 4  ;;  %s5717_s4 = smov [#allocation13]   ;;  %s102_s16 = int_to_ptr.hbm [resolvable:$true] %s101_s16 }
  0x17   :  { %s103_s17 = sshll.u32 %s5717_s4, 4  ;;  %s114_s3 = sshll.u32 %s6422_s7, 4  ;;  %s104_s17 = int_to_ptr.vmem [resolvable:$true] %s103_s17  ;;  %s115_s3 = int_to_ptr.hbm [resolvable:$true] %s114_s3 }
  0x18   :  { %s5718_s19 = smov 64   ;;  %s5719_s20 = smov 4  }
  0x19   :  { %109 = dma.hbm_to_vmem [thread:$0]  %s102_s16, 4096, %s104_s17, [#allocation12], %s5718_s19, %s5718_s19, %s5719_s20  }
  0x1a   :  { %s5720_s21 = smov [#allocation14]   ;;  %s5721_s23 = smov 512  }
  0x1b   :  { %s116_s22 = sshll.u32 %s5720_s21, 4  ;;  %s5722_s5 = smov 32   ;;  %s117_s22 = int_to_ptr.vmem [resolvable:$true] %s116_s22 }
  0x1c   :  { %122 = dma.hbm_to_vmem [thread:$0]  %s115_s3, 1024, %s117_s22, [#allocation15], %s5721_s23, %s5721_s23, %s5722_s5  }
  0x1d   :  { %5695 = dma.done.wait [#allocation3], 256  }
  0x1e   :  { %5696 = vsyncadd [#allocation3], 4294967040 }
  0x1f   :  { %5697 = dma.done.wait [#allocation6], 512  }
  0x20   :  { %5698 = vsyncadd [#allocation6], 4294966784 }
  0x21   :  { %5699 = dma.done.wait [#allocation9], 16640  }
  0x22   :  { %5700 = vsyncadd [#allocation9], 4294950656 }
  0x23   :  { %5701 = dma.done.wait [#allocation12], 8192  }
  0x24   :  { %5702 = vsyncadd [#allocation12], 4294959104 }
  0x25   :  { %5703 = dma.done.wait [#allocation15], 1024  }
  0x26   :  { %5704 = vsyncadd [#allocation15], 4294966272  ;;  %v5814_v0 = vld [vmem:[#allocation2] sm:$0xff]  ;;  %v5817_v1 = vld [vmem:[#allocation2 + $0x8] sm:$0xff]  ;;  %v5723_v2 = vmov 128.0   ;;  %vm534_vm7 = vcmask 261120  }
  0x27   :  { %301 = vadd.xlane.f32.xlu0 %v5814_v0  ;;  %5321 = vrcp.f32 %v5723_v2  ;;  %v4303_v17 = vld [vmem:[#allocation10 + $0xe0] sm:$0xf]  ;;  %v5079_v18 = vld [vmem:[#allocation10 + $0xec] sm:$0xf0]  ;;  %v5077_v19 = vld [vmem:[#allocation10 + $0xe4] sm:$0xf] }
  0x28   :  { %v4304_v20 = vor.u32 %v5079_v18, %v4303_v17  ;;  %v4305_v21 = vld [vmem:[#allocation10 + $0xf0] sm:$0xf0]  ;;  %v4311_v22 = vld [vmem:[#allocation10 + $0xe8] sm:$0xf]  ;;  %v5080_v23 = vld [vmem:[#allocation10 + $0xf4] sm:$0xf0] }
  0x29   :  { %v4308_v24 = vor.u32 %v5077_v19, %v4305_v21  ;;  %v4312_v25 = vor.u32 %v5080_v23, %v4311_v22  ;;  %v4291_v26 = vld [vmem:[#allocation10 + $0xc0] sm:$0xf]  ;;  %v5075_v27 = vld [vmem:[#allocation10 + $0xcc] sm:$0xf0]  ;;  %v5073_v28 = vld [vmem:[#allocation10 + $0xc4] sm:$0xf] }
  0x2a   :  { %488 = vmatpush.bf16.msra.mxu0 %v4304_v20  ;;  %v4292_v29 = vor.u32 %v5075_v27, %v4291_v26  ;;  %v4293_v30 = vld [vmem:[#allocation10 + $0xd0] sm:$0xf0]  ;;  %v4299_v31 = vld [vmem:[#allocation10 + $0xc8] sm:$0xf]  ;;  %v5076_v32 = vld [vmem:[#allocation10 + $0xd4] sm:$0xf0] }
  0x2b   :  { %502 = vmatpush.bf16.msra.mxu1 %v4308_v24  ;;  %516 = vmatpush.bf16.msra.mxu2 %v4312_v25  ;;  %v4296_v33 = vor.u32 %v5073_v28, %v4293_v30  ;;  %v4300_v34 = vor.u32 %v5076_v32, %v4299_v31  ;;  %v4279_v35 = vld [vmem:[#allocation10 + $0xa0] sm:$0xf]  ;;  %v5071_v36 = vld [vmem:[#allocation10 + $0xac] sm:$0xf0]  ;;  %v5069_v37 = vld [vmem:[#allocation10 + $0xa4] sm:$0xf] }
  0x2c   :  { %v4280_v38 = vor.u32 %v5071_v36, %v4279_v35  ;;  %v4281_v39 = vld [vmem:[#allocation10 + $0xb0] sm:$0xf0]  ;;  %v4287_v40 = vld [vmem:[#allocation10 + $0xa8] sm:$0xf]  ;;  %v5072_v41 = vld [vmem:[#allocation10 + $0xb4] sm:$0xf0] }
  0x2d   :  { %v5322_v3 = vpop.eup %5321  ;;  %v4284_v42 = vor.u32 %v5069_v37, %v4281_v39  ;;  %v4288_v43 = vor.u32 %v5072_v41, %v4287_v40  ;;  %v4267_v44 = vld [vmem:[#allocation10 + $0x80] sm:$0xf]  ;;  %v5067_v45 = vld [vmem:[#allocation10 + $0x8c] sm:$0xf0]  ;;  %v5065_v46 = vld [vmem:[#allocation10 + $0x84] sm:$0xf] }
  0x2e   :  { %v306_v4 = vmul.f32 128.0, %v5322_v3  ;;  %vm310_vm0 = vweird.f32 %v5322_v3  ;;  %489 = vmatpush.bf16.msra.mxu0 %v4292_v29  ;;  %v4268_v47 = vor.u32 %v5067_v45, %v4267_v44  ;;  %v4269_v48 = vld [vmem:[#allocation10 + $0x90] sm:$0xf0]  ;;  %v4275_v49 = vld [vmem:[#allocation10 + $0x88] sm:$0xf]  ;;  %s5724_s6 = smov 96  }
  0x2f   :  { %303 = vadd.xlane.f32.xlu0 %v5817_v1  ;;  %503 = vmatpush.bf16.msra.mxu1 %v4296_v33  ;;  %v5068_v50 = vld [vmem:[#allocation10 + $0x94] sm:$0xf0]  ;;  %v4272_v51 = vor.u32 %v5065_v46, %v4269_v48  ;;  %v4255_v53 = vld [vmem:[#allocation10 + $0x60] sm:$0xf]  ;;  %v5063_v54 = vld [vmem:[#allocation10 + $0x6c] sm:$0xf0] }
  0x30   :  { %v307_v5 = vsub.f32 1.0, %v306_v4  ;;  %517 = vmatpush.bf16.msra.mxu2 %v4300_v34  ;;  %v4276_v52 = vor.u32 %v5068_v50, %v4275_v49  ;;  %v5061_v55 = vld [vmem:[#allocation10 + $0x64] sm:$0xf]  ;;  %v4256_v56 = vor.u32 %v5063_v54, %v4255_v53  ;;  %v4257_v57 = vld [vmem:[#allocation10 + $0x70] sm:$0xf0]  ;;  %vm607_vm8 = vcmask 1043456  }
  0x31   :  { %v4263_v58 = vld [vmem:[#allocation10 + $0x68] sm:$0xf]  ;;  %v5064_v59 = vld [vmem:[#allocation10 + $0x74] sm:$0xf0]  ;;  %v4260_v60 = vor.u32 %v5061_v55, %v4257_v57  ;;  %v4243_v62 = vld [vmem:[#allocation10 + $0x40] sm:$0xf] }
  0x32   :  { %v308_v6 = vmul.f32 %v5322_v3, %v307_v5  ;;  %490 = vmatpush.bf16.msra.mxu0 %v4280_v38  ;;  %v4264_v61 = vor.u32 %v5064_v59, %v4263_v58  ;;  %v5059_v63 = vld [vmem:[#allocation10 + $0x4c] sm:$0xf0]  ;;  %v5057_v2 = vld [vmem:[#allocation10 + $0x44] sm:$0xf]  ;;  %v4245_v4 = vld [vmem:[#allocation10 + $0x50] sm:$0xf0] }
  0x33   :  { %504 = vmatpush.bf16.msra.mxu1 %v4284_v42  ;;  %v4251_v5 = vld [vmem:[#allocation10 + $0x48] sm:$0xf]  ;;  %v5056_v18 = vld [vmem:[#allocation10 + $0x34] sm:$0xf0]  ;;  %v4219_v21 = vld [vmem:[#allocation10] sm:$0xf] }
  0x34   :  { %v309_v7 = vadd.f32 %v5322_v3, %v308_v6  ;;  %518 = vmatpush.bf16.msra.mxu2 %v4288_v43  ;;  %v5060_v6 = vld [vmem:[#allocation10 + $0x54] sm:$0xf0]  ;;  %v4239_v17 = vld [vmem:[#allocation10 + $0x28] sm:$0xf]  ;;  %v5051_v22 = vld [vmem:[#allocation10 + $0xc] sm:$0xf0] }
  0x35   :  { %v4240_v20 = vor.u32 %v5056_v18, %v4239_v17  ;;  %v5049_v23 = vld [vmem:[#allocation10 + $0x4] sm:$0xf]  ;;  %v4220_v25 = vor.u32 %v5051_v22, %v4219_v21  ;;  %v4221_v26 = vld [vmem:[#allocation10 + $0x10] sm:$0xf0]  ;;  %v4227_v27 = vld [vmem:[#allocation10 + $0x8] sm:$0xf] }
  0x36   :  { %v5820_v8 = vsel %vm310_vm0, %v5322_v3, %v309_v7  ;;  %491 = vmatpush.bf16.msra.mxu0 %v4268_v47  ;;  %v4244_v3 = vor.u32 %v5059_v63, %v4243_v62  ;;  %v4248_v7 = vor.u32 %v5057_v2, %v4245_v4  ;;  %v5052_v28 = vld [vmem:[#allocation10 + $0x14] sm:$0xf0]  ;;  %v4224_v30 = vor.u32 %v5049_v23, %v4221_v26  ;;  %v285_v50 = vld [vmem:[#allocation14] ss:$0 sm:$0xff]  ;;  %v286_v54 = vld [vmem:[#allocation14 + $0x8] ss:$0 sm:$0xff] }
  0x37   :  { %505 = vmatpush.bf16.msra.mxu1 %v4272_v51  ;;  %v4228_v31 = vor.u32 %v5052_v28, %v4227_v27  ;;  %v293_v59 = vld [vmem:[#allocation14 + $0x2] ss:$8 sm:$0x7]  ;;  %vm577_vm10 = vcmask 64512   ;;  %vm1035_vm12 = vcmask 523264   ;;  %vm1038_vm13 = vcmask 785408  }
  0x38   :  { %519 = vmatpush.bf16.msra.mxu2 %v4276_v52  ;;  %v356_v4 = vperm.slane %v293_v59, 2  ;;  %s5726_s7 = smov [#allocation16]   ;;  %s4197_s0 = sshll.u32 %s6423_s8, 4  ;;  %s4198_s0 = int_to_ptr.hbm [resolvable:$true] %s4197_s0 }
  0x39   :  { %s4195_s24 = sshll.u32 %s5726_s7, 4  ;;  %s4196_s24 = int_to_ptr.vmem [resolvable:$true] %s4195_s24 }
  0x3a   :  { %492 = vmatpush.bf16.msra.mxu0 %v4256_v56 }
  0x3b   :  { %506 = vmatpush.bf16.msra.mxu1 %v4260_v60  ;;  %v355_v60 = vperm.slane %v293_v59, 1 }
  0x3c   :  { %520 = vmatpush.bf16.msra.mxu2 %v4264_v61  ;;  %v354_v61 = vperm.slane %v293_v59, 0 }
  0x3e   :  { %493 = vmatpush.bf16.msra.mxu0 %v4244_v3 }
  0x3f   :  { %507 = vmatpush.bf16.msra.mxu1 %v4248_v7 }
  0x9a   :  { %v302_v9 = vpop.xlane.xlu0 %301 }
  0x9b   :  { %v312_v10 = vmul.f32 %v5820_v8, %v302_v9  ;;  %v4252_v9 = vor.u32 %v5060_v6, %v4251_v5 }
  0x9d   :  { %v5824_v11 = vsub.f32 %v5814_v0, %v312_v10  ;;  %521 = vmatpush.bf16.msra.mxu2 %v4252_v9  ;;  %v4231_v10 = vld [vmem:[#allocation10 + $0x20] sm:$0xf] }
  0x9f   :  { %v316_v12 = vmul.f32 %v5824_v11, %v5824_v11 }
  0xa1   :  { %318 = vadd.xlane.f32.xlu1 %v316_v12  ;;  %v5055_v12 = vld [vmem:[#allocation10 + $0x2c] sm:$0xf0]  ;;  %522 = vmatpush.bf16.msra.mxu2 %v4240_v20 }
  0xa2   :  { %v304_v13 = vpop.xlane.xlu0 %303 }
  0xa3   :  { %v313_v14 = vmul.f32 %v5820_v8, %v304_v13  ;;  %v5053_v13 = vld [vmem:[#allocation10 + $0x24] sm:$0xf] }
  0xa5   :  { %v5830_v15 = vsub.f32 %v5817_v1, %v313_v14  ;;  %v4232_v14 = vor.u32 %v5055_v12, %v4231_v10  ;;  %523 = vmatpush.bf16.msra.mxu2 %v4228_v31 }
  0xa7   :  { %v317_v16 = vmul.f32 %v5830_v15, %v5830_v15  ;;  %494 = vmatpush.bf16.msra.mxu0 %v4232_v14 }
  0xa9   :  { %320 = vadd.xlane.f32.xlu1 %v317_v16  ;;  %v4233_v16 = vld [vmem:[#allocation10 + $0x30] sm:$0xf0] }
  0xaa   :  { %v4236_v19 = vor.u32 %v5053_v13, %v4233_v16 }
  0xab   :  { %495 = vmatpush.bf16.msra.mxu0 %v4220_v25 }
  0xac   :  { %508 = vmatpush.bf16.msra.mxu1 %v4236_v19 }
  0xb0   :  { %509 = vmatpush.bf16.msra.mxu1 %v4224_v30 }
 0x114   :  { %v319_v24 = vpop.xlane.xlu1 %318 }
 0x115   :  { %v322_v29 = vmul.f32 %v319_v24, %v5820_v8 }
 0x117   :  { %v324_v32 = vadd.f32 1e-06, %v322_v29 }
 0x119   :  { %5323 = vrsqrt.f32 %v324_v32  ;;  %vm332_vm2 = vweird.f32 %v324_v32 }
 0x11c   :  { %v321_v33 = vpop.xlane.xlu1 %320 }
 0x11d   :  { %v323_v34 = vmul.f32 %v321_v33, %v5820_v8 }
 0x11f   :  { %v5324_v35 = vpop.eup %5323  ;;  %v325_v36 = vadd.f32 1e-06, %v323_v34 }
 0x120   :  { %v327_v37 = vmul.f32 %v5324_v35, %v324_v32  ;;  %vm333_vm1 = vweird.f32 %v5324_v35 }
 0x121   :  { %5325 = vrsqrt.f32 %v325_v36  ;;  %vm334_vm3 = vmor %vm332_vm2, %vm333_vm1  ;;  %vm342_vm5 = vweird.f32 %v325_v36 }
 0x122   :  { %v328_v38 = vmul.f32 %v5324_v35, %v327_v37 }
 0x124   :  { %v329_v39 = vmul.f32 0.5, %v328_v38 }
 0x126   :  { %v330_v40 = vsub.f32 1.5, %v329_v39 }
 0x127   :  { %v5326_v41 = vpop.eup %5325 }
 0x128   :  { %v331_v42 = vmul.f32 %v5324_v35, %v330_v40  ;;  %v337_v43 = vmul.f32 %v5326_v41, %v325_v36  ;;  %vm343_vm4 = vweird.f32 %v5326_v41 }
 0x129   :  { %vm344_vm6 = vmor %vm342_vm5, %vm343_vm4 }
 0x12a   :  { %v338_v44 = vmul.f32 %v5326_v41, %v337_v43  ;;  %v335_v45 = vsel %vm334_vm3, %v5324_v35, %v331_v42  ;;  %v160_v43 = vld [vmem:[#allocation7] sm:$0xff] }
 0x12b   :  { %v346_v48 = vmul.f32 %v335_v45, %v5824_v11  ;;  %vm162_vm9 = vcmp.eq.f32.partialorder %v160_v43, 0.0 }
 0x12c   :  { %v339_v46 = vmul.f32 0.5, %v338_v44 }
 0x12d   :  { %v348_v53 = vmul.f32 %v346_v48, %v285_v50 }
 0x12e   :  { %v340_v47 = vsub.f32 1.5, %v339_v46 }
 0x12f   :  { %v350_v56 = vadd.f32 %v348_v53, %v286_v54 }
 0x130   :  { %v341_v49 = vmul.f32 %v5326_v41, %v340_v47 }
 0x132   :  { %v345_v51 = vsel %vm344_vm6, %v5326_v41, %v341_v49 }
 0x133   :  { %v347_v52 = vmul.f32 %v345_v51, %v5830_v15 }
 0x135   :  { %v349_v55 = vmul.f32 %v347_v52, %v285_v50  ;;  %v5725_v50 = vmov 0.0  }
 0x136   :  { %v5872_v51 = vsel %vm162_vm9, -1e+30, %v5725_v50 }
 0x137   :  { %v351_v57 = vadd.f32 %v349_v55, %v286_v54 }
 0x139   :  { %v352_v58 = vpack.c.bf16 %v351_v57, %v350_v56  ;;  %v161_v57 = vld [vmem:[#allocation7 + $0x8] sm:$0xff] }
 0x13a   :  { %vm163_vm11 = vcmp.eq.f32.partialorder %v161_v57, 0.0 }
 0x13b   :  { %496 = vmatmul.bf16.vlgmr.msra.gmra.mxu0 %v352_v58  ;;  %510 = vmatmul.bf16.vlgmr.msra.gmra.mxu1 %v352_v58  ;;  %v5879_v59 = vsel %vm163_vm11, -1e+30, %v5725_v50 }
 0x13c   :  { %524 = vmatmul.bf16.vlgmr.msra.gmra.mxu2 %v352_v58 }
 0x1b8   :  { %v497_v11 = vpop.f32.mrf.mxu0  ;;  %v511_v62 = vpop.f32.mrf.mxu1 }
 0x1b9   :  { %v512_v63 = vadd.f32 %v511_v62, %v355_v60  ;;  %v498_v3 = vadd.f32 %v497_v11, %v354_v61 }
 0x1bb   :  { %v532_v2 = vpack.c.bf16 %v512_v63, %v512_v63  ;;  %v530_v9 = vpack.c.bf16 %v498_v3, %v498_v3 }
 0x1bd   :  { %v649_v15 = vunpack.c.l.b16 %v532_v2  ;;  %v539_v5 = vsel %vm534_vm7, %v532_v2, 0  ;;  %v644_v20 = vunpack.c.l.b16 %v530_v9 }
 0x1be   :  { %548 = vmatpush.bf16.xpose.msra.mxu3 %v539_v5 }
 0x1bf   :  { %v650_v6 = vpack.c.b16 %v649_v15, %v649_v15  ;;  %v525_v7 = vpop.f32.mrf.mxu2  ;;  %v645_v28 = vpack.c.b16 %v644_v20, %v644_v20 }
 0x1c0   :  { %v526_v10 = vadd.f32 %v525_v7, %v356_v4  ;;  %v499_v12 = vpop.f32.mrf.mxu0  ;;  %v513_v13 = vpop.f32.mrf.mxu1 }
 0x1c1   :  { %v500_v14 = vadd.f32 %v499_v12, %v354_v61  ;;  %v514_v16 = vadd.f32 %v513_v13, %v355_v60  ;;  %651 = vrot.lane.b32.xlu2 %v650_v6, %s5724_s6 }
 0x1c2   :  { %v5840_v17 = vpack.c.bf16 %v526_v10, %v526_v10 }
 0x1c3   :  { %v531_v18 = vpack.c.bf16 %v500_v14, %v500_v14  ;;  %v533_v19 = vpack.c.bf16 %v514_v16, %v514_v16 }
 0x1c4   :  { %v609_v24 = vsel %vm607_vm8, %v5840_v17, 0  ;;  %v730_v12 = vunpack.c.l.b16 %v5840_v17 }
 0x1c5   :  { %v673_v21 = vunpack.c.l.b16 %v531_v18  ;;  %v678_v22 = vunpack.c.l.b16 %v533_v19  ;;  %4313 = vmatmul.msk.bf16.vlgmr.msra.gmra.mxu3 %vm534_vm7, %v530_v9  ;;  %v558_v23 = vsel %vm534_vm7, %v533_v19, 0 }
 0x1c6   :  { %567 = vmatpush.bf16.xpose.msrb.mxu3 %v558_v23 }
 0x1c7   :  { %v527_v25 = vpop.f32.mrf.mxu2  ;;  %v679_v26 = vpack.c.b16 %v678_v22, %v678_v22  ;;  %v674_v27 = vpack.c.b16 %v673_v21, %v673_v21 }
 0x1c8   :  { %v528_v29 = vadd.f32 %v527_v25, %v356_v4 }
 0x1c9   :  { %680 = vrot.lane.b32.xlu0 %v679_v26, %s5724_s6  ;;  %675 = vrot.lane.b32.xlu1 %v674_v27, %s5724_s6 }
 0x1ca   :  { %v5848_v30 = vpack.c.bf16 %v528_v29, %v528_v29  ;;  %646 = vrot.lane.b32.xlu2 %v645_v28, %s5724_s6 }
 0x1cc   :  { %v628_v31 = vsel %vm607_vm8, %v5848_v30, 0 }
 0x1cd   :  { %637 = vmatpush.bf16.msrb.mxu0 %v628_v31 }
 0x1ce   :  { %618 = vmatpush.bf16.msra.mxu3 %v609_v24 }
 0x1d1   :  { %800 = vrot.lane.b32.xlu0 %v674_v27, %s5718_s19  ;;  %918 = vrot.lane.b32.xlu1 %v679_v26, %s5722_s5 }
 0x1d2   :  { %779 = vrot.lane.b32.xlu2 %v650_v6, %s5718_s19 }
 0x1d5   :  { %4314 = vmatmul.msk.bf16.vlgmr.msrb.gmra.mxu3 %vm534_vm7, %v531_v18  ;;  %v5889_v18 = vpack.c.b16 %v730_v12, %v730_v12 }
 0x1d9   :  { %893 = vrot.lane.b32.xlu0 %v645_v28, %s5722_s5 }
 0x1da   :  { %802 = vrot.lane.b32.xlu2 %v679_v26, %s5718_s19 }
 0x1e2   :  { %777 = vrot.lane.b32.xlu2 %v645_v28, %s5718_s19 }
 0x1ea   :  { %895 = vrot.lane.b32.xlu2 %v650_v6, %s5722_s5 }
 0x1f2   :  { %916 = vrot.lane.b32.xlu2 %v674_v27, %s5722_s5 }
 0x21b   :  { %v652_v32 = vpop.permute.xlu2 %651 }
 0x21c   :  { %v657_v33 = vsel %vm534_vm7, %v652_v32, 0 }
 0x21d   :  { %666 = vmatpush.bf16.xpose.msrb.mxu2 %v657_v33 }
 0x224   :  { %v647_v34 = vpop.permute.xlu2 %646 }
 0x225   :  { %4317 = vmatmul.msk.bf16.vlgmr.msrb.gmra.mxu2 %vm534_vm7, %v647_v34 }
 0x22c   :  { %v780_v35 = vpop.permute.xlu2 %779 }
 0x22d   :  { %v785_v36 = vsel %vm534_vm7, %v780_v35, 0 }
 0x22e   :  { %794 = vmatpush.bf16.xpose.msrb.mxu1 %v785_v36 }
 0x234   :  { %v803_v37 = vpop.permute.xlu2 %802 }
 0x235   :  { %v808_v42 = vsel %vm534_vm7, %v803_v37, 0  ;;  %v754_v37 = vunpack.c.l.b16 %v5848_v30 }
 0x23b   :  { %v681_v38 = vpop.permute.xlu0 %680  ;;  %v676_v39 = vpop.permute.xlu1 %675 }
 0x23c   :  { %v686_v40 = vsel %vm534_vm7, %v681_v38, 0  ;;  %v778_v41 = vpop.permute.xlu2 %777 }
 0x23d   :  { %4321 = vmatmul.msk.bf16.vlgmr.msrb.gmra.mxu1 %vm534_vm7, %v778_v41  ;;  %695 = vmatpush.bf16.xpose.msra.mxu2 %v686_v40  ;;  %v5900_v40 = vpack.c.b16 %v754_v37, %v754_v37 }
 0x243   :  { %v801_v44 = vpop.permute.xlu0 %800  ;;  %v919_v45 = vpop.permute.xlu1 %918 }
 0x244   :  { %v924_v46 = vsel %vm534_vm7, %v919_v45, 0  ;;  %v896_v47 = vpop.permute.xlu2 %895  ;;  %4318 = vmatmul.msk.bf16.vlgmr.msra.gmra.mxu2 %vm534_vm7, %v676_v39 }
 0x245   :  { %817 = vmatpush.bf16.xpose.msrb.mxu2 %v808_v42  ;;  %v901_v48 = vsel %vm534_vm7, %v896_v47, 0 }
 0x246   :  { %910 = vmatpush.bf16.xpose.msra.mxu1 %v901_v48 }
 0x248   :  { %v550_v49 = vpop.f32.mrf.mxu3 }
 0x249   :  { %v573_v52 = vmul.f32 0.088388346, %v550_v49 }
 0x24b   :  { %v894_v53 = vpop.permute.xlu0 %893  ;;  %v575_v54 = vadd.f32 %v573_v52, %v5872_v51 }
 0x24c   :  { %v917_v63 = vpop.permute.xlu2 %916 }
 0x24d   :  { %933 = vmatpush.bf16.xpose.msra.mxu2 %v924_v46  ;;  %4325 = vmatmul.msk.bf16.vlgmr.msra.gmra.mxu1 %vm534_vm7, %v894_v53  ;;  %v578_v55 = vsel %vm577_vm10, %v575_v54, -inf }
 0x24e   :  { %579 = vmax.xlane.f32.xlu1 %v578_v55 }
 0x250   :  { %v552_v56 = vpop.f32.mrf.mxu3 }
 0x254   :  { %4322 = vmatmul.msk.bf16.vlgmr.msrb.gmra.mxu2 %vm534_vm7, %v801_v44 }
 0x258   :  { %v569_v58 = vpop.f32.mrf.mxu3 }
 0x259   :  { %v574_v60 = vmul.f32 0.088388346, %v569_v58 }
 0x25b   :  { %v576_v61 = vadd.f32 %v574_v60, %v5879_v59 }
 0x25d   :  { %v581_v11 = vsel %vm577_vm10, %v576_v61, -inf }
 0x25e   :  { %582 = vmax.xlane.f32.xlu0 %v581_v11 }
 0x260   :  { %v571_v62 = vpop.f32.mrf.mxu3 }
 0x264   :  { %4326 = vmatmul.msk.bf16.vlgmr.msra.gmra.mxu2 %vm534_vm7, %v917_v63 }
 0x2a8   :  { %v668_v2 = vpop.f32.mrf.mxu2 }
 0x2a9   :  { %v701_v3 = vmul.f32 0.088388346, %v668_v2 }
 0x2ab   :  { %v703_v4 = vadd.f32 %v701_v3, %v5872_v51 }
 0x2ad   :  { %v705_v15 = vsel %vm577_vm10, %v703_v4, -inf }
 0x2ae   :  { %706 = vmax.xlane.f32.xlu2 %v705_v15 }
 0x2b0   :  { %v670_v5 = vpop.f32.mrf.mxu2 }
 0x2ba   :  { %v796_v6 = vpop.f32.mrf.mxu1 }
 0x2bb   :  { %v823_v7 = vmul.f32 0.088388346, %v796_v6 }
 0x2bd   :  { %v825_v9 = vadd.f32 %v823_v7, %v5872_v51 }
 0x2bf   :  { %v827_v10 = vsel %vm577_vm10, %v825_v9, -inf }
 0x2c0   :  { %828 = vmax.xlane.f32.xlu0 %v827_v10 }
 0x2c1   :  { %v580_v13 = vpop.xlane.xlu1 %579 }
 0x2c2   :  { %v798_v14 = vpop.f32.mrf.mxu1  ;;  %v584_v16 = vsub.f32 %v575_v54, %v580_v13 }
 0x2c4   :  { %v586_v19 = vmul.f32 1.442695, %v584_v16 }
 0x2c6   :  { %5327 = vpow2.f32 %v586_v19  ;;  %851 = vrot.lane.b32.xlu2 %v5889_v18, %s5718_s19 }
 0x2c7   :  { %v697_v20 = vpop.f32.mrf.mxu2 }
 0x2c8   :  { %v702_v21 = vmul.f32 0.088388346, %v697_v20 }
 0x2ca   :  { %v912_v22 = vpop.f32.mrf.mxu1  ;;  %v704_v23 = vadd.f32 %v702_v21, %v5879_v59 }
 0x2cb   :  { %v939_v25 = vmul.f32 0.088388346, %v912_v22 }
 0x2cc   :  { %v5328_v24 = vpop.eup %5327  ;;  %v708_v17 = vsel %vm577_vm10, %v704_v23, -inf }
 0x2cd   :  { %709 = vmax.xlane.f32.xlu1 %v708_v17  ;;  %v590_v26 = vsel %vm577_vm10, %v5328_v24, 0.0  ;;  %v941_v28 = vadd.f32 %v939_v25, %v5872_v51 }
 0x2ce   :  { %591 = vadd.xlane.f32.xlu0 %v590_v26 }
 0x2cf   :  { %v699_v27 = vpop.f32.mrf.mxu2  ;;  %v943_v34 = vsel %vm577_vm10, %v941_v28, -inf }
 0x2d1   :  { %v583_v29 = vpop.xlane.xlu0 %582 }
 0x2d2   :  { %v914_v31 = vpop.f32.mrf.mxu1  ;;  %v585_v32 = vsub.f32 %v576_v61, %v583_v29 }
 0x2d4   :  { %v588_v33 = vmul.f32 1.442695, %v585_v32 }
 0x2d5   :  { %944 = vmax.xlane.f32.xlu1 %v943_v34 }
 0x2d6   :  { %5329 = vpow2.f32 %v588_v33 }
 0x2d7   :  { %v819_v35 = vpop.f32.mrf.mxu2 }
 0x2d8   :  { %v824_v41 = vmul.f32 0.088388346, %v819_v35 }
 0x2da   :  { %v826_v43 = vadd.f32 %v824_v41, %v5879_v59 }
 0x2dc   :  { %v5330_v36 = vpop.eup %5329  ;;  %v830_v45 = vsel %vm577_vm10, %v826_v43, -inf }
 0x2dd   :  { %v593_v38 = vsel %vm577_vm10, %v5330_v36, 0.0 }
 0x2de   :  { %594 = vadd.xlane.f32.xlu1 %v593_v38 }
 0x2df   :  { %v821_v39 = vpop.f32.mrf.mxu2 }
 0x2e2   :  { %756 = vrot.lane.b32.xlu0 %v5900_v40, %s5724_s6 }
 0x2e7   :  { %v935_v42 = vpop.f32.mrf.mxu2 }
 0x2e8   :  { %v940_v44 = vmul.f32 0.088388346, %v935_v42 }
 0x2ea   :  { %v942_v30 = vadd.f32 %v940_v44, %v5879_v59 }
 0x2ec   :  { %v946_v47 = vsel %vm577_vm10, %v942_v30, -inf }
 0x2ef   :  { %831 = vmax.xlane.f32.xlu2 %v830_v45  ;;  %v937_v46 = vpop.f32.mrf.mxu2 }
 0x2f7   :  { %947 = vmax.xlane.f32.xlu2 %v946_v47  ;;  %732 = vrot.lane.b32.xlu1 %v5889_v18, %s5724_s6 }
 0x321   :  { %v707_v48 = vpop.xlane.xlu2 %706 }
 0x322   :  { %v711_v49 = vsub.f32 %v703_v4, %v707_v48 }
 0x324   :  { %v713_v52 = vmul.f32 1.442695, %v711_v49 }
 0x326   :  { %5331 = vpow2.f32 %v713_v52 }
 0x329   :  { %v852_v21 = vpop.permute.xlu2 %851 }
 0x32c   :  { %v5910_v53 = vpop.eup %5331 }
 0x32d   :  { %v717_v54 = vsel %vm577_vm10, %v5910_v53, 0.0 }
 0x32e   :  { %718 = vadd.xlane.f32.xlu0 %v717_v54 }
 0x333   :  { %v829_v55 = vpop.xlane.xlu0 %828 }
 0x334   :  { %v833_v56 = vsub.f32 %v825_v9, %v829_v55 }
 0x336   :  { %v835_v57 = vmul.f32 1.442695, %v833_v56 }
 0x338   :  { %5333 = vpow2.f32 %v835_v57 }
 0x33e   :  { %v5914_v58 = vpop.eup %5333 }
 0x33f   :  { %v839_v60 = vsel %vm577_vm10, %v5914_v58, 0.0 }
 0x340   :  { %840 = vadd.xlane.f32.xlu2 %v839_v60  ;;  %v710_v61 = vpop.xlane.xlu1 %709 }
 0x341   :  { %v712_v11 = vsub.f32 %v704_v23, %v710_v61  ;;  %v592_v62 = vpop.xlane.xlu0 %591 }
 0x342   :  { %872 = vrot.lane.b32.xlu0 %v5900_v40, %s5718_s19  ;;  %5335 = vrcp.f32 %v592_v62 }
 0x343   :  { %v715_v63 = vmul.f32 1.442695, %v712_v11 }
 0x345   :  { %5337 = vpow2.f32 %v715_v63 }
 0x348   :  { %v5336_v2 = vpop.eup %5335  ;;  %v945_v3 = vpop.xlane.xlu1 %944 }
 0x349   :  { %v598_v4 = vmul.f32 %v5336_v2, %v5328_v24  ;;  %v949_v15 = vsub.f32 %v941_v28, %v945_v3  ;;  %v857_v28 = vsel %vm607_vm8, %v852_v21, 0 }
 0x34b   :  { %v5338_v5 = vpop.eup %5337  ;;  %v600_v6 = vpack.c.bf16 %v598_v4, %v598_v4  ;;  %v951_v7 = vmul.f32 1.442695, %v949_v15 }
 0x34c   :  { %v720_v9 = vsel %vm577_vm10, %v5338_v5, 0.0 }
 0x34d   :  { %5339 = vpow2.f32 %v951_v7  ;;  %721 = vadd.xlane.f32.xlu2 %v720_v9  ;;  %4315 = vmatmul.msk.bf16.vlgmr.msra.gmra.mxu3 %vm577_vm10, %v600_v6 }
 0x351   :  { %v595_v10 = vpop.xlane.xlu1 %594 }
 0x352   :  { %5341 = vrcp.f32 %v595_v10 }
 0x353   :  { %v5922_v12 = vpop.eup %5339 }
 0x354   :  { %v757_v13 = vpop.permute.xlu0 %756  ;;  %v955_v14 = vsel %vm577_vm10, %v5922_v12, 0.0 }
 0x355   :  { %v762_v16 = vsel %vm607_vm8, %v757_v13, 0  ;;  %956 = vadd.xlane.f32.xlu1 %v955_v14 }
 0x356   :  { %771 = vmatpush.bf16.msra.mxu0 %v762_v16 }
 0x358   :  { %v5342_v19 = vpop.eup %5341 }
 0x359   :  { %v599_v20 = vmul.f32 %v5342_v19, %v5330_v36 }
 0x35b   :  { %v601_v22 = vpack.c.bf16 %v599_v20, %v599_v20 }
 0x35d   :  { %4316 = vmatmul.msk.bf16.vlgmr.msrb.gmra.mxu0 %vm577_vm10, %v601_v22 }
 0x362   :  { %v832_v23 = vpop.xlane.xlu2 %831 }
 0x363   :  { %v834_v24 = vsub.f32 %v826_v43, %v832_v23 }
 0x365   :  { %v837_v25 = vmul.f32 1.442695, %v834_v24 }
 0x367   :  { %5343 = vpow2.f32 %v837_v25 }
 0x369   :  { %v733_v17 = vpop.permute.xlu1 %732 }
 0x36a   :  { %v948_v26 = vpop.xlane.xlu2 %947  ;;  %v738_v27 = vsel %vm607_vm8, %v733_v17, 0 }
 0x36b   :  { %v950_v29 = vsub.f32 %v942_v30, %v948_v26  ;;  %747 = vmatpush.bf16.msrb.mxu3 %v738_v27  ;;  %v5078_v26 = vld [vmem:[#allocation10 + $0xec] sm:$0xf]  ;;  %v4357_v27 = vld [vmem:[#allocation10 + $0xf8] sm:$0xf0] }
 0x36d   :  { %v5344_v31 = vpop.eup %5343  ;;  %v953_v32 = vmul.f32 1.442695, %v950_v29  ;;  %v4360_v29 = vor.u32 %v5078_v26, %v4357_v27  ;;  %v4417_v26 = vld [vmem:[#allocation10 + $0x170] sm:$0xf0] }
 0x36e   :  { %v842_v33 = vsel %vm577_vm10, %v5344_v31, 0.0 }
 0x36f   :  { %866 = vmatpush.bf16.msra.mxu3 %v857_v28  ;;  %5345 = vpow2.f32 %v953_v32  ;;  %843 = vadd.xlane.f32.xlu2 %v842_v33  ;;  %v5074_v28 = vld [vmem:[#allocation10 + $0xcc] sm:$0xf] }
 0x370   :  { %1074 = vmatpush.bf16.msrb.mxu1 %v4360_v29  ;;  %v5070_v33 = vld [vmem:[#allocation10 + $0xac] sm:$0xf]  ;;  %v4409_v29 = vld [vmem:[#allocation10 + $0x150] sm:$0xf0] }
 0x375   :  { %v5346_v34 = vpop.eup %5345 }
 0x376   :  { %v958_v35 = vsel %vm577_vm10, %v5346_v34, 0.0 }
 0x377   :  { %959 = vadd.xlane.f32.xlu0 %v958_v35 }
 0x387   :  { %967 = vrot.lane.b32.xlu2 %v5889_v18, %s5722_s5 }
 0x38f   :  { %988 = vrot.lane.b32.xlu2 %v5900_v40, %s5722_s5 }
 0x3a1   :  { %v719_v36 = vpop.xlane.xlu0 %718 }
 0x3a2   :  { %5347 = vrcp.f32 %v719_v36  ;;  %v5066_v36 = vld [vmem:[#allocation10 + $0x8c] sm:$0xf] }
 0x3a8   :  { %v5348_v37 = vpop.eup %5347 }
 0x3a9   :  { %v725_v38 = vmul.f32 %v5348_v37, %v5910_v53  ;;  %v4345_v37 = vld [vmem:[#allocation10 + $0x98] sm:$0xf0] }
 0x3ab   :  { %v727_v39 = vpack.c.bf16 %v725_v38, %v725_v38  ;;  %v4348_v38 = vor.u32 %v5066_v36, %v4345_v37  ;;  %v4401_v36 = vld [vmem:[#allocation10 + $0x130] sm:$0xf0] }
 0x3ad   :  { %4319 = vmatmul.msk.bf16.vlgmr.msrb.gmra.mxu3 %vm577_vm10, %v727_v39  ;;  %v5062_v39 = vld [vmem:[#allocation10 + $0x6c] sm:$0xf] }
 0x3b3   :  { %v841_v41 = vpop.xlane.xlu2 %840 }
 0x3b4   :  { %5349 = vrcp.f32 %v841_v41  ;;  %v873_v42 = vpop.permute.xlu0 %872  ;;  %v4341_v41 = vld [vmem:[#allocation10 + $0x78] sm:$0xf0] }
 0x3b5   :  { %v878_v43 = vsel %vm607_vm8, %v873_v42, 0  ;;  %v4344_v42 = vor.u32 %v5062_v39, %v4341_v41 }
 0x3b6   :  { %887 = vmatpush.bf16.msrb.mxu0 %v878_v43  ;;  %v5058_v43 = vld [vmem:[#allocation10 + $0x4c] sm:$0xf] }
 0x3ba   :  { %v5350_v44 = vpop.eup %5349 }
 0x3bb   :  { %v847_v18 = vmul.f32 %v5350_v44, %v5914_v58  ;;  %v4337_v44 = vld [vmem:[#allocation10 + $0x58] sm:$0xf0] }
 0x3bd   :  { %v849_v45 = vpack.c.bf16 %v847_v18, %v847_v18  ;;  %v5054_v18 = vld [vmem:[#allocation10 + $0x2c] sm:$0xf] }
 0x3bf   :  { %4323 = vmatmul.msk.bf16.vlgmr.msra.gmra.mxu3 %vm577_vm10, %v849_v45  ;;  %v4340_v45 = vor.u32 %v5058_v43, %v4337_v44  ;;  %v5081_v44 = vld [vmem:[#allocation10 + $0x104] sm:$0xf] }
 0x3c0   :  { %v722_v40 = vpop.xlane.xlu2 %721 }
 0x3c1   :  { %5351 = vrcp.f32 %v722_v40  ;;  %v4333_v40 = vld [vmem:[#allocation10 + $0x38] sm:$0xf0] }
 0x3c7   :  { %v5352_v46 = vpop.eup %5351 }
 0x3c8   :  { %v726_v30 = vmul.f32 %v5352_v46, %v5338_v5  ;;  %v957_v53 = vpop.xlane.xlu1 %956  ;;  %v4336_v46 = vor.u32 %v5054_v18, %v4333_v40  ;;  %v4393_v18 = vld [vmem:[#allocation10 + $0x110] sm:$0xf0] }
 0x3c9   :  { %5353 = vrcp.f32 %v957_v53  ;;  %v158_v40 = vld [vmem:[#allocation5] sm:$0xff] }
 0x3ca   :  { %v728_v47 = vpack.c.bf16 %v726_v30, %v726_v30  ;;  %v5050_v30 = vld [vmem:[#allocation10 + $0xc] sm:$0xf] }
 0x3cc   :  { %4320 = vmatmul.msk.bf16.vlgmr.msra.gmra.mxu0 %vm577_vm10, %v728_v47  ;;  %v4329_v47 = vld [vmem:[#allocation10 + $0x18] sm:$0xf0] }
 0x3cf   :  { %v5354_v56 = vpop.eup %5353 }
 0x3d0   :  { %v5942_v48 = vpop.f32.mrf.mxu3  ;;  %v963_v58 = vmul.f32 %v5354_v56, %v5922_v12 }
 0x3d2   :  { %v965_v2 = vpack.c.bf16 %v963_v58, %v963_v58 }
 0x3d8   :  { %v622_v49 = vpop.f32.mrf.mxu3 }
 0x3d9   :  { %v4332_v49 = vor.u32 %v5050_v30, %v4329_v47  ;;  %v4391_v47 = vld [vmem:[#allocation10 + $0x1e0] sm:$0xf] }
 0x3da   :  { %v5944_v52 = vpop.f32.mrf.mxu0 }
 0x3e2   :  { %v844_v54 = vpop.xlane.xlu2 %843  ;;  %v641_v55 = vpop.f32.mrf.mxu0 }
 0x3e3   :  { %5355 = vrcp.f32 %v844_v54 }
 0x3e9   :  { %v5356_v57 = vpop.eup %5355 }
 0x3ea   :  { %v848_v60 = vmul.f32 %v5356_v57, %v5344_v31  ;;  %v968_v61 = vpop.permute.xlu2 %967  ;;  %v960_v63 = vpop.xlane.xlu0 %959  ;;  %v4353_v31 = vld [vmem:[#allocation10 + $0xd8] sm:$0xf0] }
 0x3eb   :  { %v973_v11 = vsel %vm607_vm8, %v968_v61, 0  ;;  %5357 = vrcp.f32 %v960_v63  ;;  %v4356_v32 = vor.u32 %v5074_v28, %v4353_v31  ;;  %v5089_v28 = vld [vmem:[#allocation10 + $0x144] sm:$0xf] }
 0x3ec   :  { %v850_v62 = vpack.c.bf16 %v848_v60, %v848_v60  ;;  %982 = vmatpush.bf16.msrb.mxu3 %v973_v11 }
 0x3ed   :  { %1075 = vmatpush.bf16.msrb.mxu1 %v4356_v32 }
 0x3ee   :  { %4324 = vmatmul.msk.bf16.vlgmr.msrb.gmra.mxu0 %vm577_vm10, %v850_v62 }
 0x3ef   :  { %4327 = vmatmul.msk.bf16.vlgmr.msrb.gmra.mxu3 %vm577_vm10, %v965_v2 }
 0x3f1   :  { %v5358_v15 = vpop.eup %5357 }
 0x3f2   :  { %v989_v3 = vpop.permute.xlu2 %988  ;;  %v964_v5 = vmul.f32 %v5358_v15, %v5346_v34  ;;  %v4349_v34 = vld [vmem:[#allocation10 + $0xb8] sm:$0xf0] }
 0x3f3   :  { %v994_v4 = vsel %vm607_vm8, %v989_v3, 0  ;;  %v4352_v35 = vor.u32 %v5070_v33, %v4349_v34  ;;  %v4412_v33 = vor.u32 %v5089_v28, %v4409_v29 }
 0x3f4   :  { %1003 = vmatpush.bf16.msra.mxu0 %v994_v4  ;;  %v966_v6 = vpack.c.bf16 %v964_v5, %v964_v5 }
 0x3f5   :  { %1076 = vmatpush.bf16.msrb.mxu1 %v4352_v35  ;;  %v5085_v35 = vld [vmem:[#allocation10 + $0x124] sm:$0xf] }
 0x3f9   :  { %1077 = vmatpush.bf16.msrb.mxu1 %v4348_v38  ;;  %v4404_v38 = vor.u32 %v5085_v35, %v4401_v36  ;;  %v287_v36 = vld [vmem:[#allocation14 + $0x10] ss:$0 sm:$0xff] }
 0x3fd   :  { %1078 = vmatpush.bf16.msrb.mxu1 %v4344_v42 }
 0x3fe   :  { %4328 = vmatmul.msk.bf16.vlgmr.msra.gmra.mxu0 %vm577_vm10, %v966_v6  ;;  %v294_v6 = vld [vmem:[#allocation14 + $0x1a] ss:$0 sm:$0xff] }
 0x401   :  { %1079 = vmatpush.bf16.msrb.mxu1 %v4340_v45  ;;  %v4396_v45 = vor.u32 %v5081_v44, %v4393_v18 }
 0x405   :  { %1080 = vmatpush.bf16.msrb.mxu1 %v4336_v46  ;;  %v159_v46 = vld [vmem:[#allocation5 + $0x8] sm:$0xff] }
 0x406   :  { %v5983_v30 = vpack.c.bf16 %v159_v46, %v158_v40  ;;  %v5990_v40 = vld [vmem:[#allocation14 + $0xb] ss:$8 sm:$0x3] }
 0x407   :  { %v1201_v46 = vperm.slane %v5990_v40, 0 }
 0x409   :  { %1081 = vmatpush.bf16.msrb.mxu1 %v4332_v49  ;;  %v5111_v49 = vld [vmem:[#allocation10 + $0x1ec] sm:$0xf0] }
 0x430   :  { %v749_v7 = vpop.f32.mrf.mxu3 }
 0x438   :  { %v751_v9 = vpop.f32.mrf.mxu3 }
 0x442   :  { %v868_v10 = vpop.f32.mrf.mxu3 }
 0x449   :  { %v773_v12 = vpop.f32.mrf.mxu0 }
 0x44a   :  { %v5261_v13 = vpack.i.bf16 %v773_v12, %v749_v7  ;;  %v870_v14 = vpop.f32.mrf.mxu3 }
 0x44b   :  { %v4449_v14 = vld [vmem:[#allocation10 + $0x1f0] sm:$0xf0] }
 0x44c   :  { %5262 = vrot.lane.b32.xlu2 %v5261_v13, %s5722_s5  ;;  %v5109_v13 = vld [vmem:[#allocation10 + $0x1e4] sm:$0xf] }
 0x451   :  { %v775_v16 = vpop.f32.mrf.mxu0 }
 0x452   :  { %v5105_v16 = vld [vmem:[#allocation10 + $0x1c4] sm:$0xf] }
 0x46b   :  { %v889_v19 = vpop.f32.mrf.mxu0 }
 0x46c   :  { %v5266_v20 = vpack.i.bf16 %v889_v19, %v868_v10  ;;  %v4452_v19 = vor.u32 %v5109_v13, %v4449_v14 }
 0x46e   :  { %5267 = vrot.lane.b32.xlu1 %v5266_v20, %s5718_s19  ;;  %v4441_v20 = vld [vmem:[#allocation10 + $0x1d0] sm:$0xf0]  ;;  %1285 = vmatpush.bf16.msra.mxu3 %v4452_v19 }
 0x472   :  { %v984_v21 = vpop.f32.mrf.mxu3 }
 0x473   :  { %v891_v22 = vpop.f32.mrf.mxu0 }
 0x474   :  { %v5101_v22 = vld [vmem:[#allocation10 + $0x1a4] sm:$0xf] }
 0x47a   :  { %v986_v23 = vpop.f32.mrf.mxu3 }
 0x47b   :  { %v1005_v24 = vpop.f32.mrf.mxu0 }
 0x47c   :  { %v5271_v25 = vpack.i.bf16 %v1005_v24, %v984_v21  ;;  %v4444_v21 = vor.u32 %v5105_v16, %v4441_v20  ;;  %v5097_v24 = vld [vmem:[#allocation10 + $0x184] sm:$0xf] }
 0x47e   :  { %5272 = vrot.lane.b32.xlu2 %v5271_v25, %s5724_s6  ;;  %1286 = vmatpush.bf16.msra.mxu3 %v4444_v21  ;;  %v4425_v25 = vld [vmem:[#allocation10 + $0x190] sm:$0xf0] }
 0x483   :  { %v1007_v17 = vpop.f32.mrf.mxu0 }
 0x484   :  { %v4428_v17 = vor.u32 %v5097_v24, %v4425_v25 }
 0x4a6   :  { %v5263_v53 = vpop.permute.xlu2 %5262 }
 0x4a7   :  { %v5265_v54 = vunpack.i.h.bf16 %v5263_v53  ;;  %v5264_v55 = vunpack.i.l.bf16 %v5263_v53  ;;  %v4392_v53 = vor.u32 %v5111_v49, %v4391_v47 }
 0x4a9   :  { %v1034_v61 = vsel %vm534_vm7, %v5944_v52, %v5265_v54  ;;  %v1033_v11 = vsel %vm534_vm7, %v5942_v48, %v5264_v55  ;;  %1185 = vmatpush.bf16.msrb.mxu2 %v4392_v53  ;;  %v4387_v54 = vld [vmem:[#allocation10 + $0x1c0] sm:$0xf]  ;;  %v5107_v55 = vld [vmem:[#allocation10 + $0x1cc] sm:$0xf0] }
 0x4d8   :  { %v5273_v56 = vpop.permute.xlu2 %5272 }
 0x4d9   :  { %v5275_v62 = vunpack.i.h.bf16 %v5273_v56  ;;  %v5274_v63 = vunpack.i.l.bf16 %v5273_v56  ;;  %v4388_v56 = vor.u32 %v5107_v55, %v4387_v54 }
 0x4db   :  { %1186 = vmatpush.bf16.msrb.mxu2 %v4388_v56 }
 0x4e0   :  { %v5268_v57 = vpop.permute.xlu1 %5267 }
 0x4e1   :  { %v5270_v58 = vunpack.i.h.bf16 %v5268_v57  ;;  %v5269_v60 = vunpack.i.l.bf16 %v5268_v57  ;;  %v4383_v57 = vld [vmem:[#allocation10 + $0x1a0] sm:$0xf] }
 0x4e3   :  { %v1037_v2 = vsel %vm1035_vm12, %v1034_v61, %v5270_v58  ;;  %v1036_v3 = vsel %vm1035_vm12, %v1033_v11, %v5269_v60  ;;  %v5103_v58 = vld [vmem:[#allocation10 + $0x1ac] sm:$0xf0]  ;;  %v4379_v61 = vld [vmem:[#allocation10 + $0x180] sm:$0xf] }
 0x4e4   :  { %v1039_v4 = vsel %vm1038_vm13, %v1036_v3, %v5274_v63  ;;  %v1040_v15 = vsel %vm1038_vm13, %v1037_v2, %v5275_v62  ;;  %v4384_v60 = vor.u32 %v5103_v58, %v4383_v57  ;;  %v5099_v11 = vld [vmem:[#allocation10 + $0x18c] sm:$0xf0]  ;;  %v4375_v63 = vld [vmem:[#allocation10 + $0x160] sm:$0xf] }
 0x4e5   :  { %v1041_v5 = vpack.c.bf16 %v1040_v15, %v1039_v4  ;;  %v4380_v62 = vor.u32 %v5099_v11, %v4379_v61  ;;  %v5095_v2 = vld [vmem:[#allocation10 + $0x16c] sm:$0xf0]  ;;  %v4371_v4 = vld [vmem:[#allocation10 + $0x140] sm:$0xf] }
 0x4e6   :  { %1187 = vmatpush.bf16.msrb.mxu2 %v4384_v60  ;;  %v4376_v3 = vor.u32 %v5095_v2, %v4375_v63  ;;  %v5091_v15 = vld [vmem:[#allocation10 + $0x14c] sm:$0xf0]  ;;  %v295_v11 = vld [vmem:[#allocation14 + $0x3] ss:$0 sm:$0xff] }
 0x4e7   :  { %1082 = vmatmul.bf16.vlgmr.msrb.gmra.mxu1 %v1041_v5  ;;  %v4372_v5 = vor.u32 %v5091_v15, %v4371_v4 }
 0x4ea   :  { %1188 = vmatpush.bf16.msrb.mxu2 %v4380_v62 }
 0x4ee   :  { %1189 = vmatpush.bf16.msrb.mxu2 %v4376_v3 }
 0x4f2   :  { %1190 = vmatpush.bf16.msrb.mxu2 %v4372_v5 }
 0x564   :  { %v1083_v7 = vpop.f32.mrf.mxu1 }
 0x565   :  { %v1088_v9 = vadd.f32 %v1083_v7, %v5814_v0  ;;  %v4433_v0 = vld [vmem:[#allocation10 + $0x1b0] sm:$0xf0]  ;;  %v5087_v7 = vld [vmem:[#allocation10 + $0x12c] sm:$0xf0] }
 0x566   :  { %v4436_v23 = vor.u32 %v5101_v22, %v4433_v0 }
 0x567   :  { %v5964_v52 = vadd.f32 %v1088_v9, %v294_v6 }
 0x568   :  { %1287 = vmatpush.bf16.msra.mxu3 %v4436_v23 }
 0x569   :  { %1092 = vadd.xlane.f32.xlu0 %v5964_v52 }
 0x56c   :  { %v1085_v48 = vpop.f32.mrf.mxu1  ;;  %1288 = vmatpush.bf16.msra.mxu3 %v4428_v17 }
 0x56d   :  { %v1089_v10 = vadd.f32 %v1085_v48, %v5817_v1  ;;  %v5093_v1 = vld [vmem:[#allocation10 + $0x164] sm:$0xf]  ;;  %v4363_v48 = vld [vmem:[#allocation10 + $0x100] sm:$0xf] }
 0x56e   :  { %v4420_v27 = vor.u32 %v5093_v1, %v4417_v26 }
 0x56f   :  { %v5968_v12 = vadd.f32 %v1089_v10, %v294_v6  ;;  %v4367_v6 = vld [vmem:[#allocation10 + $0x120] sm:$0xf]  ;;  %v5083_v10 = vld [vmem:[#allocation10 + $0x10c] sm:$0xf0] }
 0x570   :  { %1289 = vmatpush.bf16.msra.mxu3 %v4420_v27  ;;  %v4368_v9 = vor.u32 %v5087_v7, %v4367_v6  ;;  %v4364_v14 = vor.u32 %v5083_v10, %v4363_v48 }
 0x571   :  { %1094 = vadd.xlane.f32.xlu2 %v5968_v12 }
 0x572   :  { %1191 = vmatpush.bf16.msrb.mxu2 %v4368_v9 }
 0x574   :  { %1290 = vmatpush.bf16.msra.mxu3 %v4412_v33 }
 0x576   :  { %1192 = vmatpush.bf16.msrb.mxu2 %v4364_v14 }
 0x578   :  { %1291 = vmatpush.bf16.msra.mxu3 %v4404_v38 }
 0x57c   :  { %1292 = vmatpush.bf16.msra.mxu3 %v4396_v45 }
 0x57f   :  { %1293 = vmatmul.bf16.vlgmr.msra.gmra.mxu3 %v5983_v30 }
 0x5dc   :  { %v1093_v31 = vpop.xlane.xlu0 %1092 }
 0x5dd   :  { %v1096_v32 = vmul.f32 %v1093_v31, %v5820_v8 }
 0x5df   :  { %v5973_v34 = vsub.f32 %v5964_v52, %v1096_v32 }
 0x5e1   :  { %v1100_v37 = vmul.f32 %v5973_v34, %v5973_v34 }
 0x5e3   :  { %1102 = vadd.xlane.f32.xlu0 %v1100_v37 }
 0x5e4   :  { %v1095_v39 = vpop.xlane.xlu2 %1094 }
 0x5e5   :  { %v1097_v41 = vmul.f32 %v1095_v39, %v5820_v8 }
 0x5e7   :  { %v5979_v42 = vsub.f32 %v5968_v12, %v1097_v41  ;;  %v288_v41 = vld [vmem:[#allocation14 + $0x18] ss:$0 sm:$0xff] }
 0x5e9   :  { %v1101_v43 = vmul.f32 %v5979_v42, %v5979_v42 }
 0x5eb   :  { %1104 = vadd.xlane.f32.xlu0 %v1101_v43 }
 0x602   :  { %v1294_v47 = vpop.f32.mrf.mxu3 }
 0x656   :  { %v1103_v13 = vpop.xlane.xlu0 %1102 }
 0x657   :  { %v1106_v16 = vmul.f32 %v1103_v13, %v5820_v8 }
 0x659   :  { %v1108_v19 = vadd.f32 1e-06, %v1106_v16 }
 0x65b   :  { %5359 = vrsqrt.f32 %v1108_v19  ;;  %vm1116_vm15 = vweird.f32 %v1108_v19 }
 0x65e   :  { %v1105_v20 = vpop.xlane.xlu0 %1104 }
 0x65f   :  { %v1107_v21 = vmul.f32 %v1105_v20, %v5820_v8  ;;  %v4455_v20 = vld [vmem:[#allocation10 + $0x1e8] sm:$0xf] }
 0x661   :  { %v5360_v22 = vpop.eup %5359  ;;  %v1109_v0 = vadd.f32 1e-06, %v1107_v21  ;;  %v5112_v21 = vld [vmem:[#allocation10 + $0x1f4] sm:$0xf0] }
 0x662   :  { %v1111_v23 = vmul.f32 %v5360_v22, %v1108_v19  ;;  %vm1117_vm14 = vweird.f32 %v5360_v22 }
 0x663   :  { %5361 = vrsqrt.f32 %v1109_v0  ;;  %vm1118_vm0 = vmor %vm1116_vm15, %vm1117_vm14  ;;  %vm1126_vm2 = vweird.f32 %v1109_v0 }
 0x664   :  { %v1112_v24 = vmul.f32 %v5360_v22, %v1111_v23  ;;  %v5108_v23 = vld [vmem:[#allocation10 + $0x1d4] sm:$0xf0] }
 0x666   :  { %v1113_v25 = vmul.f32 0.5, %v1112_v24 }
 0x668   :  { %v1114_v17 = vsub.f32 1.5, %v1113_v25  ;;  %v4439_v25 = vld [vmem:[#allocation10 + $0x1a8] sm:$0xf] }
 0x669   :  { %v5362_v1 = vpop.eup %5361 }
 0x66a   :  { %v1115_v26 = vmul.f32 %v5360_v22, %v1114_v17  ;;  %v1121_v27 = vmul.f32 %v5362_v1, %v1109_v0  ;;  %vm1127_vm1 = vweird.f32 %v5362_v1  ;;  %v4447_v0 = vld [vmem:[#allocation10 + $0x1c8] sm:$0xf]  ;;  %v5104_v17 = vld [vmem:[#allocation10 + $0x1b4] sm:$0xf0] }
 0x66b   :  { %vm1128_vm3 = vmor %vm1126_vm2, %vm1127_vm1  ;;  %v4448_v24 = vor.u32 %v5108_v23, %v4447_v0 }
 0x66c   :  { %v1122_v28 = vmul.f32 %v5362_v1, %v1121_v27  ;;  %v1119_v29 = vsel %vm1118_vm0, %v5360_v22, %v1115_v26  ;;  %v4456_v22 = vor.u32 %v5112_v21, %v4455_v20  ;;  %v4431_v26 = vld [vmem:[#allocation10 + $0x188] sm:$0xf]  ;;  %v5100_v27 = vld [vmem:[#allocation10 + $0x194] sm:$0xf0] }
 0x66d   :  { %v1130_v33 = vmul.f32 %v1119_v29, %v5973_v34  ;;  %v1295_v34 = vadd.f32 %v1294_v47, %v1201_v46  ;;  %v4423_v29 = vld [vmem:[#allocation10 + $0x168] sm:$0xf] }
 0x66e   :  { %v1123_v31 = vmul.f32 0.5, %v1122_v28  ;;  %1299 = vmatpush.bf16.msrb.mxu0 %v4456_v22  ;;  %v4432_v28 = vor.u32 %v5100_v27, %v4431_v26 }
 0x66f   :  { %v1132_v39 = vmul.f32 %v1130_v33, %v287_v36  ;;  %v1315_v49 = vpack.c.bf16 %v1295_v34, %v1295_v34  ;;  %v4415_v33 = vld [vmem:[#allocation10 + $0x148] sm:$0xf] }
 0x670   :  { %v1124_v32 = vsub.f32 1.5, %v1123_v31  ;;  %v5096_v31 = vld [vmem:[#allocation10 + $0x174] sm:$0xf0] }
 0x671   :  { %v1134_v44 = vadd.f32 %v1132_v39, %v288_v41  ;;  %v1321_v53 = vsel %vm534_vm7, %v1315_v49, 0  ;;  %v1429_v54 = vunpack.c.l.b16 %v1315_v49 }
 0x672   :  { %v1125_v35 = vmul.f32 %v5362_v1, %v1124_v32  ;;  %1330 = vmatpush.bf16.xpose.msra.mxu1 %v1321_v53  ;;  %1300 = vmatpush.bf16.msrb.mxu0 %v4448_v24  ;;  %v4424_v32 = vor.u32 %v5096_v31, %v4423_v29 }
 0x673   :  { %v1430_v55 = vpack.c.b16 %v1429_v54, %v1429_v54 }
 0x674   :  { %v1129_v37 = vsel %vm1128_vm3, %v5362_v1, %v1125_v35  ;;  %v4440_v1 = vor.u32 %v5104_v17, %v4439_v25  ;;  %v5092_v35 = vld [vmem:[#allocation10 + $0x154] sm:$0xf0] }
 0x675   :  { %v1131_v38 = vmul.f32 %v1129_v37, %v5979_v42  ;;  %v1296_v42 = vpop.f32.mrf.mxu3  ;;  %1431 = vrot.lane.b32.xlu1 %v1430_v55, %s5724_s6  ;;  %v4407_v37 = vld [vmem:[#allocation10 + $0x128] sm:$0xf] }
 0x676   :  { %v1297_v56 = vadd.f32 %v1296_v42, %v1201_v46  ;;  %1301 = vmatpush.bf16.msrb.mxu0 %v4440_v1  ;;  %v167_v42 = vld [vmem:[#allocation8 + $0x8] sm:$0xff] }
 0x677   :  { %v1133_v43 = vmul.f32 %v1131_v38, %v287_v36  ;;  %v4416_v36 = vor.u32 %v5092_v35, %v4415_v33  ;;  %v5088_v38 = vld [vmem:[#allocation10 + $0x134] sm:$0xf0]  ;;  %vm169_vm5 = vcmp.eq.f32.partialorder %v167_v42, 0.0 }
 0x678   :  { %v1316_v57 = vpack.c.bf16 %v1297_v56, %v1297_v56  ;;  %v4408_v39 = vor.u32 %v5088_v38, %v4407_v37 }
 0x679   :  { %v1135_v18 = vadd.f32 %v1133_v43, %v288_v41  ;;  %v4399_v41 = vld [vmem:[#allocation10 + $0x108] sm:$0xf]  ;;  %v5084_v43 = vld [vmem:[#allocation10 + $0x114] sm:$0xf0] }
 0x67a   :  { %v1458_v58 = vunpack.c.l.b16 %v1316_v57  ;;  %v1340_v60 = vsel %vm534_vm7, %v1316_v57, 0  ;;  %1302 = vmatpush.bf16.msrb.mxu0 %v4432_v28 }
 0x67b   :  { %v1136_v45 = vpack.c.bf16 %v1135_v18, %v1134_v44  ;;  %1349 = vmatpush.bf16.xpose.msra.mxu2 %v1340_v60  ;;  %v4400_v44 = vor.u32 %v5084_v43, %v4399_v41 }
 0x67c   :  { %v1459_v61 = vpack.c.b16 %v1458_v58, %v1458_v58 }
 0x67d   :  { %1193 = vmatmul.bf16.vlgmr.msrb.gmra.mxu2 %v1136_v45  ;;  %v166_v45 = vld [vmem:[#allocation8] sm:$0xff] }
 0x67e   :  { %1460 = vrot.lane.b32.xlu0 %v1459_v61, %s5724_s6  ;;  %1303 = vmatpush.bf16.msrb.mxu0 %v4424_v32  ;;  %vm168_vm4 = vcmp.eq.f32.partialorder %v166_v45, 0.0 }
 0x67f   :  { %v6015_v47 = vsel %vm168_vm4, -1e+30, %v5725_v50 }
 0x682   :  { %1304 = vmatpush.bf16.msrb.mxu0 %v4416_v36 }
 0x686   :  { %1582 = vrot.lane.b32.xlu0 %v1459_v61, %s5718_s19  ;;  %1305 = vmatpush.bf16.msrb.mxu0 %v4408_v39 }
 0x68a   :  { %1306 = vmatpush.bf16.msrb.mxu0 %v4400_v44 }
 0x68d   :  { %1307 = vmatmul.bf16.vlgmr.msrb.gmra.mxu0 %v5983_v30 }
 0x68e   :  { %1675 = vrot.lane.b32.xlu0 %v1430_v55, %s5722_s5 }
 0x6e7   :  { %v1432_v10 = vpop.permute.xlu1 %1431 }
 0x6e8   :  { %v1437_v14 = vsel %vm534_vm7, %v1432_v10, 0 }
 0x6e9   :  { %1446 = vmatpush.bf16.xpose.msrb.mxu1 %v1437_v14 }
 0x6f0   :  { %v1461_v48 = vpop.permute.xlu0 %1460 }
 0x6f1   :  { %v1466_v13 = vsel %vm534_vm7, %v1461_v48, 0  ;;  %v1202_v48 = vperm.slane %v5990_v40, 1 }
 0x6f2   :  { %1475 = vmatpush.bf16.xpose.msrb.mxu2 %v1466_v13 }
 0x6f8   :  { %v1583_v16 = vpop.permute.xlu0 %1582 }
 0x6f9   :  { %v1588_v19 = vsel %vm534_vm7, %v1583_v16, 0 }
 0x700   :  { %v1194_v62 = vpop.f32.mrf.mxu2  ;;  %v1676_v56 = vpop.permute.xlu0 %1675 }
 0x701   :  { %v1195_v63 = vadd.f32 %v1194_v62, %v295_v11  ;;  %v1681_v60 = vsel %vm534_vm7, %v1676_v56, 0 }
 0x703   :  { %v1313_v2 = vpack.c.bf16 %v1195_v63, %v1195_v63 }
 0x705   :  { %v1424_v3 = vunpack.c.l.b16 %v1313_v2  ;;  %4457 = vmatmul.msk.bf16.vlgmr.msra.gmra.mxu1 %vm534_vm7, %v1313_v2 }
 0x707   :  { %v1425_v4 = vpack.c.b16 %v1424_v3, %v1424_v3 }
 0x708   :  { %v1196_v15 = vpop.f32.mrf.mxu2 }
 0x709   :  { %v1197_v5 = vadd.f32 %v1196_v15, %v295_v11  ;;  %1557 = vrot.lane.b32.xlu2 %v1425_v4, %s5718_s19  ;;  %1673 = vrot.lane.b32.xlu0 %v1425_v4, %s5722_s5  ;;  %v6023_v11 = vsel %vm169_vm5, -1e+30, %v5725_v50 }
 0x70a   :  { %1426 = vrot.lane.b32.xlu1 %v1425_v4, %s5724_s6 }
 0x70b   :  { %v1314_v6 = vpack.c.bf16 %v1197_v5, %v1197_v5 }
 0x70d   :  { %v1453_v7 = vunpack.c.l.b16 %v1314_v6  ;;  %4458 = vmatmul.msk.bf16.vlgmr.msra.gmra.mxu2 %vm534_vm7, %v1314_v6 }
 0x70e   :  { %1597 = vmatpush.bf16.xpose.msra.mxu2 %v1588_v19 }
 0x70f   :  { %v1454_v9 = vpack.c.b16 %v1453_v7, %v1453_v7 }
 0x712   :  { %1455 = vrot.lane.b32.xlu1 %v1454_v9, %s5724_s6 }
 0x71a   :  { %1559 = vrot.lane.b32.xlu1 %v1430_v55, %s5718_s19 }
 0x722   :  { %1580 = vrot.lane.b32.xlu1 %v1454_v9, %s5718_s19 }
 0x72a   :  { %1698 = vrot.lane.b32.xlu1 %v1459_v61, %s5722_s5 }
 0x732   :  { %1696 = vrot.lane.b32.xlu1 %v1454_v9, %s5722_s5  ;;  %v1308_v9 = vpop.f32.mrf.mxu0 }
 0x733   :  { %v1309_v14 = vadd.f32 %v1308_v9, %v1202_v48 }
 0x735   :  { %v1383_v22 = vpack.c.bf16 %v1309_v14, %v1309_v14 }
 0x737   :  { %v1389_v25 = vsel %vm607_vm8, %v1383_v22, 0  ;;  %v1510_v43 = vunpack.c.l.b16 %v1383_v22 }
 0x738   :  { %1398 = vmatpush.bf16.msrb.mxu3 %v1389_v25 }
 0x73a   :  { %v1310_v10 = vpop.f32.mrf.mxu0 }
 0x73b   :  { %v1311_v16 = vadd.f32 %v1310_v10, %v1202_v48 }
 0x73d   :  { %v1384_v0 = vpack.c.bf16 %v1311_v16, %v1311_v16 }
 0x73f   :  { %v1408_v1 = vsel %vm607_vm8, %v1384_v0, 0 }
 0x740   :  { %1417 = vmatpush.bf16.msra.mxu0 %v1408_v1 }
 0x763   :  { %v1558_v2 = vpop.permute.xlu2 %1557 }
 0x77b   :  { %v1674_v50 = vpop.permute.xlu0 %1673 }
 0x77c   :  { %v1427_v18 = vpop.permute.xlu1 %1426 }
 0x77d   :  { %4461 = vmatmul.msk.bf16.vlgmr.msrb.gmra.mxu1 %vm534_vm7, %v1427_v18 }
 0x782   :  { %v1332_v46 = vpop.f32.mrf.mxu1 }
 0x783   :  { %v1355_v34 = vmul.f32 0.088388346, %v1332_v46  ;;  %v6047_v46 = vpack.c.b16 %v1510_v43, %v1510_v43 }
 0x784   :  { %v1456_v49 = vpop.permute.xlu1 %1455 }
 0x785   :  { %4462 = vmatmul.msk.bf16.vlgmr.msrb.gmra.mxu2 %vm534_vm7, %v1456_v49  ;;  %v1357_v53 = vadd.f32 %v1355_v34, %v6015_v47 }
 0x787   :  { %v1359_v54 = vsel %vm577_vm10, %v1357_v53, -inf }
 0x788   :  { %1360 = vmax.xlane.f32.xlu0 %v1359_v54 }
 0x78a   :  { %v1334_v55 = vpop.f32.mrf.mxu1 }
 0x78c   :  { %v1560_v57 = vpop.permute.xlu1 %1559 }
 0x78d   :  { %v1565_v58 = vsel %vm534_vm7, %v1560_v57, 0 }
 0x78e   :  { %1574 = vmatpush.bf16.xpose.msra.mxu1 %v1565_v58 }
 0x790   :  { %v1351_v61 = vpop.f32.mrf.mxu2 }
 0x791   :  { %v1356_v62 = vmul.f32 0.088388346, %v1351_v61 }
 0x793   :  { %v6026_v63 = vadd.f32 %v1356_v62, %v6023_v11  ;;  %v1534_v62 = vunpack.c.l.b16 %v1384_v0 }
 0x794   :  { %v1581_v3 = vpop.permute.xlu1 %1580 }
 0x795   :  { %4465 = vmatmul.msk.bf16.vlgmr.msra.gmra.mxu1 %vm534_vm7, %v1558_v2  ;;  %4466 = vmatmul.msk.bf16.vlgmr.msra.gmra.mxu2 %vm534_vm7, %v1581_v3  ;;  %v1362_v4 = vsel %vm577_vm10, %v6026_v63, -inf  ;;  %v1535_v2 = vpack.c.b16 %v1534_v62, %v1534_v62 }
 0x796   :  { %1690 = vmatpush.bf16.xpose.msrb.mxu1 %v1681_v60  ;;  %1363 = vmax.xlane.f32.xlu2 %v1362_v4 }
 0x798   :  { %v1353_v15 = vpop.f32.mrf.mxu2 }
 0x79c   :  { %v1699_v5 = vpop.permute.xlu1 %1698 }
 0x79d   :  { %v1704_v6 = vsel %vm534_vm7, %v1699_v5, 0 }
 0x79e   :  { %1713 = vmatpush.bf16.xpose.msrb.mxu2 %v1704_v6 }
 0x7a4   :  { %v1697_v7 = vpop.permute.xlu1 %1696 }
 0x7a5   :  { %4469 = vmatmul.msk.bf16.vlgmr.msrb.gmra.mxu1 %vm534_vm7, %v1674_v50  ;;  %4470 = vmatmul.msk.bf16.vlgmr.msrb.gmra.mxu2 %vm534_vm7, %v1697_v7 }
 0x7fa   :  { %v1448_v13 = vpop.f32.mrf.mxu1 }
 0x7fb   :  { %v1481_v19 = vmul.f32 0.088388346, %v1448_v13  ;;  %v1361_v20 = vpop.xlane.xlu0 %1360 }
 0x7fc   :  { %v1365_v21 = vsub.f32 %v1357_v53, %v1361_v20 }
 0x7fd   :  { %v1483_v23 = vadd.f32 %v1481_v19, %v6015_v47 }
 0x7fe   :  { %v1367_v24 = vmul.f32 1.442695, %v1365_v21 }
 0x7ff   :  { %v1485_v17 = vsel %vm577_vm10, %v1483_v23, -inf }
 0x800   :  { %5363 = vpow2.f32 %v1367_v24  ;;  %1486 = vmax.xlane.f32.xlu1 %v1485_v17 }
 0x802   :  { %v1450_v40 = vpop.f32.mrf.mxu1 }
 0x806   :  { %v5364_v26 = vpop.eup %5363 }
 0x807   :  { %v1371_v27 = vsel %vm577_vm10, %v5364_v26, 0.0 }
 0x808   :  { %v1477_v28 = vpop.f32.mrf.mxu2  ;;  %1372 = vadd.xlane.f32.xlu2 %v1371_v27 }
 0x809   :  { %v1482_v29 = vmul.f32 0.088388346, %v1477_v28  ;;  %v1364_v58 = vpop.xlane.xlu2 %1363 }
 0x80a   :  { %v1366_v60 = vsub.f32 %v6026_v63, %v1364_v58 }
 0x80b   :  { %v1484_v31 = vadd.f32 %v1482_v29, %v6023_v11 }
 0x80c   :  { %v1369_v61 = vmul.f32 1.442695, %v1366_v60 }
 0x80d   :  { %v1488_v32 = vsel %vm577_vm10, %v1484_v31, -inf }
 0x80e   :  { %1489 = vmax.xlane.f32.xlu0 %v1488_v32  ;;  %5365 = vpow2.f32 %v1369_v61 }
 0x810   :  { %v1479_v33 = vpop.f32.mrf.mxu2 }
 0x812   :  { %v1576_v35 = vpop.f32.mrf.mxu1 }
 0x813   :  { %v1603_v36 = vmul.f32 0.088388346, %v1576_v35 }
 0x814   :  { %v5366_v3 = vpop.eup %5365 }
 0x815   :  { %v1605_v37 = vadd.f32 %v1603_v36, %v6015_v47  ;;  %v1374_v15 = vsel %vm577_vm10, %v5366_v3, 0.0 }
 0x817   :  { %v1607_v38 = vsel %vm577_vm10, %v1605_v37, -inf }
 0x818   :  { %v1599_v39 = vpop.f32.mrf.mxu2  ;;  %1608 = vmax.xlane.f32.xlu2 %v1607_v38 }
 0x819   :  { %v1604_v41 = vmul.f32 0.088388346, %v1599_v39 }
 0x81a   :  { %v1578_v44 = vpop.f32.mrf.mxu1 }
 0x81b   :  { %v1606_v18 = vadd.f32 %v1604_v41, %v6023_v11 }
 0x81d   :  { %v1610_v45 = vsel %vm577_vm10, %v1606_v18, -inf }
 0x81e   :  { %1611 = vmax.xlane.f32.xlu1 %v1610_v45 }
 0x820   :  { %v1601_v34 = vpop.f32.mrf.mxu2 }
 0x822   :  { %1512 = vrot.lane.b32.xlu0 %v6047_v46, %s5724_s6  ;;  %v1692_v49 = vpop.f32.mrf.mxu1 }
 0x823   :  { %v1719_v4 = vmul.f32 0.088388346, %v1692_v49 }
 0x825   :  { %v1721_v5 = vadd.f32 %v1719_v4, %v6015_v47 }
 0x827   :  { %v1723_v6 = vsel %vm577_vm10, %v1721_v5, -inf }
 0x828   :  { %v1715_v53 = vpop.f32.mrf.mxu2 }
 0x829   :  { %v1720_v54 = vmul.f32 0.088388346, %v1715_v53 }
 0x82a   :  { %v1694_v55 = vpop.f32.mrf.mxu1 }
 0x82b   :  { %v1722_v42 = vadd.f32 %v1720_v54, %v6023_v11 }
 0x82d   :  { %v1726_v56 = vsel %vm577_vm10, %v1722_v42, -inf }
 0x82e   :  { %1727 = vmax.xlane.f32.xlu1 %v1726_v56 }
 0x830   :  { %v1717_v57 = vpop.f32.mrf.mxu2 }
 0x847   :  { %1652 = vrot.lane.b32.xlu1 %v1535_v2, %s5718_s19 }
 0x84c   :  { %1375 = vadd.xlane.f32.xlu0 %v1374_v15 }
 0x854   :  { %1724 = vmax.xlane.f32.xlu0 %v1723_v6 }
 0x868   :  { %1631 = vrot.lane.b32.xlu0 %v6047_v46, %s5718_s19 }
 0x873   :  { %v1487_v63 = vpop.xlane.xlu1 %1486 }
 0x874   :  { %v1491_v50 = vsub.f32 %v1483_v23, %v1487_v63 }
 0x876   :  { %v1493_v7 = vmul.f32 1.442695, %v1491_v50 }
 0x878   :  { %5367 = vpow2.f32 %v1493_v7 }
 0x87b   :  { %v1373_v9 = vpop.xlane.xlu2 %1372 }
 0x87c   :  { %5369 = vrcp.f32 %v1373_v9 }
 0x87e   :  { %v5368_v48 = vpop.eup %5367 }
 0x87f   :  { %v1497_v10 = vsel %vm577_vm10, %v5368_v48, 0.0 }
 0x880   :  { %1498 = vadd.xlane.f32.xlu2 %v1497_v10 }
 0x881   :  { %v1490_v13 = vpop.xlane.xlu0 %1489 }
 0x882   :  { %v5370_v14 = vpop.eup %5369  ;;  %v1492_v16 = vsub.f32 %v1484_v31, %v1490_v13 }
 0x883   :  { %v1379_v19 = vmul.f32 %v5370_v14, %v5364_v26 }
 0x884   :  { %v1495_v20 = vmul.f32 1.442695, %v1492_v16 }
 0x885   :  { %v1381_v21 = vpack.c.bf16 %v1379_v19, %v1379_v19 }
 0x886   :  { %5371 = vpow2.f32 %v1495_v20 }
 0x887   :  { %4459 = vmatmul.msk.bf16.vlgmr.msrb.gmra.mxu3 %vm577_vm10, %v1381_v21 }
 0x88b   :  { %v1609_v22 = vpop.xlane.xlu2 %1608 }
 0x88c   :  { %v5372_v0 = vpop.eup %5371  ;;  %v1613_v23 = vsub.f32 %v1605_v37, %v1609_v22 }
 0x88d   :  { %v1500_v24 = vsel %vm577_vm10, %v5372_v0, 0.0 }
 0x88e   :  { %v1615_v25 = vmul.f32 1.442695, %v1613_v23  ;;  %1501 = vadd.xlane.f32.xlu1 %v1500_v24 }
 0x890   :  { %5373 = vpow2.f32 %v1615_v25 }
 0x891   :  { %v1612_v17 = vpop.xlane.xlu1 %1611 }
 0x892   :  { %v1614_v1 = vsub.f32 %v1606_v18, %v1612_v17 }
 0x894   :  { %v1617_v40 = vmul.f32 1.442695, %v1614_v1  ;;  %v1513_v27 = vpop.permute.xlu0 %1512 }
 0x895   :  { %v1518_v28 = vsel %vm607_vm8, %v1513_v27, 0 }
 0x896   :  { %v5374_v26 = vpop.eup %5373  ;;  %5375 = vpow2.f32 %v1617_v40  ;;  %1527 = vmatpush.bf16.msra.mxu3 %v1518_v28 }
 0x897   :  { %v1619_v29 = vsel %vm577_vm10, %v5374_v26, 0.0 }
 0x898   :  { %1536 = vrot.lane.b32.xlu2 %v1535_v2, %s5724_s6  ;;  %1620 = vadd.xlane.f32.xlu1 %v1619_v29 }
 0x89c   :  { %v5376_v31 = vpop.eup %5375 }
 0x89d   :  { %v1622_v32 = vsel %vm577_vm10, %v5376_v31, 0.0 }
 0x8a0   :  { %1623 = vadd.xlane.f32.xlu1 %v1622_v32 }
 0x8a1   :  { %v1728_v33 = vpop.xlane.xlu1 %1727 }
 0x8a2   :  { %v1730_v35 = vsub.f32 %v1722_v42, %v1728_v33 }
 0x8a4   :  { %v1733_v36 = vmul.f32 1.442695, %v1730_v35 }
 0x8a6   :  { %5377 = vpow2.f32 %v1733_v36 }
 0x8ac   :  { %v5378_v37 = vpop.eup %5377 }
 0x8ad   :  { %v1738_v38 = vsel %vm577_vm10, %v5378_v37, 0.0 }
 0x8ae   :  { %1739 = vadd.xlane.f32.xlu0 %v1738_v38 }
 0x8b9   :  { %1747 = vrot.lane.b32.xlu1 %v6047_v46, %s5722_s5  ;;  %v1653_v42 = vpop.permute.xlu1 %1652 }
 0x8ba   :  { %v1658_v61 = vsel %vm607_vm8, %v1653_v42, 0  ;;  %v5102_v42 = vld [vmem:[#allocation10 + $0x1ac] sm:$0xf] }
 0x8bf   :  { %v1376_v39 = vpop.xlane.xlu0 %1375 }
 0x8c0   :  { %5379 = vrcp.f32 %v1376_v39 }
 0x8c1   :  { %1768 = vrot.lane.b32.xlu1 %v1535_v2, %s5722_s5 }
 0x8c6   :  { %v5380_v41 = vpop.eup %5379 }
 0x8c7   :  { %v1380_v43 = vmul.f32 %v5380_v41, %v5366_v3  ;;  %v1725_v44 = vpop.xlane.xlu0 %1724 }
 0x8c8   :  { %v1729_v18 = vsub.f32 %v1721_v5, %v1725_v44 }
 0x8c9   :  { %v1382_v45 = vpack.c.bf16 %v1380_v43, %v1380_v43 }
 0x8ca   :  { %v1731_v34 = vmul.f32 1.442695, %v1729_v18 }
 0x8cb   :  { %4460 = vmatmul.msk.bf16.vlgmr.msra.gmra.mxu0 %vm577_vm10, %v1382_v45 }
 0x8cc   :  { %5381 = vpow2.f32 %v1731_v34  ;;  %v5110_v34 = vld [vmem:[#allocation10 + $0x1ec] sm:$0xf] }
 0x8d2   :  { %v5382_v49 = vpop.eup %5381 }
 0x8d3   :  { %v1735_v53 = vsel %vm577_vm10, %v5382_v49, 0.0 }
 0x8d4   :  { %1736 = vadd.xlane.f32.xlu2 %v1735_v53  ;;  %v5106_v53 = vld [vmem:[#allocation10 + $0x1cc] sm:$0xf] }
 0x8da   :  { %v1632_v54 = vpop.permute.xlu0 %1631 }
 0x8db   :  { %v1637_v46 = vsel %vm607_vm8, %v1632_v54, 0 }
 0x8dc   :  { %1646 = vmatpush.bf16.msrb.mxu3 %v1637_v46  ;;  %v4497_v46 = vld [vmem:[#allocation10 + $0x1d8] sm:$0xf0] }
 0x8f3   :  { %v1499_v55 = vpop.xlane.xlu2 %1498 }
 0x8f4   :  { %5383 = vrcp.f32 %v1499_v55  ;;  %v4500_v55 = vor.u32 %v5106_v53, %v4497_v46  ;;  %v5126_v46 = vld [vmem:[#allocation11 + $0x64] sm:$0xf0] }
 0x8fa   :  { %v5384_v56 = vpop.eup %5383 }
 0x8fb   :  { %v1505_v57 = vmul.f32 %v5384_v56, %v5368_v48  ;;  %v1537_v58 = vpop.permute.xlu2 %1536  ;;  %v4493_v56 = vld [vmem:[#allocation10 + $0x1b8] sm:$0xf0] }
 0x8fc   :  { %v1542_v60 = vsel %vm607_vm8, %v1537_v58, 0  ;;  %v5098_v58 = vld [vmem:[#allocation10 + $0x18c] sm:$0xf] }
 0x8fd   :  { %v1507_v62 = vpack.c.bf16 %v1505_v57, %v1505_v57  ;;  %1551 = vmatpush.bf16.msrb.mxu0 %v1542_v60  ;;  %v4496_v57 = vor.u32 %v5102_v42, %v4493_v56  ;;  %v4489_v60 = vld [vmem:[#allocation10 + $0x198] sm:$0xf0]  ;;  %v4557_v56 = vld [vmem:[#allocation11 + $0x68] sm:$0xf0] }
 0x8ff   :  { %4463 = vmatmul.msk.bf16.vlgmr.msra.gmra.mxu3 %vm577_vm10, %v1507_v62  ;;  %v5094_v62 = vld [vmem:[#allocation10 + $0x16c] sm:$0xf] }
 0x901   :  { %1667 = vmatpush.bf16.msra.mxu0 %v1658_v61  ;;  %v1502_v2 = vpop.xlane.xlu1 %1501  ;;  %v4492_v61 = vor.u32 %v5098_v58, %v4489_v60  ;;  %v4547_v58 = vld [vmem:[#allocation11 + $0x50] sm:$0xf]  ;;  %v5124_v60 = vld [vmem:[#allocation11 + $0x54] sm:$0xf0] }
 0x902   :  { %5385 = vrcp.f32 %v1502_v2  ;;  %v4485_v2 = vld [vmem:[#allocation10 + $0x178] sm:$0xf0] }
 0x908   :  { %v5386_v3 = vpop.eup %5385 }
 0x909   :  { %v1506_v4 = vmul.f32 %v5386_v3, %v5372_v0  ;;  %v4488_v3 = vor.u32 %v5094_v62, %v4485_v2  ;;  %v4548_v62 = vor.u32 %v5124_v60, %v4547_v58  ;;  %v4549_v2 = vld [vmem:[#allocation11 + $0x58] sm:$0xf0] }
 0x90a   :  { %v6077_v15 = vpop.f32.mrf.mxu3 }
 0x90b   :  { %v1508_v5 = vpack.c.bf16 %v1506_v4, %v1506_v4  ;;  %v1621_v6 = vpop.xlane.xlu1 %1620  ;;  %v5090_v4 = vld [vmem:[#allocation10 + $0x14c] sm:$0xf] }
 0x90c   :  { %5387 = vrcp.f32 %v1621_v6 }
 0x90d   :  { %4464 = vmatmul.msk.bf16.vlgmr.msrb.gmra.mxu0 %vm577_vm10, %v1508_v5  ;;  %v4481_v5 = vld [vmem:[#allocation10 + $0x158] sm:$0xf0] }
 0x90e   :  { %v4484_v6 = vor.u32 %v5090_v4, %v4481_v5  ;;  %v4539_v4 = vld [vmem:[#allocation11 + $0x40] sm:$0xf]  ;;  %v5122_v5 = vld [vmem:[#allocation11 + $0x44] sm:$0xf0] }
 0x912   :  { %v5388_v63 = vpop.eup %5387  ;;  %v1402_v50 = vpop.f32.mrf.mxu3 }
 0x913   :  { %v1627_v7 = vmul.f32 %v5388_v63, %v5374_v26  ;;  %v1624_v9 = vpop.xlane.xlu1 %1623  ;;  %v5086_v63 = vld [vmem:[#allocation10 + $0x12c] sm:$0xf]  ;;  %v4477_v50 = vld [vmem:[#allocation10 + $0x138] sm:$0xf0] }
 0x914   :  { %5389 = vrcp.f32 %v1624_v9  ;;  %v5082_v9 = vld [vmem:[#allocation10 + $0x10c] sm:$0xf] }
 0x915   :  { %v1629_v48 = vpack.c.bf16 %v1627_v7, %v1627_v7  ;;  %v4480_v7 = vor.u32 %v5086_v63, %v4477_v50  ;;  %v4540_v63 = vor.u32 %v5122_v5, %v4539_v4  ;;  %v4541_v50 = vld [vmem:[#allocation11 + $0x48] sm:$0xf0] }
 0x917   :  { %4467 = vmatmul.msk.bf16.vlgmr.msrb.gmra.mxu3 %vm577_vm10, %v1629_v48  ;;  %v4473_v48 = vld [vmem:[#allocation10 + $0x118] sm:$0xf0] }
 0x91a   :  { %v5390_v10 = vpop.eup %5389 }
 0x91b   :  { %v1628_v13 = vmul.f32 %v5390_v10, %v5376_v31  ;;  %v4476_v10 = vor.u32 %v5082_v9, %v4473_v48  ;;  %v4531_v9 = vld [vmem:[#allocation11 + $0x30] sm:$0xf]  ;;  %v5120_v48 = vld [vmem:[#allocation11 + $0x34] sm:$0xf0] }
 0x91d   :  { %v1630_v14 = vpack.c.bf16 %v1628_v13, %v1628_v13 }
 0x91f   :  { %4468 = vmatmul.msk.bf16.vlgmr.msra.gmra.mxu0 %vm577_vm10, %v1630_v14 }
 0x921   :  { %v1740_v16 = vpop.xlane.xlu0 %1739 }
 0x922   :  { %5391 = vrcp.f32 %v1740_v16 }
 0x928   :  { %v5392_v21 = vpop.eup %5391 }
 0x929   :  { %v1744_v22 = vmul.f32 %v5392_v21, %v5378_v37 }
 0x92b   :  { %v1748_v19 = vpop.permute.xlu1 %1747  ;;  %v1746_v24 = vpack.c.bf16 %v1744_v22, %v1744_v22 }
 0x92c   :  { %v1753_v20 = vsel %vm607_vm8, %v1748_v19, 0 }
 0x92d   :  { %1762 = vmatpush.bf16.msra.mxu3 %v1753_v20 }
 0x933   :  { %v1769_v0 = vpop.permute.xlu1 %1768 }
 0x934   :  { %v1774_v23 = vsel %vm607_vm8, %v1769_v0, 0 }
 0x935   :  { %1783 = vmatpush.bf16.msrb.mxu0 %v1774_v23 }
 0x938   :  { %4472 = vmatmul.msk.bf16.vlgmr.msrb.gmra.mxu0 %vm577_vm10, %v1746_v24 }
 0x947   :  { %v1737_v25 = vpop.xlane.xlu2 %1736 }
 0x948   :  { %5393 = vrcp.f32 %v1737_v25  ;;  %v1419_v17 = vpop.f32.mrf.mxu0 }
 0x94e   :  { %v5394_v1 = vpop.eup %5393 }
 0x94f   :  { %v1743_v40 = vmul.f32 %v5394_v1, %v5382_v49  ;;  %v4501_v49 = vld [vmem:[#allocation10 + $0x1f8] sm:$0xf0] }
 0x950   :  { %v1421_v27 = vpop.f32.mrf.mxu0  ;;  %v4504_v54 = vor.u32 %v5110_v34, %v4501_v49  ;;  %v4565_v49 = vld [vmem:[#allocation11 + $0x78] sm:$0xf0] }
 0x951   :  { %v1745_v28 = vpack.c.bf16 %v1743_v40, %v1743_v40 }
 0x952   :  { %1852 = vmatpush.bf16.msra.mxu1 %v4504_v54  ;;  %v4555_v54 = vld [vmem:[#allocation11 + $0x60] sm:$0xf] }
 0x953   :  { %4471 = vmatmul.msk.bf16.vlgmr.msra.gmra.mxu3 %vm577_vm10, %v1745_v28  ;;  %v4556_v42 = vor.u32 %v5126_v46, %v4555_v54  ;;  %v5134_v54 = vld [vmem:[#allocation13 + $0x28] sm:$0xff] }
 0x954   :  { %v5142_v46 = vld [vmem:[#allocation13 + $0x68] sm:$0xff] }
 0x956   :  { %1853 = vmatpush.bf16.msra.mxu1 %v4500_v55  ;;  %v5125_v55 = vld [vmem:[#allocation11 + $0x64] sm:$0xf] }
 0x95a   :  { %1854 = vmatpush.bf16.msra.mxu1 %v4496_v57  ;;  %v4560_v57 = vor.u32 %v5125_v55, %v4557_v56  ;;  %v5133_v56 = vld [vmem:[#allocation13 + $0x20] sm:$0xff] }
 0x95e   :  { %1855 = vmatpush.bf16.msra.mxu1 %v4492_v61  ;;  %v5123_v61 = vld [vmem:[#allocation11 + $0x54] sm:$0xf] }
 0x962   :  { %1856 = vmatpush.bf16.msra.mxu1 %v4488_v3  ;;  %v4552_v3 = vor.u32 %v5123_v61, %v4549_v2 }
 0x966   :  { %1857 = vmatpush.bf16.msra.mxu1 %v4484_v6  ;;  %v5121_v6 = vld [vmem:[#allocation11 + $0x44] sm:$0xf] }
 0x96a   :  { %1858 = vmatpush.bf16.msra.mxu1 %v4480_v7  ;;  %v4544_v7 = vor.u32 %v5121_v6, %v4541_v50  ;;  %v289_v50 = vld [vmem:[#allocation14 + $0x1] ss:$0 sm:$0xff] }
 0x96e   :  { %1859 = vmatpush.bf16.msra.mxu1 %v4476_v10  ;;  %v5119_v10 = vld [vmem:[#allocation11 + $0x34] sm:$0xf] }
 0x982   :  { %v1529_v26 = vpop.f32.mrf.mxu3 }
 0x98a   :  { %v1531_v29 = vpop.f32.mrf.mxu3  ;;  %v1553_v31 = vpop.f32.mrf.mxu0 }
 0x98b   :  { %v5276_v32 = vpack.i.bf16 %v1553_v31, %v1529_v26  ;;  %v298_v29 = vld [vmem:[#allocation14 + $0x1b] ss:$0 sm:$0xff] }
 0x98d   :  { %5277 = vrot.lane.b32.xlu1 %v5276_v32, %s5722_s5 }
 0x992   :  { %v1555_v33 = vpop.f32.mrf.mxu0 }
 0x99a   :  { %v1648_v35 = vpop.f32.mrf.mxu3 }
 0x99c   :  { %v1669_v36 = vpop.f32.mrf.mxu0 }
 0x99d   :  { %v5281_v37 = vpack.i.bf16 %v1669_v36, %v1648_v35 }
 0x99f   :  { %5282 = vrot.lane.b32.xlu2 %v5281_v37, %s5718_s19 }
 0x9a2   :  { %v1650_v38 = vpop.f32.mrf.mxu3 }
 0x9a4   :  { %v1671_v39 = vpop.f32.mrf.mxu0 }
 0x9b5   :  { %v1785_v41 = vpop.f32.mrf.mxu0 }
 0x9bd   :  { %v1787_v43 = vpop.f32.mrf.mxu0 }
 0x9d6   :  { %v1764_v44 = vpop.f32.mrf.mxu3 }
 0x9d7   :  { %v5286_v18 = vpack.i.bf16 %v1785_v41, %v1764_v44  ;;  %v4563_v44 = vld [vmem:[#allocation11 + $0x70] sm:$0xf] }
 0x9d9   :  { %5287 = vrot.lane.b32.xlu0 %v5286_v18, %s5724_s6  ;;  %v5128_v18 = vld [vmem:[#allocation11 + $0x74] sm:$0xf0] }
 0x9da   :  { %v4564_v34 = vor.u32 %v5128_v18, %v4563_v44  ;;  %v5135_v18 = vld [vmem:[#allocation13 + $0x30] sm:$0xff] }
 0x9dc   :  { %2000 = vmatpush.bf16.msra.mxu2 %v4564_v34 }
 0x9de   :  { %v1766_v45 = vpop.f32.mrf.mxu3 }
 0x9df   :  { %v5127_v45 = vld [vmem:[#allocation11 + $0x74] sm:$0xf] }
 0x9e0   :  { %v4568_v53 = vor.u32 %v5127_v45, %v4565_v49  ;;  %2001 = vmatpush.bf16.msra.mxu2 %v4556_v42  ;;  %v5143_v45 = vld [vmem:[#allocation13 + $0x70] sm:$0xff] }
 0x9e2   :  { %2014 = vmatpush.bf16.msrb.mxu3 %v4568_v53 }
 0x9e4   :  { %2002 = vmatpush.bf16.msra.mxu2 %v4548_v62 }
 0x9e6   :  { %2015 = vmatpush.bf16.msrb.mxu3 %v4560_v57  ;;  %v5141_v57 = vld [vmem:[#allocation13 + $0x60] sm:$0xff] }
 0x9e8   :  { %2003 = vmatpush.bf16.msra.mxu2 %v4540_v63 }
 0x9ea   :  { %2016 = vmatpush.bf16.msrb.mxu3 %v4552_v3 }
 0x9ee   :  { %2017 = vmatpush.bf16.msrb.mxu3 %v4544_v7 }
 0x9f9   :  { %v5283_v19 = vpop.permute.xlu2 %5282 }
 0x9fa   :  { %v5285_v22 = vunpack.i.h.bf16 %v5283_v19  ;;  %v5284_v0 = vunpack.i.l.bf16 %v5283_v19  ;;  %v4523_v19 = vld [vmem:[#allocation11 + $0x20] sm:$0xf] }
 0x9ff   :  { %v5278_v13 = vpop.permute.xlu1 %5277 }
 0xa00   :  { %v5280_v14 = vunpack.i.h.bf16 %v5278_v13  ;;  %v5279_v16 = vunpack.i.l.bf16 %v5278_v13  ;;  %v4532_v13 = vor.u32 %v5120_v48, %v4531_v9 }
 0xa02   :  { %v1814_v20 = vsel %vm534_vm7, %v1419_v17, %v5280_v14  ;;  %v1813_v21 = vsel %vm534_vm7, %v6077_v15, %v5279_v16  ;;  %v4533_v14 = vld [vmem:[#allocation11 + $0x38] sm:$0xf0]  ;;  %2004 = vmatpush.bf16.msra.mxu2 %v4532_v13 }
 0xa03   :  { %v1815_v1 = vsel %vm1035_vm12, %v1813_v21, %v5284_v0  ;;  %v1816_v40 = vsel %vm1035_vm12, %v1814_v20, %v5285_v22  ;;  %v4536_v16 = vor.u32 %v5119_v10, %v4533_v14  ;;  %v5118_v20 = vld [vmem:[#allocation11 + $0x24] sm:$0xf0]  ;;  %v5117_v21 = vld [vmem:[#allocation11 + $0x24] sm:$0xf]  ;;  %v4525_v0 = vld [vmem:[#allocation11 + $0x28] sm:$0xf0] }
 0xa04   :  { %v4524_v22 = vor.u32 %v5118_v20, %v4523_v19  ;;  %v290_v10 = vld [vmem:[#allocation14 + $0x9] ss:$0 sm:$0xff]  ;;  %v5132_v20 = vld [vmem:[#allocation13 + $0x18] sm:$0xff] }
 0xa05   :  { %2018 = vmatpush.bf16.msrb.mxu3 %v4536_v16 }
 0xa06   :  { %2005 = vmatpush.bf16.msra.mxu2 %v4524_v22  ;;  %v5139_v22 = vld [vmem:[#allocation13 + $0x50] sm:$0xff] }
 0xa4b   :  { %v5288_v23 = vpop.permute.xlu0 %5287 }
 0xa4c   :  { %v5290_v24 = vunpack.i.h.bf16 %v5288_v23  ;;  %v5289_v25 = vunpack.i.l.bf16 %v5288_v23  ;;  %v4528_v23 = vor.u32 %v5117_v21, %v4525_v0  ;;  %v5140_v21 = vld [vmem:[#allocation13 + $0x58] sm:$0xff]  ;;  %v5130_v0 = vld [vmem:[#allocation13 + $0x8] sm:$0xff] }
 0xa4e   :  { %v1818_v27 = vsel %vm1038_vm13, %v1816_v40, %v5290_v24  ;;  %v1817_v28 = vsel %vm1038_vm13, %v1815_v1, %v5289_v25  ;;  %2019 = vmatpush.bf16.msrb.mxu3 %v4528_v23  ;;  %v4515_v24 = vld [vmem:[#allocation11 + $0x10] sm:$0xf]  ;;  %v5116_v25 = vld [vmem:[#allocation11 + $0x14] sm:$0xf0]  ;;  %v5115_v1 = vld [vmem:[#allocation11 + $0x14] sm:$0xf] }
 0xa4f   :  { %v1819_v26 = vpack.c.bf16 %v1818_v27, %v1817_v28  ;;  %v4516_v40 = vor.u32 %v5116_v25, %v4515_v24  ;;  %v4517_v27 = vld [vmem:[#allocation11 + $0x18] sm:$0xf0]  ;;  %v5138_v23 = vld [vmem:[#allocation13 + $0x48] sm:$0xff]  ;;  %v5137_v24 = vld [vmem:[#allocation13 + $0x40] sm:$0xff] }
 0xa50   :  { %v4520_v28 = vor.u32 %v5115_v1, %v4517_v27  ;;  %v300_v25 = vld [vmem:[#allocation14 + $0x4] ss:$8 sm:$0x3] }
 0xa51   :  { %1860 = vmatmul.bf16.vlgmr.msra.gmra.mxu1 %v1819_v26  ;;  %v4507_v26 = vld [vmem:[#allocation11] sm:$0xf]  ;;  %2006 = vmatpush.bf16.msra.mxu2 %v4516_v40  ;;  %v1916_v27 = vperm.slane %v300_v25, 0 }
 0xa52   :  { %2020 = vmatpush.bf16.msrb.mxu3 %v4520_v28  ;;  %v1917_v28 = vperm.slane %v300_v25, 1  ;;  %v4697_v25 = vld [vmem:[#allocation10 + $0x2b0] sm:$0xf0] }
 0xace   :  { %v1861_v17 = vpop.f32.mrf.mxu1 }
 0xacf   :  { %v1866_v31 = vadd.f32 %v1861_v17, %v5964_v52  ;;  %v5113_v17 = vld [vmem:[#allocation11 + $0x4] sm:$0xf] }
 0xad1   :  { %v6097_v15 = vadd.f32 %v1866_v31, %v298_v29 }
 0xad3   :  { %1870 = vadd.xlane.f32.xlu1 %v6097_v15 }
 0xad6   :  { %v1863_v32 = vpop.f32.mrf.mxu1 }
 0xad7   :  { %v1867_v33 = vadd.f32 %v1863_v32, %v5968_v12 }
 0xad9   :  { %v6101_v35 = vadd.f32 %v1867_v33, %v298_v29  ;;  %v5114_v29 = vld [vmem:[#allocation11 + $0x4] sm:$0xf0]  ;;  %v4509_v33 = vld [vmem:[#allocation11 + $0x8] sm:$0xf0] }
 0xada   :  { %v4508_v32 = vor.u32 %v5114_v29, %v4507_v26 }
 0xadb   :  { %1872 = vadd.xlane.f32.xlu0 %v6101_v35 }
 0xadc   :  { %2007 = vmatpush.bf16.msra.mxu2 %v4508_v32 }
 0xb46   :  { %v1871_v36 = vpop.xlane.xlu1 %1870 }
 0xb47   :  { %v1874_v37 = vmul.f32 %v1871_v36, %v5820_v8 }
 0xb49   :  { %v6106_v38 = vsub.f32 %v6097_v15, %v1874_v37  ;;  %v4512_v37 = vor.u32 %v5113_v17, %v4509_v33 }
 0xb4b   :  { %v1878_v52 = vmul.f32 %v6106_v38, %v6106_v38  ;;  %2021 = vmatpush.bf16.msrb.mxu3 %v4512_v37 }
 0xb4d   :  { %1880 = vadd.xlane.f32.xlu2 %v1878_v52 }
 0xb4e   :  { %v1873_v39 = vpop.xlane.xlu0 %1872 }
 0xb4f   :  { %v1875_v41 = vmul.f32 %v1873_v39, %v5820_v8  ;;  %v5136_v39 = vld [vmem:[#allocation13 + $0x38] sm:$0xff] }
 0xb50   :  { %2130 = vmatpush.bf16.msra.mxu0 %v5136_v39 }
 0xb51   :  { %v6112_v43 = vsub.f32 %v6101_v35, %v1875_v41  ;;  %v5144_v41 = vld [vmem:[#allocation13 + $0x78] sm:$0xff] }
 0xb52   :  { %2144 = vmatpush.bf16.msrb.mxu1 %v5144_v41 }
 0xb53   :  { %v1879_v12 = vmul.f32 %v6112_v43, %v6112_v43 }
 0xb54   :  { %2131 = vmatpush.bf16.msra.mxu0 %v5135_v18 }
 0xb55   :  { %1882 = vadd.xlane.f32.xlu1 %v1879_v12 }
 0xb56   :  { %2145 = vmatpush.bf16.msrb.mxu1 %v5143_v45 }
 0xb58   :  { %2132 = vmatpush.bf16.msra.mxu0 %v5134_v54 }
 0xb5a   :  { %2146 = vmatpush.bf16.msrb.mxu1 %v5142_v46 }
 0xb5c   :  { %2133 = vmatpush.bf16.msra.mxu0 %v5133_v56 }
 0xb5e   :  { %2147 = vmatpush.bf16.msrb.mxu1 %v5141_v57 }
 0xb60   :  { %2134 = vmatpush.bf16.msra.mxu0 %v5132_v20  ;;  %v4715_v20 = vld [vmem:[#allocation10 + $0x2c8] sm:$0xf] }
 0xb62   :  { %2148 = vmatpush.bf16.msrb.mxu1 %v5140_v21  ;;  %v5172_v21 = vld [vmem:[#allocation10 + $0x2d4] sm:$0xf0] }
 0xb66   :  { %2149 = vmatpush.bf16.msrb.mxu1 %v5139_v22  ;;  %v4716_v22 = vor.u32 %v5172_v21, %v4715_v20  ;;  %v4637_v20 = vld [vmem:[#allocation10 + $0x210] sm:$0xf0]  ;;  %v4643_v21 = vld [vmem:[#allocation10 + $0x208] sm:$0xf] }
 0xb6a   :  { %2150 = vmatpush.bf16.msrb.mxu1 %v5138_v23  ;;  %v5167_v23 = vld [vmem:[#allocation10 + $0x2ac] sm:$0xf0] }
 0xb6e   :  { %2151 = vmatpush.bf16.msrb.mxu1 %v5137_v24 }
 0xbc0   :  { %v1881_v31 = vpop.xlane.xlu2 %1880 }
 0xbc1   :  { %v1884_v36 = vmul.f32 %v1881_v31, %v5820_v8 }
 0xbc3   :  { %v1886_v52 = vadd.f32 1e-06, %v1884_v36 }
 0xbc5   :  { %5395 = vrsqrt.f32 %v1886_v52  ;;  %vm1894_vm9 = vweird.f32 %v1886_v52 }
 0xbc8   :  { %v1883_v12 = vpop.xlane.xlu1 %1882 }
 0xbc9   :  { %v1885_v44 = vmul.f32 %v1883_v12, %v5820_v8 }
 0xbcb   :  { %v5396_v34 = vpop.eup %5395  ;;  %v1887_v49 = vadd.f32 1e-06, %v1885_v44 }
 0xbcc   :  { %v1889_v53 = vmul.f32 %v5396_v34, %v1886_v52  ;;  %vm1895_vm6 = vweird.f32 %v5396_v34 }
 0xbcd   :  { %5397 = vrsqrt.f32 %v1887_v49  ;;  %vm1896_vm11 = vmor %vm1894_vm9, %vm1895_vm6  ;;  %vm1904_vm15 = vweird.f32 %v1887_v49 }
 0xbce   :  { %v1890_v55 = vmul.f32 %v5396_v34, %v1889_v53 }
 0xbd0   :  { %v1891_v42 = vmul.f32 0.5, %v1890_v55 }
 0xbd2   :  { %v1892_v58 = vsub.f32 1.5, %v1891_v42 }
 0xbd3   :  { %v5398_v60 = vpop.eup %5397 }
 0xbd4   :  { %v1893_v61 = vmul.f32 %v5396_v34, %v1892_v58  ;;  %v1899_v62 = vmul.f32 %v5398_v60, %v1887_v49  ;;  %vm1905_vm14 = vweird.f32 %v5398_v60 }
 0xbd5   :  { %vm1906_vm0 = vmor %vm1904_vm15, %vm1905_vm14 }
 0xbd6   :  { %v1900_v2 = vmul.f32 %v5398_v60, %v1899_v62  ;;  %v1897_v3 = vsel %vm1896_vm11, %v5396_v34, %v1893_v61  ;;  %v291_v34 = vld [vmem:[#allocation14 + $0x11] ss:$0 sm:$0xff] }
 0xbd7   :  { %v1908_v6 = vmul.f32 %v1897_v3, %v6106_v38  ;;  %v5131_v38 = vld [vmem:[#allocation13 + $0x10] sm:$0xff]  ;;  %v4719_v3 = vld [vmem:[#allocation10 + $0x2e0] sm:$0xf] }
 0xbd8   :  { %v1901_v4 = vmul.f32 0.5, %v1900_v2  ;;  %2135 = vmatpush.bf16.msra.mxu0 %v5131_v38 }
 0xbd9   :  { %v1910_v48 = vmul.f32 %v1908_v6, %v289_v50 }
 0xbda   :  { %v1902_v5 = vsub.f32 1.5, %v1901_v4  ;;  %v5175_v4 = vld [vmem:[#allocation10 + $0x2ec] sm:$0xf0] }
 0xbdb   :  { %v1912_v14 = vadd.f32 %v1910_v48, %v290_v10  ;;  %v4720_v6 = vor.u32 %v5175_v4, %v4719_v3  ;;  %v4647_v3 = vld [vmem:[#allocation10 + $0x220] sm:$0xf]  ;;  %v5151_v4 = vld [vmem:[#allocation10 + $0x22c] sm:$0xf0] }
 0xbdc   :  { %v1903_v63 = vmul.f32 %v5398_v60, %v1902_v5  ;;  %2136 = vmatpush.bf16.msra.mxu0 %v5130_v0  ;;  %v5173_v5 = vld [vmem:[#allocation10 + $0x2e4] sm:$0xf]  ;;  %v4695_v0 = vld [vmem:[#allocation10 + $0x2a0] sm:$0xf] }
 0xbdd   :  { %2475 = vmatpush.bf16.msrb.mxu2 %v4720_v6  ;;  %v4696_v24 = vor.u32 %v5167_v23, %v4695_v0  ;;  %v4648_v6 = vor.u32 %v5151_v4, %v4647_v3 }
 0xbde   :  { %v1907_v7 = vsel %vm1906_vm0, %v5398_v60, %v1903_v63  ;;  %v4721_v63 = vld [vmem:[#allocation10 + $0x2f0] sm:$0xf0] }
 0xbdf   :  { %v1909_v9 = vmul.f32 %v1907_v7, %v6112_v43  ;;  %v5129_v43 = vld [vmem:[#allocation13] sm:$0xff]  ;;  %v5176_v7 = vld [vmem:[#allocation10 + $0x2f4] sm:$0xf0] }
 0xbe0   :  { %2137 = vmatpush.bf16.msra.mxu0 %v5129_v43  ;;  %v5165_v43 = vld [vmem:[#allocation10 + $0x2a4] sm:$0xf] }
 0xbe1   :  { %v1911_v13 = vmul.f32 %v1909_v9, %v289_v50  ;;  %v4727_v50 = vld [vmem:[#allocation10 + $0x2e8] sm:$0xf]  ;;  %v4724_v9 = vor.u32 %v5173_v5, %v4721_v63  ;;  %v5149_v5 = vld [vmem:[#allocation10 + $0x224] sm:$0xf]  ;;  %v4649_v63 = vld [vmem:[#allocation10 + $0x230] sm:$0xf0] }
 0xbe2   :  { %v4728_v48 = vor.u32 %v5176_v7, %v4727_v50  ;;  %v4655_v50 = vld [vmem:[#allocation10 + $0x228] sm:$0xf]  ;;  %v5152_v7 = vld [vmem:[#allocation10 + $0x234] sm:$0xf0] }
 0xbe3   :  { %v1913_v16 = vadd.f32 %v1911_v13, %v290_v10  ;;  %2489 = vmatpush.bf16.msra.mxu3 %v4724_v9  ;;  %v4707_v10 = vld [vmem:[#allocation10 + $0x2c0] sm:$0xf]  ;;  %v5171_v13 = vld [vmem:[#allocation10 + $0x2cc] sm:$0xf0]  ;;  %v4652_v9 = vor.u32 %v5149_v5, %v4649_v63 }
 0xbe4   :  { %2503 = vmatpush.bf16.msrb.mxu0 %v4728_v48  ;;  %v4656_v48 = vor.u32 %v5152_v7, %v4655_v50 }
 0xbe5   :  { %v1914_v19 = vpack.c.bf16 %v1913_v16, %v1912_v14  ;;  %v5169_v14 = vld [vmem:[#allocation10 + $0x2c4] sm:$0xf]  ;;  %v4708_v16 = vor.u32 %v5171_v13, %v4707_v10  ;;  %v4635_v10 = vld [vmem:[#allocation10 + $0x200] sm:$0xf]  ;;  %v5147_v13 = vld [vmem:[#allocation10 + $0x20c] sm:$0xf0] }
 0xbe7   :  { %2008 = vmatmul.bf16.vlgmr.msra.gmra.mxu2 %v1914_v19  ;;  %2022 = vmatmul.bf16.vlgmr.msrb.gmra.mxu3 %v1914_v19  ;;  %v4709_v19 = vld [vmem:[#allocation10 + $0x2d0] sm:$0xf0] }
 0xbe8   :  { %v4712_v38 = vor.u32 %v5169_v14, %v4709_v19  ;;  %2476 = vmatpush.bf16.msrb.mxu2 %v4708_v16  ;;  %2504 = vmatpush.bf16.msrb.mxu0 %v4716_v22  ;;  %v5145_v14 = vld [vmem:[#allocation10 + $0x204] sm:$0xf]  ;;  %v4636_v19 = vor.u32 %v5147_v13, %v4635_v10 }
 0xbe9   :  { %v4640_v0 = vor.u32 %v5145_v14, %v4637_v20 }
 0xbea   :  { %2490 = vmatpush.bf16.msra.mxu3 %v4712_v38  ;;  %v5148_v38 = vld [vmem:[#allocation10 + $0x214] sm:$0xf0] }
 0xbeb   :  { %v4644_v23 = vor.u32 %v5148_v38, %v4643_v21 }
 0xbec   :  { %2477 = vmatpush.bf16.msrb.mxu2 %v4696_v24 }
 0xc6a   :  { %v2009_v1 = vpop.f32.mrf.mxu2  ;;  %v2023_v40 = vpop.f32.mrf.mxu3 }
 0xc6b   :  { %v2010_v26 = vadd.f32 %v2009_v1, %v1916_v27  ;;  %v2024_v29 = vadd.f32 %v2023_v40, %v1917_v28  ;;  %v4703_v1 = vld [vmem:[#allocation10 + $0x2a8] sm:$0xf]  ;;  %v5168_v40 = vld [vmem:[#allocation10 + $0x2b4] sm:$0xf0] }
 0xc6d   :  { %v2028_v36 = vmax.f32 %v2010_v26, 0.0  ;;  %v2029_v37 = vmax.f32 %v2024_v29, 0.0  ;;  %v4683_v26 = vld [vmem:[#allocation10 + $0x280] sm:$0xf]  ;;  %v5163_v29 = vld [vmem:[#allocation10 + $0x28c] sm:$0xf0] }
 0xc72   :  { %v2011_v17 = vpop.f32.mrf.mxu2  ;;  %v2025_v31 = vpop.f32.mrf.mxu3 }
 0xc73   :  { %v2012_v32 = vadd.f32 %v2011_v17, %v1916_v27  ;;  %v2026_v33 = vadd.f32 %v2025_v31, %v1917_v28  ;;  %v4700_v27 = vor.u32 %v5165_v43, %v4697_v25  ;;  %v4704_v28 = vor.u32 %v5168_v40, %v4703_v1  ;;  %v5161_v17 = vld [vmem:[#allocation10 + $0x284] sm:$0xf] }
 0xc74   :  { %v4684_v31 = vor.u32 %v5163_v29, %v4683_v26 }
 0xc75   :  { %v2030_v52 = vmax.f32 %v2012_v32, 0.0  ;;  %v2031_v39 = vmax.f32 %v2026_v33, 0.0  ;;  %2491 = vmatpush.bf16.msra.mxu3 %v4700_v27  ;;  %2505 = vmatpush.bf16.msrb.mxu0 %v4704_v28  ;;  %v4685_v32 = vld [vmem:[#allocation10 + $0x290] sm:$0xf0]  ;;  %v4691_v33 = vld [vmem:[#allocation10 + $0x288] sm:$0xf] }
 0xc76   :  { %2478 = vmatpush.bf16.msrb.mxu2 %v4684_v31 }
 0xc77   :  { %v2032_v41 = vpack.c.bf16 %v2030_v52, %v2028_v36  ;;  %v2033_v12 = vpack.c.bf16 %v2031_v39, %v2029_v37  ;;  %v5164_v36 = vld [vmem:[#allocation10 + $0x294] sm:$0xf0]  ;;  %v4688_v37 = vor.u32 %v5161_v17, %v4685_v32  ;;  %v4671_v39 = vld [vmem:[#allocation10 + $0x260] sm:$0xf] }
 0xc78   :  { %v4692_v52 = vor.u32 %v5164_v36, %v4691_v33 }
 0xc79   :  { %2138 = vmatmul.bf16.vlgmr.msra.gmra.mxu0 %v2032_v41  ;;  %2152 = vmatmul.bf16.vlgmr.msrb.gmra.mxu1 %v2033_v12  ;;  %v5159_v41 = vld [vmem:[#allocation10 + $0x26c] sm:$0xf0]  ;;  %v5157_v12 = vld [vmem:[#allocation10 + $0x264] sm:$0xf] }
 0xc7a   :  { %2492 = vmatpush.bf16.msra.mxu3 %v4688_v37  ;;  %2506 = vmatpush.bf16.msrb.mxu0 %v4692_v52 }
 0xcf6   :  { %v2139_v44 = vpop.f32.mrf.mxu0  ;;  %v2153_v18 = vpop.f32.mrf.mxu1 }
 0xcf7   :  { %v2154_v45 = vadd.f32 %v2153_v18, %v2139_v44  ;;  %v4672_v44 = vor.u32 %v5159_v41, %v4671_v39  ;;  %v4673_v18 = vld [vmem:[#allocation10 + $0x270] sm:$0xf0] }
 0xcf9   :  { %v2158_v49 = vadd.f32 %v2154_v45, %v6097_v15  ;;  %v4679_v45 = vld [vmem:[#allocation10 + $0x268] sm:$0xf]  ;;  %2479 = vmatpush.bf16.msrb.mxu2 %v4672_v44 }
 0xcfb   :  { %v6121_v53 = vadd.f32 %v2158_v49, %v291_v34  ;;  %v4676_v49 = vor.u32 %v5157_v12, %v4673_v18  ;;  %v2279_v12 = vld [vmem:[#allocation14 + $0x20] ss:$0 sm:$0xff] }
 0xcfd   :  { %2295 = vadd.xlane.f32.xlu1 %v6121_v53  ;;  %2493 = vmatpush.bf16.msra.mxu3 %v4676_v49 }
 0xcfe   :  { %v2141_v54 = vpop.f32.mrf.mxu0  ;;  %v2155_v46 = vpop.f32.mrf.mxu1 }
 0xcff   :  { %v2156_v55 = vadd.f32 %v2155_v46, %v2141_v54  ;;  %v4659_v46 = vld [vmem:[#allocation10 + $0x240] sm:$0xf] }
 0xd01   :  { %v2159_v42 = vadd.f32 %v2156_v55, %v6101_v35  ;;  %v5155_v55 = vld [vmem:[#allocation10 + $0x24c] sm:$0xf0] }
 0xd03   :  { %v6125_v56 = vadd.f32 %v2159_v42, %v291_v34  ;;  %v5160_v34 = vld [vmem:[#allocation10 + $0x274] sm:$0xf0]  ;;  %v5153_v42 = vld [vmem:[#allocation10 + $0x244] sm:$0xf] }
 0xd04   :  { %v4680_v54 = vor.u32 %v5160_v34, %v4679_v45  ;;  %v2280_v34 = vld [vmem:[#allocation14 + $0x28] ss:$0 sm:$0xff] }
 0xd05   :  { %2297 = vadd.xlane.f32.xlu1 %v6125_v56 }
 0xd06   :  { %2507 = vmatpush.bf16.msrb.mxu0 %v4680_v54 }
 0xd70   :  { %v2296_v57 = vpop.xlane.xlu1 %2295 }
 0xd71   :  { %v2299_v58 = vmul.f32 %v2296_v57, %v5820_v8  ;;  %v4660_v57 = vor.u32 %v5155_v55, %v4659_v46 }
 0xd73   :  { %v6130_v60 = vsub.f32 %v6121_v53, %v2299_v58  ;;  %v4661_v58 = vld [vmem:[#allocation10 + $0x250] sm:$0xf0]  ;;  %2480 = vmatpush.bf16.msrb.mxu2 %v4660_v57 }
 0xd75   :  { %v2303_v15 = vmul.f32 %v6130_v60, %v6130_v60 }
 0xd77   :  { %2305 = vadd.xlane.f32.xlu2 %v2303_v15  ;;  %v4667_v15 = vld [vmem:[#allocation10 + $0x248] sm:$0xf]  ;;  %2481 = vmatpush.bf16.msrb.mxu2 %v4648_v6 }
 0xd78   :  { %v2298_v61 = vpop.xlane.xlu1 %2297 }
 0xd79   :  { %v2300_v62 = vmul.f32 %v2298_v61, %v5820_v8  ;;  %v5156_v61 = vld [vmem:[#allocation10 + $0x254] sm:$0xf0] }
 0xd7b   :  { %v6136_v2 = vsub.f32 %v6125_v56, %v2300_v62  ;;  %v4664_v62 = vor.u32 %v5153_v42, %v4661_v58  ;;  %2482 = vmatpush.bf16.msrb.mxu2 %v4636_v19  ;;  %v2287_v42 = vld [vmem:[#allocation14 + $0x22] ss:$8 sm:$0x7] }
 0xd7c   :  { %v2343_v57 = vperm.slane %v2287_v42, 2 }
 0xd7d   :  { %v2304_v35 = vmul.f32 %v6136_v2, %v6136_v2  ;;  %2494 = vmatpush.bf16.msra.mxu3 %v4664_v62 }
 0xd7f   :  { %2307 = vadd.xlane.f32.xlu0 %v2304_v35  ;;  %v4668_v35 = vor.u32 %v5156_v61, %v4667_v15  ;;  %v2341_v15 = vperm.slane %v2287_v42, 0  ;;  %v2342_v61 = vperm.slane %v2287_v42, 1 }
 0xd81   :  { %2508 = vmatpush.bf16.msrb.mxu0 %v4668_v35  ;;  %2495 = vmatpush.bf16.msra.mxu3 %v4652_v9 }
 0xd85   :  { %2509 = vmatpush.bf16.msrb.mxu0 %v4656_v48  ;;  %2496 = vmatpush.bf16.msra.mxu3 %v4640_v0 }
 0xd89   :  { %2510 = vmatpush.bf16.msrb.mxu0 %v4644_v23 }
 0xdea   :  { %v2306_v16 = vpop.xlane.xlu2 %2305 }
 0xdeb   :  { %v2309_v22 = vmul.f32 %v2306_v16, %v5820_v8 }
 0xded   :  { %v2311_v43 = vadd.f32 1e-06, %v2309_v22 }
 0xdef   :  { %5399 = vrsqrt.f32 %v2311_v43  ;;  %vm2319_vm2 = vweird.f32 %v2311_v43 }
 0xdf2   :  { %v2308_v24 = vpop.xlane.xlu0 %2307 }
 0xdf3   :  { %v2310_v25 = vmul.f32 %v2308_v24, %v5820_v8 }
 0xdf5   :  { %v5400_v1 = vpop.eup %5399  ;;  %v2312_v40 = vadd.f32 1e-06, %v2310_v25 }
 0xdf6   :  { %v2314_v27 = vmul.f32 %v5400_v1, %v2311_v43  ;;  %vm2320_vm1 = vweird.f32 %v5400_v1 }
 0xdf7   :  { %5401 = vrsqrt.f32 %v2312_v40  ;;  %vm2321_vm3 = vmor %vm2319_vm2, %vm2320_vm1  ;;  %vm2329_vm5 = vweird.f32 %v2312_v40 }
 0xdf8   :  { %v2315_v28 = vmul.f32 %v5400_v1, %v2314_v27 }
 0xdfa   :  { %v2316_v26 = vmul.f32 0.5, %v2315_v28 }
 0xdfc   :  { %v2317_v29 = vsub.f32 1.5, %v2316_v26 }
 0xdfd   :  { %v5402_v17 = vpop.eup %5401 }
 0xdfe   :  { %v2318_v31 = vmul.f32 %v5400_v1, %v2317_v29  ;;  %v2324_v32 = vmul.f32 %v5402_v17, %v2312_v40  ;;  %vm2330_vm4 = vweird.f32 %v5402_v17 }
 0xdff   :  { %vm2331_vm6 = vmor %vm2329_vm5, %vm2330_vm4 }
 0xe00   :  { %v2325_v33 = vmul.f32 %v5402_v17, %v2324_v32  ;;  %v2322_v36 = vsel %vm2321_vm3, %v5400_v1, %v2318_v31 }
 0xe01   :  { %v2333_v39 = vmul.f32 %v2322_v36, %v6130_v60 }
 0xe02   :  { %v2326_v37 = vmul.f32 0.5, %v2325_v33 }
 0xe03   :  { %v2335_v45 = vmul.f32 %v2333_v39, %v2279_v12 }
 0xe04   :  { %v2327_v52 = vsub.f32 1.5, %v2326_v37 }
 0xe05   :  { %v2337_v54 = vadd.f32 %v2335_v45, %v2280_v34 }
 0xe06   :  { %v2328_v41 = vmul.f32 %v5402_v17, %v2327_v52 }
 0xe08   :  { %v2332_v44 = vsel %vm2331_vm6, %v5402_v17, %v2328_v41 }
 0xe09   :  { %v2334_v18 = vmul.f32 %v2332_v44, %v6136_v2 }
 0xe0b   :  { %v2336_v49 = vmul.f32 %v2334_v18, %v2279_v12 }
 0xe0d   :  { %v2338_v46 = vadd.f32 %v2336_v49, %v2280_v34 }
 0xe0f   :  { %v2339_v55 = vpack.c.bf16 %v2338_v46, %v2337_v54 }
 0xe11   :  { %2483 = vmatmul.bf16.vlgmr.msrb.gmra.mxu2 %v2339_v55  ;;  %2497 = vmatmul.bf16.vlgmr.msra.gmra.mxu3 %v2339_v55 }
 0xe12   :  { %2511 = vmatmul.bf16.vlgmr.msrb.gmra.mxu0 %v2339_v55 }
 0xe8f   :  { %v2512_v58 = vpop.f32.mrf.mxu0 }
 0xe90   :  { %v2513_v60 = vadd.f32 %v2512_v58, %v2343_v57 }
 0xe92   :  { %v6144_v62 = vpack.c.bf16 %v2513_v60, %v2513_v60 }
 0xe94   :  { %v2593_v2 = vsel %vm607_vm8, %v6144_v62, 0  ;;  %v2484_v35 = vpop.f32.mrf.mxu2  ;;  %v2498_v3 = vpop.f32.mrf.mxu3 }
 0xe95   :  { %v2485_v4 = vadd.f32 %v2484_v35, %v2341_v15  ;;  %v2499_v5 = vadd.f32 %v2498_v3, %v2342_v61  ;;  %2602 = vmatpush.bf16.msrb.mxu3 %v2593_v2 }
 0xe97   :  { %v2517_v6 = vpack.c.bf16 %v2485_v4, %v2485_v4  ;;  %v2519_v63 = vpack.c.bf16 %v2499_v5, %v2499_v5  ;;  %v2514_v50 = vpop.f32.mrf.mxu0 }
 0xe98   :  { %v2515_v7 = vadd.f32 %v2514_v50, %v2343_v57 }
 0xe99   :  { %v2628_v9 = vunpack.c.l.b16 %v2517_v6  ;;  %v2525_v48 = vsel %vm534_vm7, %v2519_v63, 0  ;;  %v2633_v10 = vunpack.c.l.b16 %v2519_v63 }
 0xe9a   :  { %v6149_v13 = vpack.c.bf16 %v2515_v7, %v2515_v7  ;;  %2534 = vmatpush.bf16.xpose.msra.mxu1 %v2525_v48 }
 0xe9b   :  { %v2629_v14 = vpack.c.b16 %v2628_v9, %v2628_v9  ;;  %v2634_v16 = vpack.c.b16 %v2633_v10, %v2633_v10 }
 0xe9c   :  { %v2612_v19 = vsel %vm607_vm8, %v6149_v13, 0  ;;  %v2486_v20 = vpop.f32.mrf.mxu2  ;;  %v2500_v21 = vpop.f32.mrf.mxu3 }
 0xe9d   :  { %v2487_v38 = vadd.f32 %v2486_v20, %v2341_v15  ;;  %v2501_v22 = vadd.f32 %v2500_v21, %v2342_v61  ;;  %2621 = vmatpush.bf16.msra.mxu0 %v2612_v19  ;;  %2635 = vrot.lane.b32.xlu1 %v2634_v16, %s5724_s6 }
 0xe9e   :  { %2630 = vrot.lane.b32.xlu0 %v2629_v14, %s5724_s6 }
 0xe9f   :  { %v2518_v0 = vpack.c.bf16 %v2487_v38, %v2487_v38  ;;  %v2520_v23 = vpack.c.bf16 %v2501_v22, %v2501_v22 }
 0xea1   :  { %v2657_v43 = vunpack.c.l.b16 %v2518_v0  ;;  %v2544_v24 = vsel %vm534_vm7, %v2520_v23, 0  ;;  %v2662_v25 = vunpack.c.l.b16 %v2520_v23  ;;  %4729 = vmatmul.msk.bf16.vlgmr.msra.gmra.mxu1 %vm534_vm7, %v2517_v6 }
 0xea2   :  { %2553 = vmatpush.bf16.xpose.msra.mxu2 %v2544_v24 }
 0xea3   :  { %v2658_v1 = vpack.c.b16 %v2657_v43, %v2657_v43  ;;  %v2663_v40 = vpack.c.b16 %v2662_v25, %v2662_v25  ;;  %v2714_v25 = vunpack.c.l.b16 %v6144_v62 }
 0xea5   :  { %2664 = vrot.lane.b32.xlu2 %v2663_v40, %s5724_s6  ;;  %2763 = vrot.lane.b32.xlu1 %v2634_v16, %s5718_s19 }
 0xea6   :  { %2659 = vrot.lane.b32.xlu0 %v2658_v1, %s5724_s6 }
 0xea9   :  { %4730 = vmatmul.msk.bf16.vlgmr.msra.gmra.mxu2 %vm534_vm7, %v2518_v0 }
 0xead   :  { %2786 = vrot.lane.b32.xlu2 %v2663_v40, %s5718_s19  ;;  %2784 = vrot.lane.b32.xlu1 %v2658_v1, %s5718_s19 }
 0xeae   :  { %2761 = vrot.lane.b32.xlu0 %v2629_v14, %s5718_s19 }
 0xeb5   :  { %2879 = vrot.lane.b32.xlu2 %v2634_v16, %s5722_s5  ;;  %2877 = vrot.lane.b32.xlu1 %v2629_v14, %s5722_s5 }
 0xeb6   :  { %2902 = vrot.lane.b32.xlu0 %v2663_v40, %s5722_s5  ;;  %v6194_v40 = vpack.c.b16 %v2714_v25, %v2714_v25 }
 0xebd   :  { %2900 = vrot.lane.b32.xlu2 %v2658_v1, %s5722_s5 }
 0xeff   :  { %v2665_v27 = vpop.permute.xlu2 %2664 }
 0xf00   :  { %v2670_v28 = vsel %vm534_vm7, %v2665_v27, 0 }
 0xf01   :  { %2679 = vmatpush.bf16.xpose.msrb.mxu2 %v2670_v28 }
 0xf07   :  { %v2787_v26 = vpop.permute.xlu2 %2786 }
 0xf08   :  { %v2792_v29 = vsel %vm534_vm7, %v2787_v26, 0 }
 0xf09   :  { %2801 = vmatpush.bf16.xpose.msra.mxu2 %v2792_v29 }
 0xf0f   :  { %v2636_v17 = vpop.permute.xlu1 %2635  ;;  %v2880_v33 = vpop.permute.xlu2 %2879 }
 0xf10   :  { %v2641_v31 = vsel %vm534_vm7, %v2636_v17, 0  ;;  %v2631_v32 = vpop.permute.xlu0 %2630  ;;  %v2885_v39 = vsel %vm534_vm7, %v2880_v33, 0 }
 0xf11   :  { %2650 = vmatpush.bf16.xpose.msrb.mxu1 %v2641_v31 }
 0xf17   :  { %v2764_v36 = vpop.permute.xlu1 %2763  ;;  %v2901_v61 = vpop.permute.xlu2 %2900 }
 0xf18   :  { %v2769_v37 = vsel %vm534_vm7, %v2764_v36, 0  ;;  %v2660_v52 = vpop.permute.xlu0 %2659  ;;  %4733 = vmatmul.msk.bf16.vlgmr.msrb.gmra.mxu1 %vm534_vm7, %v2631_v32 }
 0xf19   :  { %4734 = vmatmul.msk.bf16.vlgmr.msrb.gmra.mxu2 %vm534_vm7, %v2660_v52  ;;  %2778 = vmatpush.bf16.xpose.msra.mxu1 %v2769_v37 }
 0xf1e   :  { %v2536_v41 = vpop.f32.mrf.mxu1 }
 0xf1f   :  { %v2559_v12 = vmul.f32 0.088388346, %v2536_v41  ;;  %v2785_v49 = vpop.permute.xlu1 %2784 }
 0xf20   :  { %v2762_v44 = vpop.permute.xlu0 %2761 }
 0xf21   :  { %2894 = vmatpush.bf16.xpose.msrb.mxu1 %v2885_v39  ;;  %v2561_v18 = vadd.f32 %v2559_v12, %v5872_v51 }
 0xf23   :  { %v2563_v45 = vsel %vm577_vm10, %v2561_v18, -inf }
 0xf24   :  { %2564 = vmax.xlane.f32.xlu0 %v2563_v45 }
 0xf26   :  { %v2538_v34 = vpop.f32.mrf.mxu1 }
 0xf27   :  { %v2878_v15 = vpop.permute.xlu1 %2877 }
 0xf28   :  { %v2903_v54 = vpop.permute.xlu0 %2902  ;;  %4737 = vmatmul.msk.bf16.vlgmr.msra.gmra.mxu1 %vm534_vm7, %v2762_v44  ;;  %v2738_v44 = vunpack.c.l.b16 %v6149_v13 }
 0xf29   :  { %v2908_v46 = vsel %vm534_vm7, %v2903_v54, 0  ;;  %4738 = vmatmul.msk.bf16.vlgmr.msra.gmra.mxu2 %vm534_vm7, %v2785_v49 }
 0xf2a   :  { %2917 = vmatpush.bf16.xpose.msrb.mxu2 %v2908_v46 }
 0xf2c   :  { %v2555_v55 = vpop.f32.mrf.mxu2 }
 0xf2d   :  { %v2560_v42 = vmul.f32 0.088388346, %v2555_v55 }
 0xf2f   :  { %v2562_v57 = vadd.f32 %v2560_v42, %v5879_v59 }
 0xf31   :  { %v2566_v58 = vsel %vm577_vm10, %v2562_v57, -inf }
 0xf32   :  { %2567 = vmax.xlane.f32.xlu1 %v2566_v58 }
 0xf34   :  { %v2557_v60 = vpop.f32.mrf.mxu2 }
 0xf38   :  { %4741 = vmatmul.msk.bf16.vlgmr.msrb.gmra.mxu1 %vm534_vm7, %v2878_v15 }
 0xf39   :  { %4742 = vmatmul.msk.bf16.vlgmr.msrb.gmra.mxu2 %vm534_vm7, %v2901_v61 }
 0xf95   :  { %v2652_v2 = vpop.f32.mrf.mxu1 }
 0xf96   :  { %v2685_v35 = vmul.f32 0.088388346, %v2652_v2 }
 0xf97   :  { %v2565_v3 = vpop.xlane.xlu0 %2564 }
 0xf98   :  { %v2569_v4 = vsub.f32 %v2561_v18, %v2565_v3  ;;  %v2687_v5 = vadd.f32 %v2685_v35, %v5872_v51  ;;  %v2739_v18 = vpack.c.b16 %v2738_v44, %v2738_v44 }
 0xf9a   :  { %v2571_v6 = vmul.f32 1.442695, %v2569_v4  ;;  %v2689_v63 = vsel %vm577_vm10, %v2687_v5, -inf }
 0xf9b   :  { %2690 = vmax.xlane.f32.xlu2 %v2689_v63 }
 0xf9c   :  { %5403 = vpow2.f32 %v2571_v6  ;;  %v2681_v50 = vpop.f32.mrf.mxu2 }
 0xf9d   :  { %v2686_v7 = vmul.f32 0.088388346, %v2681_v50  ;;  %v2654_v9 = vpop.f32.mrf.mxu1 }
 0xf9f   :  { %v2688_v48 = vadd.f32 %v2686_v7, %v5879_v59 }
 0xfa1   :  { %v2692_v10 = vsel %vm577_vm10, %v2688_v48, -inf }
 0xfa2   :  { %v5404_v14 = vpop.eup %5403  ;;  %2693 = vmax.xlane.f32.xlu0 %v2692_v10 }
 0xfa3   :  { %v2575_v16 = vsel %vm577_vm10, %v5404_v14, 0.0 }
 0xfa4   :  { %v2683_v19 = vpop.f32.mrf.mxu2  ;;  %2576 = vadd.xlane.f32.xlu2 %v2575_v16 }
 0xfa5   :  { %v2780_v20 = vpop.f32.mrf.mxu1  ;;  %v2568_v62 = vpop.xlane.xlu1 %2567 }
 0xfa6   :  { %v2807_v21 = vmul.f32 0.088388346, %v2780_v20  ;;  %v2570_v36 = vsub.f32 %v2562_v57, %v2568_v62 }
 0xfa8   :  { %v2809_v38 = vadd.f32 %v2807_v21, %v5872_v51  ;;  %v2573_v37 = vmul.f32 1.442695, %v2570_v36 }
 0xfaa   :  { %v2811_v22 = vsel %vm577_vm10, %v2809_v38, -inf  ;;  %5405 = vpow2.f32 %v2573_v37 }
 0xfac   :  { %v2803_v0 = vpop.f32.mrf.mxu2  ;;  %2812 = vmax.xlane.f32.xlu2 %v2811_v22 }
 0xfad   :  { %v2808_v23 = vmul.f32 0.088388346, %v2803_v0  ;;  %v2782_v43 = vpop.f32.mrf.mxu1 }
 0xfaf   :  { %v2810_v24 = vadd.f32 %v2808_v23, %v5879_v59 }
 0xfb0   :  { %v6202_v52 = vpop.eup %5405 }
 0xfb1   :  { %v2814_v1 = vsel %vm577_vm10, %v2810_v24, -inf  ;;  %v2578_v41 = vsel %vm577_vm10, %v6202_v52, 0.0 }
 0xfb2   :  { %2815 = vmax.xlane.f32.xlu1 %v2814_v1 }
 0xfb4   :  { %v2805_v27 = vpop.f32.mrf.mxu2 }
 0xfb5   :  { %v2896_v28 = vpop.f32.mrf.mxu1 }
 0xfb6   :  { %2716 = vrot.lane.b32.xlu0 %v6194_v40, %s5724_s6  ;;  %v2923_v39 = vmul.f32 0.088388346, %v2896_v28 }
 0xfbc   :  { %v2919_v26 = vpop.f32.mrf.mxu2 }
 0xfbd   :  { %v2924_v29 = vmul.f32 0.088388346, %v2919_v26  ;;  %v2898_v17 = vpop.f32.mrf.mxu1 }
 0xfbf   :  { %v2926_v31 = vadd.f32 %v2924_v29, %v5879_v59  ;;  %v6207_v59 = vadd.f32 %v2923_v39, %v5872_v51 }
 0xfc1   :  { %v2930_v32 = vsel %vm577_vm10, %v2926_v31, -inf  ;;  %v2927_v12 = vsel %vm577_vm10, %v6207_v59, -inf }
 0xfc2   :  { %2931 = vmax.xlane.f32.xlu1 %v2930_v32 }
 0xfc4   :  { %v2921_v33 = vpop.f32.mrf.mxu2 }
 0xfdb   :  { %2835 = vrot.lane.b32.xlu1 %v6194_v40, %s5718_s19 }
 0xfe0   :  { %2579 = vadd.xlane.f32.xlu0 %v2578_v41 }
 0xfe8   :  { %2928 = vmax.xlane.f32.xlu0 %v2927_v12 }
 0xffc   :  { %2856 = vrot.lane.b32.xlu0 %v2739_v18, %s5718_s19 }
0x100e   :  { %v2691_v45 = vpop.xlane.xlu2 %2690 }
0x100f   :  { %v2695_v34 = vsub.f32 %v2687_v5, %v2691_v45 }
0x1011   :  { %v2697_v49 = vmul.f32 1.442695, %v2695_v34 }
0x1013   :  { %5407 = vpow2.f32 %v2697_v49 }
0x1015   :  { %v2694_v54 = vpop.xlane.xlu0 %2693 }
0x1016   :  { %v2696_v46 = vsub.f32 %v2688_v48, %v2694_v54 }
0x1017   :  { %v2577_v55 = vpop.xlane.xlu2 %2576 }
0x1018   :  { %v2699_v42 = vmul.f32 1.442695, %v2696_v46  ;;  %5409 = vrcp.f32 %v2577_v55 }
0x1019   :  { %v5408_v51 = vpop.eup %5407 }
0x101a   :  { %5411 = vpow2.f32 %v2699_v42  ;;  %v2701_v57 = vsel %vm577_vm10, %v5408_v51, 0.0 }
0x101b   :  { %2702 = vadd.xlane.f32.xlu2 %v2701_v57 }
0x101e   :  { %v5410_v58 = vpop.eup %5409 }
0x101f   :  { %v2583_v60 = vmul.f32 %v5410_v58, %v5404_v14  ;;  %v2813_v13 = vpop.xlane.xlu2 %2812 }
0x1020   :  { %v5412_v15 = vpop.eup %5411  ;;  %v2817_v61 = vsub.f32 %v2809_v38, %v2813_v13 }
0x1021   :  { %v2585_v2 = vpack.c.bf16 %v2583_v60, %v2583_v60  ;;  %v2704_v35 = vsel %vm577_vm10, %v5412_v15, 0.0 }
0x1022   :  { %v2819_v3 = vmul.f32 1.442695, %v2817_v61  ;;  %2705 = vadd.xlane.f32.xlu1 %v2704_v35 }
0x1023   :  { %4731 = vmatmul.msk.bf16.vlgmr.msrb.gmra.mxu3 %vm577_vm10, %v2585_v2 }
0x1024   :  { %5413 = vpow2.f32 %v2819_v3 }
0x1025   :  { %v2816_v4 = vpop.xlane.xlu1 %2815 }
0x1026   :  { %v2818_v5 = vsub.f32 %v2810_v24, %v2816_v4 }
0x1028   :  { %v2821_v6 = vmul.f32 1.442695, %v2818_v5  ;;  %v2717_v63 = vpop.permute.xlu0 %2716 }
0x1029   :  { %v2722_v50 = vsel %vm607_vm8, %v2717_v63, 0 }
0x102a   :  { %v5414_v7 = vpop.eup %5413  ;;  %5415 = vpow2.f32 %v2821_v6  ;;  %2731 = vmatpush.bf16.msra.mxu3 %v2722_v50 }
0x102b   :  { %v2823_v9 = vsel %vm577_vm10, %v5414_v7, 0.0 }
0x102c   :  { %2824 = vadd.xlane.f32.xlu1 %v2823_v9 }
0x1030   :  { %v5416_v48 = vpop.eup %5415 }
0x1031   :  { %v2826_v10 = vsel %vm577_vm10, %v5416_v48, 0.0 }
0x1033   :  { %2740 = vrot.lane.b32.xlu2 %v2739_v18, %s5724_s6 }
0x1034   :  { %2827 = vadd.xlane.f32.xlu1 %v2826_v10 }
0x1035   :  { %v2932_v14 = vpop.xlane.xlu1 %2931 }
0x1036   :  { %v2934_v16 = vsub.f32 %v2926_v31, %v2932_v14 }
0x1038   :  { %v2937_v19 = vmul.f32 1.442695, %v2934_v16 }
0x103a   :  { %5417 = vpow2.f32 %v2937_v19 }
0x1040   :  { %v5418_v20 = vpop.eup %5417 }
0x1041   :  { %v2942_v21 = vsel %vm577_vm10, %v5418_v20, 0.0 }
0x1042   :  { %2943 = vadd.xlane.f32.xlu0 %v2942_v21 }
0x104d   :  { %v2836_v38 = vpop.permute.xlu1 %2835  ;;  %2951 = vrot.lane.b32.xlu1 %v6194_v40, %s5722_s5 }
0x104e   :  { %v2841_v22 = vsel %vm607_vm8, %v2836_v38, 0 }
0x104f   :  { %2850 = vmatpush.bf16.msrb.mxu3 %v2841_v22 }
0x1053   :  { %v2580_v0 = vpop.xlane.xlu0 %2579 }
0x1054   :  { %5419 = vrcp.f32 %v2580_v0 }
0x1055   :  { %2972 = vrot.lane.b32.xlu1 %v2739_v18, %s5722_s5 }
0x105a   :  { %v5420_v23 = vpop.eup %5419 }
0x105b   :  { %v2584_v43 = vmul.f32 %v5420_v23, %v6202_v52  ;;  %v2929_v24 = vpop.xlane.xlu0 %2928 }
0x105c   :  { %v2933_v25 = vsub.f32 %v6207_v59, %v2929_v24  ;;  %v4773_v24 = vld [vmem:[#allocation10 + $0x2f8] sm:$0xf0] }
0x105d   :  { %v2586_v1 = vpack.c.bf16 %v2584_v43, %v2584_v43  ;;  %v5174_v43 = vld [vmem:[#allocation10 + $0x2ec] sm:$0xf] }
0x105e   :  { %v2935_v27 = vmul.f32 1.442695, %v2933_v25  ;;  %v5170_v25 = vld [vmem:[#allocation10 + $0x2cc] sm:$0xf] }
0x105f   :  { %4732 = vmatmul.msk.bf16.vlgmr.msra.gmra.mxu0 %vm577_vm10, %v2586_v1  ;;  %v4776_v1 = vor.u32 %v5174_v43, %v4773_v24  ;;  %v4833_v43 = vld [vmem:[#allocation10 + $0x370] sm:$0xf0] }
0x1060   :  { %5421 = vpow2.f32 %v2935_v27  ;;  %v4769_v27 = vld [vmem:[#allocation10 + $0x2d8] sm:$0xf0] }
0x1061   :  { %3056 = vmatpush.bf16.msra.mxu1 %v4776_v1  ;;  %v4825_v1 = vld [vmem:[#allocation10 + $0x350] sm:$0xf0] }
0x1066   :  { %v5422_v28 = vpop.eup %5421 }
0x1067   :  { %v2939_v40 = vsel %vm577_vm10, %v5422_v28, 0.0 }
0x1068   :  { %2940 = vadd.xlane.f32.xlu2 %v2939_v40  ;;  %v5166_v40 = vld [vmem:[#allocation10 + $0x2ac] sm:$0xf] }
0x106e   :  { %v2857_v17 = vpop.permute.xlu0 %2856 }
0x106f   :  { %v2862_v36 = vsel %vm607_vm8, %v2857_v17, 0  ;;  %v5162_v17 = vld [vmem:[#allocation10 + $0x28c] sm:$0xf] }
0x108e   :  { %v2703_v26 = vpop.xlane.xlu2 %2702 }
0x108f   :  { %5423 = vrcp.f32 %v2703_v26  ;;  %v4765_v26 = vld [vmem:[#allocation10 + $0x2b8] sm:$0xf0] }
0x1095   :  { %v5424_v29 = vpop.eup %5423  ;;  %v2706_v31 = vpop.xlane.xlu1 %2705 }
0x1096   :  { %v2709_v32 = vmul.f32 %v5424_v29, %v5408_v51  ;;  %5425 = vrcp.f32 %v2706_v31  ;;  %v2741_v33 = vpop.permute.xlu2 %2740  ;;  %v4768_v29 = vor.u32 %v5166_v40, %v4765_v26  ;;  %v4761_v31 = vld [vmem:[#allocation10 + $0x298] sm:$0xf0] }
0x1097   :  { %v2746_v62 = vsel %vm607_vm8, %v2741_v33, 0  ;;  %v5158_v33 = vld [vmem:[#allocation10 + $0x26c] sm:$0xf] }
0x1098   :  { %v2711_v37 = vpack.c.bf16 %v2709_v32, %v2709_v32  ;;  %2755 = vmatpush.bf16.msrb.mxu0 %v2746_v62  ;;  %v4764_v32 = vor.u32 %v5162_v17, %v4761_v31  ;;  %v4757_v62 = vld [vmem:[#allocation10 + $0x278] sm:$0xf0]  ;;  %v4817_v17 = vld [vmem:[#allocation10 + $0x330] sm:$0xf0] }
0x109a   :  { %4735 = vmatmul.msk.bf16.vlgmr.msra.gmra.mxu3 %vm577_vm10, %v2711_v37  ;;  %v5154_v37 = vld [vmem:[#allocation10 + $0x24c] sm:$0xf] }
0x109c   :  { %2871 = vmatpush.bf16.msra.mxu0 %v2862_v36  ;;  %v5426_v52 = vpop.eup %5425  ;;  %v4760_v36 = vor.u32 %v5158_v33, %v4757_v62  ;;  %v5177_v33 = vld [vmem:[#allocation10 + $0x304] sm:$0xf]  ;;  %v4809_v62 = vld [vmem:[#allocation10 + $0x310] sm:$0xf0] }
0x109d   :  { %v2710_v39 = vmul.f32 %v5426_v52, %v5412_v15  ;;  %v4753_v52 = vld [vmem:[#allocation10 + $0x258] sm:$0xf0] }
0x109f   :  { %v2712_v41 = vpack.c.bf16 %v2710_v39, %v2710_v39  ;;  %v2825_v59 = vpop.xlane.xlu1 %2824  ;;  %v4756_v39 = vor.u32 %v5154_v37, %v4753_v52  ;;  %v4812_v52 = vor.u32 %v5177_v33, %v4809_v62 }
0x10a0   :  { %5427 = vrcp.f32 %v2825_v59  ;;  %v4749_v59 = vld [vmem:[#allocation10 + $0x238] sm:$0xf0] }
0x10a1   :  { %4736 = vmatmul.msk.bf16.vlgmr.msrb.gmra.mxu0 %vm577_vm10, %v2712_v41  ;;  %v5150_v41 = vld [vmem:[#allocation10 + $0x22c] sm:$0xf] }
0x10a6   :  { %v5428_v12 = vpop.eup %5427  ;;  %v6233_v44 = vpop.f32.mrf.mxu3 }
0x10a7   :  { %v2831_v18 = vmul.f32 %v5428_v12, %v5414_v7  ;;  %v2828_v45 = vpop.xlane.xlu1 %2827  ;;  %v4752_v12 = vor.u32 %v5150_v41, %v4749_v59  ;;  %v4807_v59 = vld [vmem:[#allocation10 + $0x3e0] sm:$0xf] }
0x10a8   :  { %5429 = vrcp.f32 %v2828_v45  ;;  %v4745_v45 = vld [vmem:[#allocation10 + $0x218] sm:$0xf0] }
0x10a9   :  { %v2833_v34 = vpack.c.bf16 %v2831_v18, %v2831_v18  ;;  %v5146_v18 = vld [vmem:[#allocation10 + $0x20c] sm:$0xf] }
0x10ab   :  { %4739 = vmatmul.msk.bf16.vlgmr.msrb.gmra.mxu3 %vm577_vm10, %v2833_v34  ;;  %v4748_v34 = vor.u32 %v5146_v18, %v4745_v45  ;;  %v4803_v45 = vld [vmem:[#allocation10 + $0x3c0] sm:$0xf] }
0x10ae   :  { %v5430_v49 = vpop.eup %5429  ;;  %v2606_v54 = vpop.f32.mrf.mxu3 }
0x10af   :  { %v2832_v46 = vmul.f32 %v5430_v49, %v5416_v48 }
0x10b1   :  { %v2834_v55 = vpack.c.bf16 %v2832_v46, %v2832_v46 }
0x10b3   :  { %4740 = vmatmul.msk.bf16.vlgmr.msra.gmra.mxu0 %vm577_vm10, %v2834_v55 }
0x10b5   :  { %v2944_v42 = vpop.xlane.xlu0 %2943 }
0x10b6   :  { %5431 = vrcp.f32 %v2944_v42 }
0x10bc   :  { %v5432_v58 = vpop.eup %5431 }
0x10bd   :  { %v2948_v60 = vmul.f32 %v5432_v58, %v5418_v20 }
0x10bf   :  { %v2952_v51 = vpop.permute.xlu1 %2951  ;;  %v2950_v61 = vpack.c.bf16 %v2948_v60, %v2948_v60 }
0x10c0   :  { %v2957_v57 = vsel %vm607_vm8, %v2952_v51, 0 }
0x10c1   :  { %2966 = vmatpush.bf16.msra.mxu3 %v2957_v57 }
0x10c7   :  { %v2973_v13 = vpop.permute.xlu1 %2972 }
0x10c8   :  { %v2978_v15 = vsel %vm607_vm8, %v2973_v13, 0 }
0x10c9   :  { %2987 = vmatpush.bf16.msrb.mxu0 %v2978_v15 }
0x10cc   :  { %4744 = vmatmul.msk.bf16.vlgmr.msrb.gmra.mxu0 %vm577_vm10, %v2950_v61 }
0x10db   :  { %v2941_v2 = vpop.xlane.xlu2 %2940 }
0x10dc   :  { %5433 = vrcp.f32 %v2941_v2  ;;  %v2623_v35 = vpop.f32.mrf.mxu0 }
0x10e2   :  { %v5434_v3 = vpop.eup %5433 }
0x10e3   :  { %v2947_v4 = vmul.f32 %v5434_v3, %v5422_v28  ;;  %v4772_v28 = vor.u32 %v5170_v25, %v4769_v27  ;;  %v5185_v25 = vld [vmem:[#allocation10 + $0x344] sm:$0xf] }
0x10e4   :  { %v2625_v5 = vpop.f32.mrf.mxu0  ;;  %v4828_v40 = vor.u32 %v5185_v25, %v4825_v1 }
0x10e5   :  { %v2949_v6 = vpack.c.bf16 %v2947_v4, %v2947_v4  ;;  %3057 = vmatpush.bf16.msra.mxu1 %v4772_v28 }
0x10e7   :  { %4743 = vmatmul.msk.bf16.vlgmr.msra.gmra.mxu3 %vm577_vm10, %v2949_v6  ;;  %v2288_v6 = vld [vmem:[#allocation14 + $0x3a] ss:$0 sm:$0xff] }
0x10e9   :  { %3058 = vmatpush.bf16.msra.mxu1 %v4768_v29  ;;  %v5181_v29 = vld [vmem:[#allocation10 + $0x324] sm:$0xf] }
0x10ed   :  { %3059 = vmatpush.bf16.msra.mxu1 %v4764_v32  ;;  %v4820_v32 = vor.u32 %v5181_v29, %v4817_v17  ;;  %v2281_v17 = vld [vmem:[#allocation14 + $0x30] ss:$0 sm:$0xff] }
0x10f1   :  { %3060 = vmatpush.bf16.msra.mxu1 %v4760_v36 }
0x10f5   :  { %3061 = vmatpush.bf16.msra.mxu1 %v4756_v39 }
0x10f9   :  { %3062 = vmatpush.bf16.msra.mxu1 %v4752_v12  ;;  %v5207_v12 = vld [vmem:[#allocation10 + $0x3ec] sm:$0xf0] }
0x10fa   :  { %v4808_v18 = vor.u32 %v5207_v12, %v4807_v59 }
0x10fc   :  { %3167 = vmatpush.bf16.msra.mxu2 %v4808_v18 }
0x10fd   :  { %3063 = vmatpush.bf16.msra.mxu1 %v4748_v34  ;;  %v5203_v34 = vld [vmem:[#allocation10 + $0x3cc] sm:$0xf0] }
0x111d   :  { %v2733_v63 = vpop.f32.mrf.mxu3 }
0x111e   :  { %v2757_v50 = vpop.f32.mrf.mxu0 }
0x111f   :  { %v5291_v7 = vpack.i.bf16 %v2757_v50, %v2733_v63 }
0x1121   :  { %5292 = vrot.lane.b32.xlu1 %v5291_v7, %s5722_s5 }
0x1125   :  { %v2735_v9 = vpop.f32.mrf.mxu3 }
0x1126   :  { %v2759_v48 = vpop.f32.mrf.mxu0 }
0x1127   :  { %v5205_v48 = vld [vmem:[#allocation10 + $0x3e4] sm:$0xf] }
0x112e   :  { %v2852_v10 = vpop.f32.mrf.mxu3 }
0x1130   :  { %v2873_v14 = vpop.f32.mrf.mxu0 }
0x1131   :  { %v5296_v16 = vpack.i.bf16 %v2873_v14, %v2852_v10  ;;  %v4865_v10 = vld [vmem:[#allocation10 + $0x3f0] sm:$0xf0]  ;;  %v5201_v14 = vld [vmem:[#allocation10 + $0x3c4] sm:$0xf] }
0x1133   :  { %5297 = vrot.lane.b32.xlu2 %v5296_v16, %s5718_s19  ;;  %v4868_v16 = vor.u32 %v5205_v48, %v4865_v10 }
0x1135   :  { %3266 = vmatpush.bf16.msrb.mxu3 %v4868_v16 }
0x1136   :  { %v2854_v19 = vpop.f32.mrf.mxu3 }
0x1137   :  { %v4857_v19 = vld [vmem:[#allocation10 + $0x3d0] sm:$0xf0] }
0x1138   :  { %v2875_v20 = vpop.f32.mrf.mxu0 }
0x1139   :  { %v4860_v20 = vor.u32 %v5201_v14, %v4857_v19 }
0x113b   :  { %3267 = vmatpush.bf16.msrb.mxu3 %v4860_v20 }
0x1149   :  { %v2989_v21 = vpop.f32.mrf.mxu0 }
0x1151   :  { %v2991_v38 = vpop.f32.mrf.mxu0 }
0x116a   :  { %v2968_v22 = vpop.f32.mrf.mxu3 }
0x116b   :  { %v5301_v0 = vpack.i.bf16 %v2989_v21, %v2968_v22  ;;  %v5197_v21 = vld [vmem:[#allocation10 + $0x3a4] sm:$0xf] }
0x116c   :  { %v5193_v22 = vld [vmem:[#allocation10 + $0x384] sm:$0xf] }
0x116d   :  { %5302 = vrot.lane.b32.xlu1 %v5301_v0, %s5724_s6  ;;  %v4841_v0 = vld [vmem:[#allocation10 + $0x390] sm:$0xf0] }
0x1172   :  { %v2970_v23 = vpop.f32.mrf.mxu3 }
0x1173   :  { %v4844_v23 = vor.u32 %v5193_v22, %v4841_v0 }
0x118d   :  { %v5298_v55 = vpop.permute.xlu2 %5297 }
0x118e   :  { %v5300_v57 = vunpack.i.h.bf16 %v5298_v55  ;;  %v5299_v58 = vunpack.i.l.bf16 %v5298_v55 }
0x1193   :  { %v5293_v49 = vpop.permute.xlu1 %5292 }
0x1194   :  { %v5295_v54 = vunpack.i.h.bf16 %v5293_v49  ;;  %v5294_v46 = vunpack.i.l.bf16 %v5293_v49  ;;  %v4804_v49 = vor.u32 %v5203_v34, %v4803_v45 }
0x1196   :  { %v3018_v42 = vsel %vm534_vm7, %v2623_v35, %v5295_v54  ;;  %v3017_v51 = vsel %vm534_vm7, %v6233_v44, %v5294_v46  ;;  %3168 = vmatpush.bf16.msra.mxu2 %v4804_v49  ;;  %v4799_v54 = vld [vmem:[#allocation10 + $0x3a0] sm:$0xf]  ;;  %v5199_v46 = vld [vmem:[#allocation10 + $0x3ac] sm:$0xf0] }
0x1197   :  { %v3019_v61 = vsel %vm1035_vm12, %v3017_v51, %v5299_v58  ;;  %v3020_v2 = vsel %vm1035_vm12, %v3018_v42, %v5300_v57  ;;  %v4800_v55 = vor.u32 %v5199_v46, %v4799_v54  ;;  %v4795_v42 = vld [vmem:[#allocation10 + $0x380] sm:$0xf]  ;;  %v5195_v51 = vld [vmem:[#allocation10 + $0x38c] sm:$0xf0] }
0x1198   :  { %v4796_v57 = vor.u32 %v5195_v51, %v4795_v42  ;;  %v4791_v58 = vld [vmem:[#allocation10 + $0x360] sm:$0xf] }
0x1199   :  { %v2289_v42 = vld [vmem:[#allocation14 + $0x23] ss:$0 sm:$0xff] }
0x119a   :  { %3169 = vmatpush.bf16.msra.mxu2 %v4800_v55 }
0x119e   :  { %3170 = vmatpush.bf16.msra.mxu2 %v4796_v57 }
0x11df   :  { %v5303_v60 = vpop.permute.xlu1 %5302 }
0x11e0   :  { %v5305_v13 = vunpack.i.h.bf16 %v5303_v60  ;;  %v5304_v15 = vunpack.i.l.bf16 %v5303_v60  ;;  %v5191_v60 = vld [vmem:[#allocation10 + $0x36c] sm:$0xf0] }
0x11e2   :  { %v3022_v3 = vsel %vm1038_vm13, %v3020_v2, %v5305_v13  ;;  %v3021_v4 = vsel %vm1038_vm13, %v3019_v61, %v5304_v15  ;;  %v4792_v13 = vor.u32 %v5191_v60, %v4791_v58  ;;  %v4787_v15 = vld [vmem:[#allocation10 + $0x340] sm:$0xf]  ;;  %v5187_v61 = vld [vmem:[#allocation10 + $0x34c] sm:$0xf0] }
0x11e3   :  { %v3023_v5 = vpack.c.bf16 %v3022_v3, %v3021_v4  ;;  %v4788_v2 = vor.u32 %v5187_v61, %v4787_v15  ;;  %v4783_v3 = vld [vmem:[#allocation10 + $0x320] sm:$0xf]  ;;  %v5183_v4 = vld [vmem:[#allocation10 + $0x32c] sm:$0xf0] }
0x11e4   :  { %3171 = vmatpush.bf16.msra.mxu2 %v4792_v13 }
0x11e5   :  { %3064 = vmatmul.bf16.vlgmr.msra.gmra.mxu1 %v3023_v5  ;;  %v4784_v5 = vor.u32 %v5183_v4, %v4783_v3 }
0x11e8   :  { %3172 = vmatpush.bf16.msra.mxu2 %v4788_v2 }
0x11ec   :  { %3173 = vmatpush.bf16.msra.mxu2 %v4784_v5 }
0x1262   :  { %v3065_v35 = vpop.f32.mrf.mxu1 }
0x1263   :  { %v3070_v63 = vadd.f32 %v3065_v35, %v6121_v53  ;;  %v4849_v53 = vld [vmem:[#allocation10 + $0x3b0] sm:$0xf0] }
0x1264   :  { %v4852_v38 = vor.u32 %v5197_v21, %v4849_v53 }
0x1265   :  { %v6252_v44 = vadd.f32 %v3070_v63, %v2288_v6  ;;  %v4779_v63 = vld [vmem:[#allocation10 + $0x300] sm:$0xf] }
0x1266   :  { %3268 = vmatpush.bf16.msrb.mxu3 %v4852_v38 }
0x1267   :  { %3074 = vadd.xlane.f32.xlu0 %v6252_v44 }
0x126a   :  { %v3067_v50 = vpop.f32.mrf.mxu1  ;;  %3269 = vmatpush.bf16.msrb.mxu3 %v4844_v23 }
0x126b   :  { %v3071_v7 = vadd.f32 %v3067_v50, %v6125_v56  ;;  %v5189_v56 = vld [vmem:[#allocation10 + $0x364] sm:$0xf]  ;;  %v5179_v50 = vld [vmem:[#allocation10 + $0x30c] sm:$0xf0] }
0x126c   :  { %v4836_v24 = vor.u32 %v5189_v56, %v4833_v43  ;;  %v6274_v43 = vld [vmem:[#allocation14 + $0x2b] ss:$8 sm:$0x3] }
0x126d   :  { %v6256_v9 = vadd.f32 %v3071_v7, %v2288_v6  ;;  %v4780_v7 = vor.u32 %v5179_v50, %v4779_v63  ;;  %v3182_v1 = vperm.slane %v6274_v43, 0 }
0x126e   :  { %3270 = vmatpush.bf16.msrb.mxu3 %v4836_v24 }
0x126f   :  { %3076 = vadd.xlane.f32.xlu1 %v6256_v9  ;;  %3174 = vmatpush.bf16.msra.mxu2 %v4780_v7 }
0x1272   :  { %3271 = vmatpush.bf16.msrb.mxu3 %v4828_v40 }
0x1276   :  { %3272 = vmatpush.bf16.msrb.mxu3 %v4820_v32 }
0x127a   :  { %3273 = vmatpush.bf16.msrb.mxu3 %v4812_v52 }
0x127d   :  { %3274 = vmatmul.bf16.vlgmr.msrb.gmra.mxu3 %v5983_v30 }
0x12da   :  { %v3075_v27 = vpop.xlane.xlu0 %3074 }
0x12db   :  { %v3078_v28 = vmul.f32 %v3075_v27, %v5820_v8 }
0x12dd   :  { %v6261_v26 = vsub.f32 %v6252_v44, %v3078_v28 }
0x12df   :  { %v3082_v31 = vmul.f32 %v6261_v26, %v6261_v26 }
0x12e1   :  { %3084 = vadd.xlane.f32.xlu0 %v3082_v31 }
0x12e2   :  { %v3077_v36 = vpop.xlane.xlu1 %3076 }
0x12e3   :  { %v3079_v37 = vmul.f32 %v3077_v36, %v5820_v8 }
0x12e5   :  { %v6267_v39 = vsub.f32 %v6256_v9, %v3079_v37 }
0x12e7   :  { %v3083_v41 = vmul.f32 %v6267_v39, %v6267_v39 }
0x12e9   :  { %3086 = vadd.xlane.f32.xlu0 %v3083_v41  ;;  %v2282_v41 = vld [vmem:[#allocation14 + $0x38] ss:$0 sm:$0xff] }
0x1300   :  { %v3275_v28 = vpop.f32.mrf.mxu3 }
0x1301   :  { %v3276_v29 = vadd.f32 %v3275_v28, %v3182_v1 }
0x1303   :  { %v3296_v32 = vpack.c.bf16 %v3276_v29, %v3276_v29  ;;  %v5184_v29 = vld [vmem:[#allocation10 + $0x334] sm:$0xf0] }
0x1305   :  { %v3302_v37 = vsel %vm534_vm7, %v3296_v32, 0  ;;  %v3410_v52 = vunpack.c.l.b16 %v3296_v32  ;;  %v5180_v32 = vld [vmem:[#allocation10 + $0x314] sm:$0xf0] }
0x1306   :  { %3311 = vmatpush.bf16.xpose.msrb.mxu1 %v3302_v37 }
0x1307   :  { %v3411_v12 = vpack.c.b16 %v3410_v52, %v3410_v52 }
0x1308   :  { %v3277_v18 = vpop.f32.mrf.mxu3 }
0x1309   :  { %v3278_v34 = vadd.f32 %v3277_v18, %v3182_v1  ;;  %3412 = vrot.lane.b32.xlu2 %v3411_v12, %s5724_s6  ;;  %v4831_v1 = vld [vmem:[#allocation10 + $0x348] sm:$0xf] }
0x130b   :  { %v3297_v54 = vpack.c.bf16 %v3278_v34, %v3278_v34 }
0x130d   :  { %v3321_v46 = vsel %vm534_vm7, %v3297_v54, 0  ;;  %v3439_v55 = vunpack.c.l.b16 %v3297_v54 }
0x130e   :  { %3330 = vmatpush.bf16.xpose.msrb.mxu2 %v3321_v46 }
0x1354   :  { %v3085_v6 = vpop.xlane.xlu0 %3084 }
0x1355   :  { %v3088_v35 = vmul.f32 %v3085_v6, %v5820_v8 }
0x1357   :  { %v3090_v48 = vadd.f32 1e-06, %v3088_v35 }
0x1359   :  { %5435 = vrsqrt.f32 %v3090_v48  ;;  %vm3098_vm11 = vweird.f32 %v3090_v48 }
0x135c   :  { %v3087_v10 = vpop.xlane.xlu0 %3086 }
0x135d   :  { %v3089_v14 = vmul.f32 %v3087_v10, %v5820_v8  ;;  %v5208_v10 = vld [vmem:[#allocation10 + $0x3f4] sm:$0xf0] }
0x135f   :  { %v5436_v16 = vpop.eup %5435  ;;  %v3091_v19 = vadd.f32 1e-06, %v3089_v14 }
0x1360   :  { %v3093_v20 = vmul.f32 %v5436_v16, %v3090_v48  ;;  %vm3099_vm9 = vweird.f32 %v5436_v16  ;;  %v4871_v48 = vld [vmem:[#allocation10 + $0x3e8] sm:$0xf] }
0x1361   :  { %5437 = vrsqrt.f32 %v3091_v19  ;;  %vm3100_vm14 = vmor %vm3098_vm11, %vm3099_vm9  ;;  %vm3108_vm0 = vweird.f32 %v3091_v19  ;;  %v4872_v14 = vor.u32 %v5208_v10, %v4871_v48 }
0x1362   :  { %v3094_v21 = vmul.f32 %v5436_v16, %v3093_v20 }
0x1363   :  { %v3413_v2 = vpop.permute.xlu2 %3412  ;;  %3280 = vmatpush.bf16.msra.mxu0 %v4872_v14 }
0x1364   :  { %v3095_v53 = vmul.f32 0.5, %v3094_v21  ;;  %v3418_v4 = vsel %vm534_vm7, %v3413_v2, 0  ;;  %v4855_v21 = vld [vmem:[#allocation10 + $0x3a8] sm:$0xf] }
0x1365   :  { %3427 = vmatpush.bf16.xpose.msra.mxu1 %v3418_v4 }
0x1366   :  { %v3096_v38 = vsub.f32 1.5, %v3095_v53  ;;  %v5200_v53 = vld [vmem:[#allocation10 + $0x3b4] sm:$0xf0] }
0x1367   :  { %v5438_v22 = vpop.eup %5437 }
0x1368   :  { %v3097_v0 = vmul.f32 %v5436_v16, %v3096_v38  ;;  %v3103_v23 = vmul.f32 %v5438_v22, %v3091_v19  ;;  %vm3109_vm15 = vweird.f32 %v5438_v22  ;;  %v5204_v19 = vld [vmem:[#allocation10 + $0x3d4] sm:$0xf0]  ;;  %v4856_v38 = vor.u32 %v5200_v53, %v4855_v21 }
0x1369   :  { %vm3110_vm1 = vmor %vm3108_vm0, %vm3109_vm15 }
0x136a   :  { %v3104_v56 = vmul.f32 %v5438_v22, %v3103_v23  ;;  %v3101_v24 = vsel %vm3100_vm14, %v5436_v16, %v3097_v0  ;;  %v4863_v16 = vld [vmem:[#allocation10 + $0x3c8] sm:$0xf]  ;;  %v5196_v0 = vld [vmem:[#allocation10 + $0x394] sm:$0xf0] }
0x136b   :  { %v3112_v40 = vmul.f32 %v3101_v24, %v6261_v26  ;;  %v4864_v20 = vor.u32 %v5204_v19, %v4863_v16  ;;  %v5192_v24 = vld [vmem:[#allocation10 + $0x374] sm:$0xf0] }
0x136c   :  { %v3105_v25 = vmul.f32 0.5, %v3104_v56  ;;  %v4839_v56 = vld [vmem:[#allocation10 + $0x368] sm:$0xf] }
0x136d   :  { %v3114_v62 = vmul.f32 %v3112_v40, %v2281_v17  ;;  %3281 = vmatpush.bf16.msra.mxu0 %v4864_v20  ;;  %v4823_v40 = vld [vmem:[#allocation10 + $0x328] sm:$0xf] }
0x136e   :  { %v3106_v27 = vsub.f32 1.5, %v3105_v25  ;;  %v4840_v25 = vor.u32 %v5192_v24, %v4839_v56 }
0x136f   :  { %v3116_v45 = vadd.f32 %v3114_v62, %v2282_v41 }
0x1370   :  { %v3107_v31 = vmul.f32 %v5438_v22, %v3106_v27  ;;  %v5188_v27 = vld [vmem:[#allocation10 + $0x354] sm:$0xf0] }
0x1371   :  { %3282 = vmatpush.bf16.msra.mxu0 %v4856_v38  ;;  %v4832_v28 = vor.u32 %v5188_v27, %v4831_v1 }
0x1372   :  { %v3111_v33 = vsel %vm3110_vm1, %v5438_v22, %v3107_v31  ;;  %v4847_v22 = vld [vmem:[#allocation10 + $0x388] sm:$0xf] }
0x1373   :  { %v3113_v36 = vmul.f32 %v3111_v33, %v6267_v39  ;;  %v3440_v39 = vpack.c.b16 %v3439_v55, %v3439_v55  ;;  %v4848_v23 = vor.u32 %v5196_v0, %v4847_v22  ;;  %v4815_v31 = vld [vmem:[#allocation10 + $0x308] sm:$0xf] }
0x1374   :  { %v4816_v33 = vor.u32 %v5180_v32, %v4815_v31 }
0x1375   :  { %v3115_v59 = vmul.f32 %v3113_v36, %v2281_v17  ;;  %3441 = vrot.lane.b32.xlu0 %v3440_v39, %s5724_s6  ;;  %3283 = vmatpush.bf16.msra.mxu0 %v4848_v23  ;;  %v4824_v17 = vor.u32 %v5184_v29, %v4823_v40 }
0x1377   :  { %v3117_v26 = vadd.f32 %v3115_v59, %v2282_v41 }
0x1379   :  { %v3118_v49 = vpack.c.bf16 %v3117_v26, %v3116_v45  ;;  %3284 = vmatpush.bf16.msra.mxu0 %v4840_v25 }
0x137b   :  { %3175 = vmatmul.bf16.vlgmr.msra.gmra.mxu2 %v3118_v49 }
0x137d   :  { %3540 = vrot.lane.b32.xlu0 %v3411_v12, %s5718_s19  ;;  %3285 = vmatpush.bf16.msra.mxu0 %v4832_v28 }
0x1381   :  { %3286 = vmatpush.bf16.msra.mxu0 %v4824_v17 }
0x1385   :  { %3287 = vmatpush.bf16.msra.mxu0 %v4816_v33 }
0x1388   :  { %3288 = vmatmul.bf16.vlgmr.msra.gmra.mxu0 %v5983_v30 }
0x13e7   :  { %v3442_v3 = vpop.permute.xlu0 %3441 }
0x13e8   :  { %v3447_v5 = vsel %vm534_vm7, %v3442_v3, 0 }
0x13e9   :  { %3456 = vmatpush.bf16.xpose.msra.mxu2 %v3447_v5 }
0x13ef   :  { %v3541_v50 = vpop.permute.xlu0 %3540 }
0x13f0   :  { %v3546_v7 = vsel %vm534_vm7, %v3541_v50, 0 }
0x13fe   :  { %v3176_v51 = vpop.f32.mrf.mxu2 }
0x13ff   :  { %v3177_v57 = vadd.f32 %v3176_v51, %v2289_v42 }
0x1401   :  { %v3294_v58 = vpack.c.bf16 %v3177_v57, %v3177_v57 }
0x1403   :  { %v3405_v60 = vunpack.c.l.b16 %v3294_v58  ;;  %4873 = vmatmul.msk.bf16.vlgmr.msrb.gmra.mxu1 %vm534_vm7, %v3294_v58 }
0x1404   :  { %3555 = vmatpush.bf16.xpose.msrb.mxu1 %v3546_v7 }
0x1405   :  { %v3406_v13 = vpack.c.b16 %v3405_v60, %v3405_v60 }
0x1406   :  { %v3178_v15 = vpop.f32.mrf.mxu2 }
0x1407   :  { %v3179_v61 = vadd.f32 %v3178_v15, %v2289_v42  ;;  %3538 = vrot.lane.b32.xlu1 %v3406_v13, %s5718_s19  ;;  %3407 = vrot.lane.b32.xlu2 %v3406_v13, %s5724_s6 }
0x1409   :  { %v3295_v6 = vpack.c.bf16 %v3179_v61, %v3179_v61  ;;  %v3183_v61 = vperm.slane %v6274_v43, 1 }
0x140b   :  { %v3434_v35 = vunpack.c.l.b16 %v3295_v6  ;;  %4874 = vmatmul.msk.bf16.vlgmr.msrb.gmra.mxu2 %vm534_vm7, %v3295_v6 }
0x140d   :  { %v3435_v63 = vpack.c.b16 %v3434_v35, %v3434_v35 }
0x140f   :  { %3561 = vrot.lane.b32.xlu0 %v3435_v63, %s5718_s19  ;;  %3436 = vrot.lane.b32.xlu2 %v3435_v63, %s5724_s6 }
0x1417   :  { %3679 = vrot.lane.b32.xlu0 %v3440_v39, %s5722_s5  ;;  %3563 = vrot.lane.b32.xlu2 %v3440_v39, %s5718_s19 }
0x141f   :  { %3677 = vrot.lane.b32.xlu0 %v3435_v63, %s5722_s5  ;;  %3656 = vrot.lane.b32.xlu2 %v3411_v12, %s5722_s5 }
0x1427   :  { %3654 = vrot.lane.b32.xlu2 %v3406_v13, %s5722_s5  ;;  %v3289_v13 = vpop.f32.mrf.mxu0 }
0x1428   :  { %v3290_v3 = vadd.f32 %v3289_v13, %v3183_v61 }
0x142a   :  { %v3364_v6 = vpack.c.bf16 %v3290_v3, %v3290_v3 }
0x142c   :  { %v3370_v50 = vsel %vm607_vm8, %v3364_v6, 0  ;;  %v3491_v23 = vunpack.c.l.b16 %v3364_v6 }
0x142d   :  { %3379 = vmatpush.bf16.msra.mxu3 %v3370_v50 }
0x142e   :  { %v6323_v28 = vpack.c.b16 %v3491_v23, %v3491_v23 }
0x142f   :  { %v3291_v5 = vpop.f32.mrf.mxu0 }
0x1430   :  { %v3292_v35 = vadd.f32 %v3291_v5, %v3183_v61 }
0x1432   :  { %v3365_v7 = vpack.c.bf16 %v3292_v35, %v3292_v35 }
0x1434   :  { %v3389_v10 = vsel %vm607_vm8, %v3365_v7, 0 }
0x1435   :  { %3398 = vmatpush.bf16.msrb.mxu0 %v3389_v10 }
0x1461   :  { %v3408_v62 = vpop.permute.xlu2 %3407 }
0x1462   :  { %4877 = vmatmul.msk.bf16.vlgmr.msra.gmra.mxu1 %vm534_vm7, %v3408_v62 }
0x1469   :  { %v3437_v36 = vpop.permute.xlu2 %3436 }
0x146a   :  { %4878 = vmatmul.msk.bf16.vlgmr.msra.gmra.mxu2 %vm534_vm7, %v3437_v36 }
0x1471   :  { %v3564_v37 = vpop.permute.xlu2 %3563 }
0x1472   :  { %v3569_v52 = vsel %vm534_vm7, %v3564_v37, 0 }
0x1473   :  { %3578 = vmatpush.bf16.xpose.msrb.mxu2 %v3569_v52 }
0x1479   :  { %v3539_v41 = vpop.permute.xlu1 %3538  ;;  %v3657_v59 = vpop.permute.xlu2 %3656 }
0x147a   :  { %v3662_v12 = vsel %vm534_vm7, %v3657_v59, 0  ;;  %4881 = vmatmul.msk.bf16.vlgmr.msrb.gmra.mxu1 %vm534_vm7, %v3539_v41 }
0x147b   :  { %3671 = vmatpush.bf16.xpose.msra.mxu1 %v3662_v12 }
0x1480   :  { %v3313_v18 = vpop.f32.mrf.mxu1 }
0x1481   :  { %v3336_v45 = vmul.f32 0.088388346, %v3313_v18  ;;  %v3562_v30 = vpop.permute.xlu0 %3561  ;;  %v3655_v54 = vpop.permute.xlu2 %3654 }
0x1482   :  { %4882 = vmatmul.msk.bf16.vlgmr.msrb.gmra.mxu2 %vm534_vm7, %v3562_v30 }
0x1483   :  { %v3338_v26 = vadd.f32 %v3336_v45, %v6015_v47 }
0x1485   :  { %v3340_v34 = vsel %vm577_vm10, %v3338_v26, -inf }
0x1486   :  { %3341 = vmax.xlane.f32.xlu2 %v3340_v34 }
0x1488   :  { %v3315_v49 = vpop.f32.mrf.mxu1 }
0x1489   :  { %v3680_v46 = vpop.permute.xlu0 %3679 }
0x148a   :  { %v3685_v55 = vsel %vm534_vm7, %v3680_v46, 0  ;;  %4885 = vmatmul.msk.bf16.vlgmr.msra.gmra.mxu1 %vm534_vm7, %v3655_v54  ;;  %v3515_v54 = vunpack.c.l.b16 %v3365_v7 }
0x148b   :  { %3694 = vmatpush.bf16.xpose.msra.mxu2 %v3685_v55 }
0x148c   :  { %v3516_v46 = vpack.c.b16 %v3515_v54, %v3515_v54 }
0x148e   :  { %v3332_v39 = vpop.f32.mrf.mxu2 }
0x148f   :  { %v3337_v42 = vmul.f32 0.088388346, %v3332_v39 }
0x1491   :  { %v3339_v51 = vadd.f32 %v3337_v42, %v6023_v11  ;;  %v3678_v57 = vpop.permute.xlu0 %3677 }
0x1492   :  { %4886 = vmatmul.msk.bf16.vlgmr.msra.gmra.mxu2 %vm534_vm7, %v3678_v57 }
0x1493   :  { %v3343_v58 = vsel %vm577_vm10, %v3339_v51, -inf }
0x1494   :  { %3344 = vmax.xlane.f32.xlu1 %v3343_v58 }
0x1496   :  { %v3334_v60 = vpop.f32.mrf.mxu2 }
0x14df   :  { %v3429_v15 = vpop.f32.mrf.mxu1 }
0x14e0   :  { %v3462_v2 = vmul.f32 0.088388346, %v3429_v15 }
0x14e2   :  { %v6314_v4 = vadd.f32 %v3462_v2, %v6015_v47 }
0x14e4   :  { %v3466_v63 = vsel %vm577_vm10, %v6314_v4, -inf }
0x14e5   :  { %3467 = vmax.xlane.f32.xlu0 %v3466_v63 }
0x14e7   :  { %v3431_v48 = vpop.f32.mrf.mxu1 }
0x14ed   :  { %v3458_v43 = vpop.f32.mrf.mxu2 }
0x14ee   :  { %v3463_v14 = vmul.f32 0.088388346, %v3458_v43 }
0x14f0   :  { %v3465_v16 = vadd.f32 %v3463_v14, %v6023_v11 }
0x14f2   :  { %v3469_v19 = vsel %vm577_vm10, %v3465_v16, -inf }
0x14f3   :  { %3470 = vmax.xlane.f32.xlu2 %v3469_v19 }
0x14f5   :  { %v3460_v20 = vpop.f32.mrf.mxu2 }
0x14f7   :  { %v3557_v21 = vpop.f32.mrf.mxu1 }
0x14f8   :  { %v3584_v24 = vmul.f32 0.088388346, %v3557_v21 }
0x14f9   :  { %v3342_v53 = vpop.xlane.xlu2 %3341 }
0x14fa   :  { %v3346_v38 = vsub.f32 %v3338_v26, %v3342_v53  ;;  %v3586_v17 = vadd.f32 %v3584_v24, %v6015_v47 }
0x14fc   :  { %v3348_v22 = vmul.f32 1.442695, %v3346_v38  ;;  %v3588_v33 = vsel %vm577_vm10, %v3586_v17, -inf }
0x14fe   :  { %5439 = vpow2.f32 %v3348_v22 }
0x14ff   :  { %v3559_v0 = vpop.f32.mrf.mxu1 }
0x1504   :  { %v5440_v56 = vpop.eup %5439 }
0x1505   :  { %v3580_v25 = vpop.f32.mrf.mxu2  ;;  %v3352_v1 = vsel %vm577_vm10, %v5440_v56, 0.0 }
0x1506   :  { %v3585_v27 = vmul.f32 0.088388346, %v3580_v25  ;;  %3353 = vadd.xlane.f32.xlu1 %v3352_v1 }
0x1507   :  { %v3673_v40 = vpop.f32.mrf.mxu1  ;;  %v3345_v12 = vpop.xlane.xlu1 %3344 }
0x1508   :  { %v3587_v29 = vadd.f32 %v3585_v27, %v6023_v11  ;;  %v3347_v18 = vsub.f32 %v3339_v51, %v3345_v12  ;;  %v3700_v26 = vmul.f32 0.088388346, %v3673_v40 }
0x150a   :  { %v3591_v31 = vsel %vm577_vm10, %v3587_v29, -inf  ;;  %v3350_v45 = vmul.f32 1.442695, %v3347_v18  ;;  %v3702_v49 = vadd.f32 %v3700_v26, %v6015_v47 }
0x150b   :  { %3493 = vrot.lane.b32.xlu2 %v6323_v28, %s5724_s6  ;;  %3592 = vmax.xlane.f32.xlu0 %v3591_v31 }
0x150c   :  { %5441 = vpow2.f32 %v3350_v45 }
0x150d   :  { %v3582_v32 = vpop.f32.mrf.mxu2 }
0x150e   :  { %3589 = vmax.xlane.f32.xlu1 %v3588_v33 }
0x150f   :  { %v3675_v62 = vpop.f32.mrf.mxu1 }
0x1512   :  { %v5442_v30 = vpop.eup %5441 }
0x1513   :  { %v3355_v34 = vsel %vm577_vm10, %v5442_v30, 0.0 }
0x1515   :  { %v3696_v36 = vpop.f32.mrf.mxu2 }
0x1516   :  { %v3701_v37 = vmul.f32 0.088388346, %v3696_v36 }
0x1518   :  { %v3703_v52 = vadd.f32 %v3701_v37, %v6023_v11  ;;  %v3704_v11 = vsel %vm577_vm10, %v3702_v49, -inf }
0x151a   :  { %v3707_v41 = vsel %vm577_vm10, %v3703_v52, -inf }
0x151b   :  { %3708 = vmax.xlane.f32.xlu0 %v3707_v41 }
0x151d   :  { %v3698_v59 = vpop.f32.mrf.mxu2 }
0x152f   :  { %3612 = vrot.lane.b32.xlu0 %v6323_v28, %s5718_s19 }
0x1534   :  { %3356 = vadd.xlane.f32.xlu2 %v3355_v34 }
0x153c   :  { %3705 = vmax.xlane.f32.xlu2 %v3704_v11 }
0x1554   :  { %3633 = vrot.lane.b32.xlu2 %v3516_v46, %s5718_s19 }
0x1558   :  { %v3468_v55 = vpop.xlane.xlu0 %3467 }
0x1559   :  { %v3472_v39 = vsub.f32 %v6314_v4, %v3468_v55 }
0x155b   :  { %v3474_v42 = vmul.f32 1.442695, %v3472_v39 }
0x155d   :  { %5443 = vpow2.f32 %v3474_v42 }
0x1563   :  { %v5444_v51 = vpop.eup %5443 }
0x1564   :  { %v3478_v57 = vsel %vm577_vm10, %v5444_v51, 0.0 }
0x1565   :  { %3479 = vadd.xlane.f32.xlu1 %v3478_v57 }
0x1566   :  { %v3471_v58 = vpop.xlane.xlu2 %3470 }
0x1567   :  { %v3473_v60 = vsub.f32 %v3465_v16, %v3471_v58 }
0x1569   :  { %v3476_v13 = vmul.f32 1.442695, %v3473_v60 }
0x156b   :  { %5445 = vpow2.f32 %v3476_v13 }
0x156e   :  { %v3494_v47 = vpop.permute.xlu2 %3493 }
0x156f   :  { %v3499_v15 = vsel %vm607_vm8, %v3494_v47, 0 }
0x1570   :  { %3508 = vmatpush.bf16.msrb.mxu3 %v3499_v15 }
0x1571   :  { %v5446_v61 = vpop.eup %5445 }
0x1572   :  { %v3481_v2 = vsel %vm577_vm10, %v5446_v61, 0.0 }
0x1573   :  { %3482 = vadd.xlane.f32.xlu0 %v3481_v2 }
0x1579   :  { %v3354_v3 = vpop.xlane.xlu1 %3353 }
0x157a   :  { %5447 = vrcp.f32 %v3354_v3 }
0x157e   :  { %3517 = vrot.lane.b32.xlu1 %v3516_v46, %s5724_s6  ;;  %v3593_v6 = vpop.xlane.xlu0 %3592 }
0x157f   :  { %v3595_v7 = vsub.f32 %v3587_v29, %v3593_v6 }
0x1580   :  { %v5448_v4 = vpop.eup %5447 }
0x1581   :  { %v3360_v5 = vmul.f32 %v5448_v4, %v5440_v56  ;;  %v3590_v35 = vpop.xlane.xlu1 %3589  ;;  %v3598_v10 = vmul.f32 1.442695, %v3595_v7 }
0x1582   :  { %v3594_v63 = vsub.f32 %v3586_v17, %v3590_v35 }
0x1583   :  { %v3362_v50 = vpack.c.bf16 %v3360_v5, %v3360_v5 }
0x1584   :  { %v3596_v48 = vmul.f32 1.442695, %v3594_v63 }
0x1585   :  { %4875 = vmatmul.msk.bf16.vlgmr.msra.gmra.mxu3 %vm577_vm10, %v3362_v50 }
0x1586   :  { %5449 = vpow2.f32 %v3596_v48 }
0x1587   :  { %5451 = vpow2.f32 %v3598_v10 }
0x158c   :  { %v5450_v43 = vpop.eup %5449 }
0x158d   :  { %v3600_v14 = vsel %vm577_vm10, %v5450_v43, 0.0  ;;  %v5452_v21 = vpop.eup %5451 }
0x158e   :  { %3601 = vadd.xlane.f32.xlu0 %v3600_v14  ;;  %v3709_v16 = vpop.xlane.xlu0 %3708  ;;  %v3603_v53 = vsel %vm577_vm10, %v5452_v21, 0.0 }
0x158f   :  { %v3711_v19 = vsub.f32 %v3703_v52, %v3709_v16 }
0x1591   :  { %v3714_v20 = vmul.f32 1.442695, %v3711_v19 }
0x1593   :  { %5453 = vpow2.f32 %v3714_v20 }
0x1596   :  { %3604 = vadd.xlane.f32.xlu0 %v3603_v53 }
0x1599   :  { %v5454_v38 = vpop.eup %5453 }
0x159a   :  { %v3719_v22 = vsel %vm577_vm10, %v5454_v38, 0.0 }
0x159b   :  { %3720 = vadd.xlane.f32.xlu2 %v3719_v22 }
0x15a1   :  { %v3613_v0 = vpop.permute.xlu0 %3612 }
0x15a2   :  { %v3618_v23 = vsel %vm607_vm8, %v3613_v0, 0 }
0x15a3   :  { %3627 = vmatpush.bf16.msra.mxu3 %v3618_v23  ;;  %v5206_v23 = vld [vmem:[#allocation10 + $0x3ec] sm:$0xf] }
0x15a7   :  { %v3357_v56 = vpop.xlane.xlu2 %3356 }
0x15a8   :  { %5455 = vrcp.f32 %v3357_v56  ;;  %v4917_v56 = vld [vmem:[#allocation10 + $0x3f8] sm:$0xf0] }
0x15aa   :  { %3728 = vrot.lane.b32.xlu0 %v6323_v28, %s5722_s5 }
0x15ae   :  { %v5456_v24 = vpop.eup %5455 }
0x15af   :  { %v3361_v25 = vmul.f32 %v5456_v24, %v5442_v30  ;;  %v3706_v1 = vpop.xlane.xlu2 %3705  ;;  %v5202_v24 = vld [vmem:[#allocation10 + $0x3cc] sm:$0xf] }
0x15b0   :  { %v3710_v27 = vsub.f32 %v3702_v49, %v3706_v1  ;;  %v4913_v1 = vld [vmem:[#allocation10 + $0x3d8] sm:$0xf0] }
0x15b1   :  { %v3363_v40 = vpack.c.bf16 %v3361_v25, %v3361_v25  ;;  %v4920_v25 = vor.u32 %v5206_v23, %v4917_v56  ;;  %v5221_v23 = vld [vmem:[#allocation11 + $0xe4] sm:$0xf] }
0x15b2   :  { %v3712_v29 = vmul.f32 1.442695, %v3710_v27  ;;  %3749 = vrot.lane.b32.xlu0 %v3516_v46, %s5722_s5  ;;  %v4916_v27 = vor.u32 %v5202_v24, %v4913_v1  ;;  %v4973_v24 = vld [vmem:[#allocation11 + $0xe8] sm:$0xf0]  ;;  %v4963_v1 = vld [vmem:[#allocation11 + $0xd0] sm:$0xf] }
0x15b3   :  { %4876 = vmatmul.msk.bf16.vlgmr.msrb.gmra.mxu0 %vm577_vm10, %v3363_v40  ;;  %3833 = vmatpush.bf16.msrb.mxu1 %v4920_v25  ;;  %v5198_v40 = vld [vmem:[#allocation10 + $0x3ac] sm:$0xf]  ;;  %v4976_v25 = vor.u32 %v5221_v23, %v4973_v24 }
0x15b4   :  { %5457 = vpow2.f32 %v3712_v29  ;;  %v4909_v29 = vld [vmem:[#allocation10 + $0x3b8] sm:$0xf0] }
0x15b7   :  { %v3634_v52 = vpop.permute.xlu2 %3633  ;;  %3834 = vmatpush.bf16.msrb.mxu1 %v4916_v27  ;;  %v5220_v27 = vld [vmem:[#allocation11 + $0xd4] sm:$0xf0] }
0x15b8   :  { %v3639_v18 = vsel %vm607_vm8, %v3634_v52, 0  ;;  %v4897_v52 = vld [vmem:[#allocation10 + $0x358] sm:$0xf0] }
0x15ba   :  { %v5458_v17 = vpop.eup %5457 }
0x15bb   :  { %v3716_v31 = vsel %vm577_vm10, %v5458_v17, 0.0 }
0x15bc   :  { %3717 = vadd.xlane.f32.xlu1 %v3716_v31  ;;  %v5194_v31 = vld [vmem:[#allocation10 + $0x38c] sm:$0xf] }
0x15d8   :  { %v3480_v32 = vpop.xlane.xlu1 %3479 }
0x15d9   :  { %5459 = vrcp.f32 %v3480_v32  ;;  %v4905_v32 = vld [vmem:[#allocation10 + $0x398] sm:$0xf0] }
0x15df   :  { %v5460_v33 = vpop.eup %5459 }
0x15e0   :  { %v3486_v62 = vmul.f32 %v5460_v33, %v5444_v51  ;;  %v4908_v33 = vor.u32 %v5194_v31, %v4905_v32  ;;  %v4955_v32 = vld [vmem:[#allocation11 + $0xc0] sm:$0xf] }
0x15e2   :  { %v3488_v28 = vpack.c.bf16 %v3486_v62, %v3486_v62  ;;  %v5190_v62 = vld [vmem:[#allocation10 + $0x36c] sm:$0xf] }
0x15e4   :  { %4879 = vmatmul.msk.bf16.vlgmr.msrb.gmra.mxu3 %vm577_vm10, %v3488_v28  ;;  %v4901_v28 = vld [vmem:[#allocation10 + $0x378] sm:$0xf0] }
0x15e6   :  { %v3483_v36 = vpop.xlane.xlu0 %3482 }
0x15e7   :  { %5461 = vrcp.f32 %v3483_v36  ;;  %v4904_v36 = vor.u32 %v5190_v62, %v4901_v28  ;;  %v5217_v62 = vld [vmem:[#allocation11 + $0xc4] sm:$0xf] }
0x15ed   :  { %v5462_v37 = vpop.eup %5461 }
0x15ee   :  { %v3487_v41 = vmul.f32 %v5462_v37, %v5446_v61  ;;  %v5186_v37 = vld [vmem:[#allocation10 + $0x34c] sm:$0xf] }
0x15f0   :  { %v3518_v59 = vpop.permute.xlu1 %3517  ;;  %v3489_v45 = vpack.c.bf16 %v3487_v41, %v3487_v41  ;;  %v4900_v41 = vor.u32 %v5186_v37, %v4897_v52  ;;  %v4947_v52 = vld [vmem:[#allocation11 + $0xb0] sm:$0xf] }
0x15f1   :  { %v3523_v12 = vsel %vm607_vm8, %v3518_v59, 0  ;;  %v5182_v59 = vld [vmem:[#allocation10 + $0x32c] sm:$0xf] }
0x15f2   :  { %3532 = vmatpush.bf16.msra.mxu0 %v3523_v12  ;;  %v4893_v12 = vld [vmem:[#allocation10 + $0x338] sm:$0xf0] }
0x15f5   :  { %4880 = vmatmul.msk.bf16.vlgmr.msra.gmra.mxu0 %vm577_vm10, %v3489_v45  ;;  %v5178_v45 = vld [vmem:[#allocation10 + $0x30c] sm:$0xf] }
0x15f6   :  { %3648 = vmatpush.bf16.msrb.mxu0 %v3639_v18  ;;  %v4896_v18 = vor.u32 %v5182_v59, %v4893_v12  ;;  %v5215_v59 = vld [vmem:[#allocation11 + $0xb4] sm:$0xf] }
0x1601   :  { %v3602_v30 = vpop.xlane.xlu0 %3601 }
0x1602   :  { %5463 = vrcp.f32 %v3602_v30  ;;  %v4889_v30 = vld [vmem:[#allocation10 + $0x318] sm:$0xf0] }
0x1608   :  { %v5464_v26 = vpop.eup %5463  ;;  %v6358_v34 = vpop.f32.mrf.mxu3 }
0x1609   :  { %v3608_v49 = vmul.f32 %v5464_v26, %v5450_v43  ;;  %v3605_v11 = vpop.xlane.xlu0 %3604  ;;  %v4892_v26 = vor.u32 %v5178_v45, %v4889_v30  ;;  %v4939_v30 = vld [vmem:[#allocation11 + $0xa0] sm:$0xf] }
0x160a   :  { %5465 = vrcp.f32 %v3605_v11 }
0x160b   :  { %v3610_v54 = vpack.c.bf16 %v3608_v49, %v3608_v49 }
0x160d   :  { %4883 = vmatmul.msk.bf16.vlgmr.msra.gmra.mxu3 %vm577_vm10, %v3610_v54 }
0x160e   :  { %v3721_v51 = vpop.xlane.xlu2 %3720 }
0x160f   :  { %5467 = vrcp.f32 %v3721_v51 }
0x1610   :  { %v5466_v46 = vpop.eup %5465  ;;  %v3383_v55 = vpop.f32.mrf.mxu3 }
0x1611   :  { %v3609_v39 = vmul.f32 %v5466_v46, %v5452_v21 }
0x1613   :  { %v3611_v42 = vpack.c.bf16 %v3609_v39, %v3609_v39 }
0x1615   :  { %4884 = vmatmul.msk.bf16.vlgmr.msrb.gmra.mxu0 %vm577_vm10, %v3611_v42  ;;  %v5468_v60 = vpop.eup %5467 }
0x1616   :  { %v3725_v13 = vmul.f32 %v5468_v60, %v5454_v38 }
0x1618   :  { %v3727_v61 = vpack.c.bf16 %v3725_v13, %v3725_v13 }
0x161c   :  { %v3729_v57 = vpop.permute.xlu0 %3728 }
0x161d   :  { %v3734_v58 = vsel %vm607_vm8, %v3729_v57, 0 }
0x161e   :  { %3743 = vmatpush.bf16.msrb.mxu3 %v3734_v58 }
0x1624   :  { %v3750_v47 = vpop.permute.xlu0 %3749 }
0x1625   :  { %v3755_v15 = vsel %vm607_vm8, %v3750_v47, 0 }
0x1626   :  { %3764 = vmatpush.bf16.msra.mxu0 %v3755_v15 }
0x1629   :  { %4888 = vmatmul.msk.bf16.vlgmr.msra.gmra.mxu0 %vm577_vm10, %v3727_v61 }
0x162f   :  { %v3718_v2 = vpop.xlane.xlu1 %3717 }
0x1630   :  { %5469 = vrcp.f32 %v3718_v2  ;;  %v6365_v3 = vpop.f32.mrf.mxu0 }
0x1636   :  { %v5470_v4 = vpop.eup %5469 }
0x1637   :  { %v3724_v5 = vmul.f32 %v5470_v4, %v5458_v17  ;;  %v4912_v17 = vor.u32 %v5198_v40, %v4909_v29  ;;  %v2292_v4 = vld [vmem:[#allocation14 + $0x3b] ss:$0 sm:$0xff]  ;;  %v5219_v40 = vld [vmem:[#allocation11 + $0xd4] sm:$0xf]  ;;  %v4964_v29 = vor.u32 %v5220_v27, %v4963_v1 }
0x1638   :  { %v3402_v6 = vpop.f32.mrf.mxu0 }
0x1639   :  { %v3726_v35 = vpack.c.bf16 %v3724_v5, %v3724_v5  ;;  %3835 = vmatpush.bf16.msrb.mxu1 %v4912_v17  ;;  %v4965_v17 = vld [vmem:[#allocation11 + $0xd8] sm:$0xf0] }
0x163a   :  { %v4968_v31 = vor.u32 %v5219_v40, %v4965_v17  ;;  %v2283_v17 = vld [vmem:[#allocation14 + $0x21] ss:$0 sm:$0xff] }
0x163b   :  { %4887 = vmatmul.msk.bf16.vlgmr.msrb.gmra.mxu3 %vm577_vm10, %v3726_v35 }
0x163d   :  { %3836 = vmatpush.bf16.msrb.mxu1 %v4908_v33  ;;  %v5218_v33 = vld [vmem:[#allocation11 + $0xc4] sm:$0xf0] }
0x163e   :  { %v4956_v28 = vor.u32 %v5218_v33, %v4955_v32 }
0x1641   :  { %3837 = vmatpush.bf16.msrb.mxu1 %v4904_v36  ;;  %v4957_v36 = vld [vmem:[#allocation11 + $0xc8] sm:$0xf0] }
0x1642   :  { %v4960_v37 = vor.u32 %v5217_v62, %v4957_v36 }
0x1645   :  { %3838 = vmatpush.bf16.msrb.mxu1 %v4900_v41  ;;  %v5216_v41 = vld [vmem:[#allocation11 + $0xb4] sm:$0xf0] }
0x1646   :  { %v4948_v12 = vor.u32 %v5216_v41, %v4947_v52 }
0x1649   :  { %3839 = vmatpush.bf16.msrb.mxu1 %v4896_v18  ;;  %v4949_v18 = vld [vmem:[#allocation11 + $0xb8] sm:$0xf0] }
0x164a   :  { %v4952_v45 = vor.u32 %v5215_v59, %v4949_v18  ;;  %v5228_v59 = vld [vmem:[#allocation13 + $0x98] sm:$0xff]  ;;  %v5235_v18 = vld [vmem:[#allocation13 + $0xd0] sm:$0xff] }
0x164d   :  { %3840 = vmatpush.bf16.msrb.mxu1 %v4892_v26  ;;  %v5214_v26 = vld [vmem:[#allocation11 + $0xa4] sm:$0xf0] }
0x1667   :  { %v3510_v63 = vpop.f32.mrf.mxu3 }
0x166f   :  { %v3512_v50 = vpop.f32.mrf.mxu3 }
0x1672   :  { %v3534_v7 = vpop.f32.mrf.mxu0 }
0x1673   :  { %v5306_v48 = vpack.i.bf16 %v3534_v7, %v3510_v63 }
0x1675   :  { %5307 = vrot.lane.b32.xlu0 %v5306_v48, %s5722_s5 }
0x167a   :  { %v3536_v10 = vpop.f32.mrf.mxu0 }
0x1690   :  { %v3629_v43 = vpop.f32.mrf.mxu3 }
0x1692   :  { %v3650_v14 = vpop.f32.mrf.mxu0 }
0x1693   :  { %v5311_v16 = vpack.i.bf16 %v3650_v14, %v3629_v43 }
0x1695   :  { %5312 = vrot.lane.b32.xlu0 %v5311_v16, %s5718_s19  ;;  %v4979_v16 = vld [vmem:[#allocation11 + $0xf0] sm:$0xf] }
0x1698   :  { %v3631_v19 = vpop.f32.mrf.mxu3 }
0x1699   :  { %v5224_v19 = vld [vmem:[#allocation11 + $0xf4] sm:$0xf0] }
0x169a   :  { %v3652_v20 = vpop.f32.mrf.mxu0 }
0x169b   :  { %v5223_v20 = vld [vmem:[#allocation11 + $0xf4] sm:$0xf] }
0x16a6   :  { %v3766_v21 = vpop.f32.mrf.mxu0 }
0x16ae   :  { %v3768_v53 = vpop.f32.mrf.mxu0 }
0x16af   :  { %v4981_v53 = vld [vmem:[#allocation11 + $0xf8] sm:$0xf0] }
0x16be   :  { %v3745_v38 = vpop.f32.mrf.mxu3 }
0x16bf   :  { %v5316_v22 = vpack.i.bf16 %v3766_v21, %v3745_v38  ;;  %v4980_v21 = vor.u32 %v5224_v19, %v4979_v16  ;;  %v4984_v38 = vor.u32 %v5223_v20, %v4981_v53  ;;  %v5230_v19 = vld [vmem:[#allocation13 + $0xa8] sm:$0xff] }
0x16c0   :  { %v5238_v20 = vld [vmem:[#allocation13 + $0xe8] sm:$0xff] }
0x16c1   :  { %5317 = vrot.lane.b32.xlu1 %v5316_v22, %s5724_s6  ;;  %3981 = vmatpush.bf16.msrb.mxu2 %v4980_v21  ;;  %v4971_v22 = vld [vmem:[#allocation11 + $0xe0] sm:$0xf] }
0x16c2   :  { %3995 = vmatpush.bf16.msra.mxu3 %v4984_v38  ;;  %v5229_v38 = vld [vmem:[#allocation13 + $0xa0] sm:$0xff] }
0x16c6   :  { %v3747_v0 = vpop.f32.mrf.mxu3  ;;  %3996 = vmatpush.bf16.msra.mxu3 %v4976_v25 }
0x16c7   :  { %v5222_v0 = vld [vmem:[#allocation11 + $0xe4] sm:$0xf0] }
0x16c8   :  { %v4972_v56 = vor.u32 %v5222_v0, %v4971_v22  ;;  %v5237_v22 = vld [vmem:[#allocation13 + $0xe0] sm:$0xff] }
0x16ca   :  { %3982 = vmatpush.bf16.msrb.mxu2 %v4972_v56  ;;  %3997 = vmatpush.bf16.msra.mxu3 %v4968_v31 }
0x16ce   :  { %3983 = vmatpush.bf16.msrb.mxu2 %v4964_v29  ;;  %3998 = vmatpush.bf16.msra.mxu3 %v4960_v37 }
0x16d2   :  { %3984 = vmatpush.bf16.msrb.mxu2 %v4956_v28  ;;  %3999 = vmatpush.bf16.msra.mxu3 %v4952_v45  ;;  %v2284_v28 = vld [vmem:[#allocation14 + $0x29] ss:$0 sm:$0xff] }
0x16d3   :  { %v5226_v45 = vld [vmem:[#allocation13 + $0x88] sm:$0xff] }
0x16d6   :  { %3985 = vmatpush.bf16.msrb.mxu2 %v4948_v12  ;;  %v5236_v12 = vld [vmem:[#allocation13 + $0xd8] sm:$0xff] }
0x16e7   :  { %v5308_v49 = vpop.permute.xlu0 %5307 }
0x16e8   :  { %v5310_v54 = vunpack.i.h.bf16 %v5308_v49  ;;  %v5309_v46 = vunpack.i.l.bf16 %v5308_v49  ;;  %v5213_v49 = vld [vmem:[#allocation11 + $0xa4] sm:$0xf] }
0x16ea   :  { %v3795_v51 = vsel %vm534_vm7, %v6365_v3, %v5310_v54  ;;  %v3794_v57 = vsel %vm534_vm7, %v6358_v34, %v5309_v46  ;;  %v4941_v54 = vld [vmem:[#allocation11 + $0xa8] sm:$0xf0] }
0x16eb   :  { %v4944_v46 = vor.u32 %v5213_v49, %v4941_v54  ;;  %v2294_v49 = vld [vmem:[#allocation14 + $0x24] ss:$8 sm:$0x3] }
0x16ed   :  { %4000 = vmatpush.bf16.msra.mxu3 %v4944_v46  ;;  %v3897_v46 = vperm.slane %v2294_v49, 0 }
0x1707   :  { %v5313_v11 = vpop.permute.xlu0 %5312 }
0x1708   :  { %v5315_v55 = vunpack.i.h.bf16 %v5313_v11  ;;  %v5314_v39 = vunpack.i.l.bf16 %v5313_v11  ;;  %v4940_v11 = vor.u32 %v5214_v26, %v4939_v30  ;;  %v5234_v30 = vld [vmem:[#allocation13 + $0xc8] sm:$0xff]  ;;  %v5233_v26 = vld [vmem:[#allocation13 + $0xc0] sm:$0xff] }
0x170a   :  { %v3796_v13 = vsel %vm1035_vm12, %v3794_v57, %v5314_v39  ;;  %v3797_v47 = vsel %vm1035_vm12, %v3795_v51, %v5315_v55  ;;  %3986 = vmatpush.bf16.msrb.mxu2 %v4940_v11  ;;  %v4931_v55 = vld [vmem:[#allocation11 + $0x90] sm:$0xf]  ;;  %v5212_v39 = vld [vmem:[#allocation11 + $0x94] sm:$0xf0]  ;;  %v4933_v57 = vld [vmem:[#allocation11 + $0x98] sm:$0xf0] }
0x170b   :  { %v4932_v51 = vor.u32 %v5212_v39, %v4931_v55  ;;  %v3898_v55 = vperm.slane %v2294_v49, 1 }
0x170e   :  { %3987 = vmatpush.bf16.msrb.mxu2 %v4932_v51 }
0x1733   :  { %v5318_v42 = vpop.permute.xlu1 %5317 }
0x1734   :  { %v5320_v58 = vunpack.i.h.bf16 %v5318_v42  ;;  %v5319_v60 = vunpack.i.l.bf16 %v5318_v42  ;;  %v5211_v42 = vld [vmem:[#allocation11 + $0x94] sm:$0xf] }
0x1736   :  { %v3798_v15 = vsel %vm1038_vm13, %v3796_v13, %v5319_v60  ;;  %v3799_v61 = vsel %vm1038_vm13, %v3797_v47, %v5320_v58  ;;  %v4936_v58 = vor.u32 %v5211_v42, %v4933_v57  ;;  %v4923_v47 = vld [vmem:[#allocation11 + $0x80] sm:$0xf] }
0x1737   :  { %v3800_v2 = vpack.c.bf16 %v3799_v61, %v3798_v15  ;;  %v5210_v15 = vld [vmem:[#allocation11 + $0x84] sm:$0xf0]  ;;  %v5209_v61 = vld [vmem:[#allocation11 + $0x84] sm:$0xf] }
0x1738   :  { %4001 = vmatpush.bf16.msra.mxu3 %v4936_v58 }
0x1739   :  { %3841 = vmatmul.bf16.vlgmr.msrb.gmra.mxu1 %v3800_v2  ;;  %v4924_v2 = vor.u32 %v5210_v15, %v4923_v47 }
0x173b   :  { %3988 = vmatpush.bf16.msrb.mxu2 %v4924_v2 }
0x17b6   :  { %v3842_v5 = vpop.f32.mrf.mxu1 }
0x17b7   :  { %v3847_v6 = vadd.f32 %v3842_v5, %v6252_v44 }
0x17b9   :  { %v6380_v3 = vadd.f32 %v3847_v6, %v2292_v4 }
0x17bb   :  { %3851 = vadd.xlane.f32.xlu2 %v6380_v3 }
0x17be   :  { %v3844_v34 = vpop.f32.mrf.mxu1 }
0x17bf   :  { %v3848_v35 = vadd.f32 %v3844_v34, %v6256_v9  ;;  %v5232_v34 = vld [vmem:[#allocation13 + $0xb8] sm:$0xff] }
0x17c0   :  { %4111 = vmatpush.bf16.msrb.mxu0 %v5232_v34 }
0x17c1   :  { %v6384_v63 = vadd.f32 %v3848_v35, %v2292_v4  ;;  %v4925_v4 = vld [vmem:[#allocation11 + $0x88] sm:$0xf0]  ;;  %v5240_v35 = vld [vmem:[#allocation13 + $0xf8] sm:$0xff] }
0x17c2   :  { %v4928_v6 = vor.u32 %v5209_v61, %v4925_v4  ;;  %4125 = vmatpush.bf16.msra.mxu1 %v5240_v35  ;;  %v2285_v35 = vld [vmem:[#allocation14 + $0x31] ss:$0 sm:$0xff] }
0x17c3   :  { %3853 = vadd.xlane.f32.xlu0 %v6384_v63 }
0x17c4   :  { %4002 = vmatpush.bf16.msra.mxu3 %v4928_v6 }
0x182e   :  { %v3852_v50 = vpop.xlane.xlu2 %3851 }
0x182f   :  { %v3855_v7 = vmul.f32 %v3852_v50, %v5820_v8 }
0x1831   :  { %v6389_v48 = vsub.f32 %v6380_v3, %v3855_v7 }
0x1833   :  { %v3859_v44 = vmul.f32 %v6389_v48, %v6389_v48 }
0x1835   :  { %3861 = vadd.xlane.f32.xlu2 %v3859_v44  ;;  %v5231_v44 = vld [vmem:[#allocation13 + $0xb0] sm:$0xff] }
0x1836   :  { %v3854_v10 = vpop.xlane.xlu0 %3853  ;;  %4112 = vmatpush.bf16.msrb.mxu0 %v5231_v44 }
0x1837   :  { %v3856_v43 = vmul.f32 %v3854_v10, %v5820_v8  ;;  %v5239_v10 = vld [vmem:[#allocation13 + $0xf0] sm:$0xff] }
0x1838   :  { %4126 = vmatpush.bf16.msra.mxu1 %v5239_v10 }
0x1839   :  { %v6395_v14 = vsub.f32 %v6384_v63, %v3856_v43 }
0x183a   :  { %4113 = vmatpush.bf16.msrb.mxu0 %v5230_v19 }
0x183b   :  { %v3860_v9 = vmul.f32 %v6395_v14, %v6395_v14 }
0x183c   :  { %4127 = vmatpush.bf16.msra.mxu1 %v5238_v20 }
0x183d   :  { %3863 = vadd.xlane.f32.xlu2 %v3860_v9 }
0x183e   :  { %4114 = vmatpush.bf16.msrb.mxu0 %v5229_v38 }
0x1840   :  { %4128 = vmatpush.bf16.msra.mxu1 %v5237_v22 }
0x1842   :  { %4115 = vmatpush.bf16.msrb.mxu0 %v5228_v59  ;;  %v4144_v59 = vld [vmem:[#allocation14 + $0xd] ss:$0 sm:$0xff] }
0x1844   :  { %4129 = vmatpush.bf16.msra.mxu1 %v5236_v12 }
0x1848   :  { %4130 = vmatpush.bf16.msra.mxu1 %v5235_v18 }
0x184c   :  { %4131 = vmatpush.bf16.msra.mxu1 %v5234_v30 }
0x1850   :  { %4132 = vmatpush.bf16.msra.mxu1 %v5233_v26 }
0x18a8   :  { %v3862_v60 = vpop.xlane.xlu2 %3861 }
0x18a9   :  { %v3865_v13 = vmul.f32 %v3862_v60, %v5820_v8 }
0x18ab   :  { %v3867_v5 = vadd.f32 1e-06, %v3865_v13 }
0x18ad   :  { %5471 = vrsqrt.f32 %v3867_v5  ;;  %vm3875_vm8 = vweird.f32 %v3867_v5 }
0x18b0   :  { %v3864_v50 = vpop.xlane.xlu2 %3863 }
0x18b1   :  { %v3866_v7 = vmul.f32 %v3864_v50, %v5820_v8 }
0x18b3   :  { %v5472_v43 = vpop.eup %5471  ;;  %v3868_v9 = vadd.f32 1e-06, %v3866_v7 }
0x18b4   :  { %v3870_v16 = vmul.f32 %v5472_v43, %v3867_v5  ;;  %vm3876_vm7 = vweird.f32 %v5472_v43 }
0x18b5   :  { %5473 = vrsqrt.f32 %v3868_v9  ;;  %vm3877_vm10 = vmor %vm3875_vm8, %vm3876_vm7  ;;  %vm3885_vm13 = vweird.f32 %v3868_v9 }
0x18b6   :  { %v3871_v21 = vmul.f32 %v5472_v43, %v3870_v16 }
0x18b8   :  { %v3872_v53 = vmul.f32 0.5, %v3871_v21 }
0x18ba   :  { %v3873_v0 = vsub.f32 1.5, %v3872_v53 }
0x18bb   :  { %v5474_v23 = vpop.eup %5473 }
0x18bc   :  { %v3874_v56 = vmul.f32 %v5472_v43, %v3873_v0  ;;  %v3880_v24 = vmul.f32 %v5474_v23, %v3868_v9  ;;  %vm3886_vm12 = vweird.f32 %v5474_v23 }
0x18bd   :  { %vm3887_vm2 = vmor %vm3885_vm13, %vm3886_vm12 }
0x18be   :  { %v3881_v25 = vmul.f32 %v5474_v23, %v3880_v24  ;;  %v3878_v1 = vsel %vm3877_vm10, %v5472_v43, %v3874_v56 }
0x18bf   :  { %v3889_v29 = vmul.f32 %v3878_v1, %v6389_v48  ;;  %v5227_v48 = vld [vmem:[#allocation13 + $0x90] sm:$0xff] }
0x18c0   :  { %v3882_v27 = vmul.f32 0.5, %v3881_v25  ;;  %4116 = vmatpush.bf16.msrb.mxu0 %v5227_v48 }
0x18c1   :  { %v3891_v33 = vmul.f32 %v3889_v29, %v2283_v17 }
0x18c2   :  { %v3883_v40 = vsub.f32 1.5, %v3882_v27 }
0x18c3   :  { %v3893_v37 = vadd.f32 %v3891_v33, %v2284_v28 }
0x18c4   :  { %v3884_v31 = vmul.f32 %v5474_v23, %v3883_v40  ;;  %4117 = vmatpush.bf16.msrb.mxu0 %v5226_v45 }
0x18c6   :  { %v3888_v32 = vsel %vm3887_vm2, %v5474_v23, %v3884_v31 }
0x18c7   :  { %v3890_v62 = vmul.f32 %v3888_v32, %v6395_v14  ;;  %v5225_v14 = vld [vmem:[#allocation13 + $0x80] sm:$0xff] }
0x18c8   :  { %4118 = vmatpush.bf16.msrb.mxu0 %v5225_v14 }
0x18c9   :  { %v3892_v36 = vmul.f32 %v3890_v62, %v2283_v17 }
0x18cb   :  { %v3894_v52 = vadd.f32 %v3892_v36, %v2284_v28 }
0x18cd   :  { %v3895_v41 = vpack.c.bf16 %v3894_v52, %v3893_v37  ;;  %v4143_v37 = vld [vmem:[#allocation14 + $0x5] ss:$0 sm:$0xff] }
0x18cf   :  { %3989 = vmatmul.bf16.vlgmr.msrb.gmra.mxu2 %v3895_v41  ;;  %4003 = vmatmul.bf16.vlgmr.msra.gmra.mxu3 %v3895_v41 }
0x1952   :  { %v3990_v11 = vpop.f32.mrf.mxu2  ;;  %v4004_v54 = vpop.f32.mrf.mxu3 }
0x1953   :  { %v3991_v39 = vadd.f32 %v3990_v11, %v3897_v46  ;;  %v4005_v42 = vadd.f32 %v4004_v54, %v3898_v55 }
0x1955   :  { %v4009_v13 = vmax.f32 %v3991_v39, 0.0  ;;  %v4010_v47 = vmax.f32 %v4005_v42, 0.0 }
0x195a   :  { %v3992_v51 = vpop.f32.mrf.mxu2  ;;  %v4006_v57 = vpop.f32.mrf.mxu3 }
0x195b   :  { %v3993_v58 = vadd.f32 %v3992_v51, %v3897_v46  ;;  %v4007_v60 = vadd.f32 %v4006_v57, %v3898_v55 }
0x195d   :  { %v4011_v15 = vmax.f32 %v3993_v58, 0.0  ;;  %v4012_v61 = vmax.f32 %v4007_v60, 0.0 }
0x195f   :  { %v4013_v2 = vpack.c.bf16 %v4011_v15, %v4009_v13  ;;  %v4014_v4 = vpack.c.bf16 %v4012_v61, %v4010_v47 }
0x1961   :  { %4119 = vmatmul.bf16.vlgmr.msrb.gmra.mxu0 %v4013_v2  ;;  %4133 = vmatmul.bf16.vlgmr.msra.gmra.mxu1 %v4014_v4 }
0x19de   :  { %v4120_v5 = vpop.f32.mrf.mxu0  ;;  %v4134_v6 = vpop.f32.mrf.mxu1 }
0x19df   :  { %v4135_v34 = vadd.f32 %v4134_v6, %v4120_v5 }
0x19e1   :  { %v4139_v50 = vadd.f32 %v4135_v34, %v6380_v3 }
0x19e3   :  { %v4141_v7 = vadd.f32 %v4139_v50, %v2285_v35 }
0x19e5   :  { %4145 = vadd.xlane.f32.xlu1 %v4141_v7 }
0x19e6   :  { %v4122_v44 = vpop.f32.mrf.mxu0  ;;  %v4136_v10 = vpop.f32.mrf.mxu1 }
0x19e7   :  { %v4137_v43 = vadd.f32 %v4136_v10, %v4122_v44 }
0x19e9   :  { %v4140_v9 = vadd.f32 %v4137_v43, %v6384_v63 }
0x19eb   :  { %v4142_v16 = vadd.f32 %v4140_v9, %v2285_v35 }
0x19ed   :  { %4147 = vadd.xlane.f32.xlu2 %v4142_v16 }
0x1a58   :  { %v4146_v19 = vpop.xlane.xlu1 %4145 }
0x1a59   :  { %v4149_v20 = vmul.f32 %v4146_v19, %v5820_v8 }
0x1a5b   :  { %v4151_v21 = vsub.f32 %v4141_v7, %v4149_v20 }
0x1a5d   :  { %v4153_v53 = vmul.f32 %v4151_v21, %v4151_v21 }
0x1a5f   :  { %4155 = vadd.xlane.f32.xlu2 %v4153_v53 }
0x1a60   :  { %v4148_v38 = vpop.xlane.xlu2 %4147 }
0x1a61   :  { %v4150_v22 = vmul.f32 %v4148_v38, %v5820_v8 }
0x1a63   :  { %v4152_v0 = vsub.f32 %v4142_v16, %v4150_v22 }
0x1a65   :  { %v4154_v3 = vmul.f32 %v4152_v0, %v4152_v0 }
0x1a67   :  { %4157 = vadd.xlane.f32.xlu2 %v4154_v3 }
0x1ad2   :  { %v4156_v23 = vpop.xlane.xlu2 %4155 }
0x1ad3   :  { %v4159_v56 = vmul.f32 %v4156_v23, %v5820_v8 }
0x1ad5   :  { %v4161_v24 = vadd.f32 1e-06, %v4159_v56 }
0x1ad7   :  { %5475 = vrsqrt.f32 %v4161_v24  ;;  %vm4169_vm4 = vweird.f32 %v4161_v24 }
0x1ada   :  { %v4158_v63 = vpop.xlane.xlu2 %4157 }
0x1adb   :  { %v4160_v25 = vmul.f32 %v4158_v63, %v5820_v8 }
0x1add   :  { %v5476_v1 = vpop.eup %5475  ;;  %v4162_v27 = vadd.f32 1e-06, %v4160_v25 }
0x1ade   :  { %v4164_v40 = vmul.f32 %v5476_v1, %v4161_v24  ;;  %vm4170_vm3 = vweird.f32 %v5476_v1 }
0x1adf   :  { %5477 = vrsqrt.f32 %v4162_v27  ;;  %vm4171_vm5 = vmor %vm4169_vm4, %vm4170_vm3  ;;  %vm4179_vm9 = vweird.f32 %v4162_v27 }
0x1ae0   :  { %v4165_v29 = vmul.f32 %v5476_v1, %v4164_v40 }
0x1ae2   :  { %v4166_v17 = vmul.f32 0.5, %v4165_v29 }
0x1ae4   :  { %v4167_v31 = vsub.f32 1.5, %v4166_v17 }
0x1ae5   :  { %v5478_v32 = vpop.eup %5477 }
0x1ae6   :  { %v4168_v33 = vmul.f32 %v5476_v1, %v4167_v31  ;;  %v4174_v62 = vmul.f32 %v5478_v32, %v4162_v27  ;;  %vm4180_vm6 = vweird.f32 %v5478_v32 }
0x1ae7   :  { %vm4181_vm11 = vmor %vm4179_vm9, %vm4180_vm6 }
0x1ae8   :  { %v4172_v28 = vsel %vm4171_vm5, %v5476_v1, %v4168_v33  ;;  %v4175_v36 = vmul.f32 %v5478_v32, %v4174_v62 }
0x1ae9   :  { %v4183_v52 = vmul.f32 %v4172_v28, %v4151_v21 }
0x1aea   :  { %v4176_v41 = vmul.f32 0.5, %v4175_v36 }
0x1aeb   :  { %v4185_v8 = vmul.f32 %v4183_v52, %v4143_v37 }
0x1aec   :  { %v4177_v12 = vsub.f32 1.5, %v4176_v41 }
0x1aed   :  { %v4187_v48 = vadd.f32 %v4185_v8, %v4144_v59 }
0x1aee   :  { %v4178_v18 = vmul.f32 %v5478_v32, %v4177_v12 }
0x1aef   :  { %4189 = vst [vmem:[#allocation16] sm:$0xff] %v4187_v48 }
0x1af0   :  { %v4182_v45 = vsel %vm4181_vm11, %v5478_v32, %v4178_v18 }
0x1af1   :  { %v4184_v30 = vmul.f32 %v4182_v45, %v4152_v0 }
0x1af3   :  { %v4186_v14 = vmul.f32 %v4184_v30, %v4143_v37 }
0x1af5   :  { %v4188_v26 = vadd.f32 %v4186_v14, %v4144_v59 }
0x1af7   :  { %4190 = vst [vmem:[#allocation16 + $0x8] sm:$0xff] %v4188_v26 }
0x1af8   :  { %4203 = dma.vmem_to_hbm [thread:$0]  %s4196_s24, 256, %s4198_s0, [#allocation4], %s5708_s13, %s5708_s13, %s5709_s14  }
0x1af9   :  { %5705 = dma.done.wait [#allocation4], 256  }
0x1afa   :  { %5706 = vsyncadd [#allocation4], 4294967040 }
0x1afb   :  { %4208 = vsyncpa [#allocation3], 1 }
0x1afc   :  { %4209 = vsyncpa [#allocation6], 1 }
0x1afd   :  { %4210 = vsyncpa [#allocation9], 1 }
0x1afe   :  { %4211 = vsyncpa [#allocation12], 1 }
0x1aff   :  { %4212 = vsyncpa [#allocation15], 1 }
0x1b00   :  { %4213 = vsyncpa [#allocation4], 1 }

</bundles_post_ra>
